<compile_context>
chip_gen: v7x
topology: tpu7x:2x2x1
jax: 0.10.0
libtpu: 0.0.40
codegen_flags: <defaults>
</compile_context>

<pallas_src>
import functools

import numpy as np
import jax
import jax.numpy as jnp
from jax.experimental import pallas as pl
from jax.experimental.pallas import tpu as pltpu


def _rup(x, m):
    return ((x + m - 1) // m) * m


# ----------------------------------------------------------------------------
# Pallas kernel: fused chain  h = relu?(h @ M_i + b_i), whole network in one body
# ----------------------------------------------------------------------------
def _fused_mlp_kernel(*refs, relu_flags):
    # refs = (x_ref, M_0, b_0, M_1, b_1, ..., M_{L-1}, b_{L-1}, out_ref)
    o_ref = refs[-1]
    h = refs[0][...]                                    # [Mpad, Kpad0] f32
    for i, relu in enumerate(relu_flags):
        m = refs[1 + 2 * i][...]                        # [Kpad_i, Kpad_{i+1}]
        b = refs[2 + 2 * i][...]                        # [1, Kpad_{i+1}] -> broadcasts
        h = jnp.dot(h, m, preferred_element_type=jnp.float32) + b
        if relu:
            h = jnp.maximum(h, 0.0)
    o_ref[...] = h.astype(o_ref.dtype)


def fused_forward(x2d, mats, relu_flags, in_dim, out_dim):
    """x2d: [N, in_dim] f32. mats: list of (M [Kp_i, Kp_{i+1}], b [1, Kp_{i+1}])
    jnp arrays, already zero-padded to (8,128)-aligned shapes."""
    N = x2d.shape[0]
    m_pad = _rup(max(N, 8), 8)
    in_pad = mats[0][0].shape[0]
    xp = jnp.zeros((m_pad, in_pad), jnp.float32).at[:N, :in_dim].set(
        x2d.astype(jnp.float32))

    inputs = [xp]
    in_specs = [pl.BlockSpec((m_pad, in_pad), lambda i: (0, 0))]
    for (m, b) in mats:
        inputs += [m, b]
        in_specs += [pl.BlockSpec(m.shape, lambda i: (0, 0)),
                     pl.BlockSpec(b.shape, lambda i: (0, 0))]
    last_pad = mats[-1][0].shape[1]

    out = pl.pallas_call(
        functools.partial(_fused_mlp_kernel, relu_flags=relu_flags),
        out_shape=jax.ShapeDtypeStruct((m_pad, last_pad), jnp.float32),
        grid=(1,),
        in_specs=in_specs,
        out_specs=pl.BlockSpec((m_pad, last_pad), lambda i: (0, 0)),
        compiler_params=pltpu.CompilerParams(
            dimension_semantics=("arbitrary",)),
    )(*inputs)
    return out[:N, :out_dim]


# ----------------------------------------------------------------------------
# Init-time folding of Conv2d (PyTorch NCHW semantics) into a dense matmul
# ----------------------------------------------------------------------------
def _conv_to_dense(w, b, C, H, W, stride, padding):
    """conv2d(x, w, b, stride, padding).reshape(N,-1) == x.reshape(N,-1) @ T + bvec."""
    w = np.asarray(w, np.float32)
    b = np.asarray(b, np.float32)
    OC, Cw, KH, KW = w.shape
    assert Cw == C
    OH = (H + 2 * padding - KH) // stride + 1
    OW = (W + 2 * padding - KW) // stride + 1
    T = np.zeros((C * H * W, OC * OH * OW), np.float32)
    for oc in range(OC):
        for oh in range(OH):
            for ow in range(OW):
                oi = (oc * OH + oh) * OW + ow
                for c in range(C):
                    for kh in range(KH):
                        ih = oh * stride + kh - padding
                        if ih < 0 or ih >= H:
                            continue
                        for kw in range(KW):
                            iw = ow * stride + kw - padding
                            if iw < 0 or iw >= W:
                                continue
                            T[(c * H + ih) * W + iw, oi] = w[oc, c, kh, kw]
    bvec = np.repeat(b, OH * OW)
    return T, bvec, OH, OW


def _pad2(a, r, c):
    out = np.zeros((r, c), np.float32)
    out[:a.shape[0], :a.shape[1]] = a
    return out


def _pad1(a, c):
    out = np.zeros((1, c), np.float32)
    out[0, :a.shape[0]] = a
    return out


def build_fused_params(params, *, stride, padding, in_shape=(1, 28, 28)):
    """One-time pre-processing: fold every layer into a padded matmul chain."""
    C, H, W = in_shape
    mats, relu_flags = [], []
    in_dim = C * H * W
    cur_pad = _rup(in_dim, 128)
    for (cw, cb) in params["convs"]:
        T, bvec, OH, OW = _conv_to_dense(cw, cb, C, H, W, stride, padding)
        out_pad = _rup(T.shape[1], 128)
        mats.append((jnp.asarray(_pad2(T, cur_pad, out_pad)),
                     jnp.asarray(_pad1(bvec, out_pad))))
        relu_flags.append(True)
        C, H, W = cw.shape[0], OH, OW
        cur_pad = out_pad
    # fc1: weight pre-transposed at init (no runtime .T)
    w1t = np.asarray(params["fc1_w"], np.float32).T          # [feat, 256]
    out_pad = _rup(256, 128)
    mats.append((jnp.asarray(_pad2(w1t, cur_pad, out_pad)),
                 jnp.asarray(_pad1(np.asarray(params["fc1_b"], np.float32), out_pad))))
    relu_flags.append(False)
    cur_pad = out_pad
    # fc2
    w2t = np.asarray(params["fc2_w"], np.float32).T          # [256, 10]
    out_pad = _rup(10, 128)
    mats.append((jnp.asarray(_pad2(w2t, cur_pad, out_pad)),
                 jnp.asarray(_pad1(np.asarray(params["fc2_b"], np.float32), out_pad))))
    relu_flags.append(False)
    return mats, tuple(relu_flags), in_dim, 10


def cnn_forward(fused, x):
    mats, relu_flags, in_dim, out_dim = fused
    N = x.shape[0]
    return fused_forward(x.reshape(N, -1), mats, relu_flags, in_dim, out_dim)


# ----------------------------------------------------------------------------
# Parameter init (deterministic, synthetic) — same layout as the PyTorch module
# ----------------------------------------------------------------------------
def init_params(key, layers, padding, stride):
    params = {"convs": []}
    channel, length = 1, 28
    for _ in range(layers):
        key, kw_, kb_ = jax.random.split(key, 3)
        fan_in = channel * 4 * 4
        bound = 1.0 / jnp.sqrt(fan_in)
        w = jax.random.uniform(kw_, (3, channel, 4, 4), jnp.float32, -bound, bound)
        b = jax.random.uniform(kb_, (3,), jnp.float32, -bound, bound)
        params["convs"].append((w, b))
        channel = 3
        length = (length + 2 * padding - 4) // stride + 1
        assert length > 0
    feat = 3 * length * length

    key, k1w, k1b, k2w, k2b = jax.random.split(key, 5)
    bound1 = 1.0 / jnp.sqrt(feat)
    params["fc1_w"] = jax.random.uniform(k1w, (256, feat), jnp.float32, -bound1, bound1)
    params["fc1_b"] = jax.random.uniform(k1b, (256,), jnp.float32, -bound1, bound1)
    bound2 = 1.0 / jnp.sqrt(256)
    params["fc2_w"] = jax.random.uniform(k2w, (10, 256), jnp.float32, -bound2, bound2)
    params["fc2_b"] = jax.random.uniform(k2b, (10,), jnp.float32, -bound2, bound2)
    return params


# ----------------------------------------------------------------------------
# Pure-JAX reference (unfused, canonical conv) for a correctness check
# ----------------------------------------------------------------------------
def cnn_forward_ref(params, x, *, stride, padding):
    for (w, b) in params["convs"]:
        x = jax.lax.conv_general_dilated(
            x, w, window_strides=(stride, stride),
            padding=[(padding, padding), (padding, padding)],
            dimension_numbers=("NCHW", "OIHW", "NCHW"))
        x = jnp.maximum(x + b.reshape(1, -1, 1, 1), 0.0)
    N = x.shape[0]
    x = x.reshape(N, -1)
    x = x @ params["fc1_w"].T + params["fc1_b"]
    x = x @ params["fc2_w"].T + params["fc2_b"]
    return x


if __name__ == "__main__":
    LAYERS, PADDING, STRIDE = 2, 1, 2     # 28 -> 14 -> 7 ; features = 3*7*7 = 147
    BATCH = 2

    key = jax.random.PRNGKey(0)
    kx, kp = jax.random.split(key)
    x = jax.random.normal(kx, (BATCH, 1, 28, 28), jnp.float32)
    params = init_params(kp, LAYERS, PADDING, STRIDE)
    fused = build_fused_params(params, stride=STRIDE, padding=PADDING)

    fwd = jax.jit(lambda xx: cnn_forward(fused, xx))
    out = jax.block_until_ready(fwd(x))
    assert out.shape == (BATCH, 10), out.shape

    ref = cnn_forward_ref(params, x, stride=STRIDE, padding=PADDING)
    assert jnp.allclose(out, ref, atol=2e-4, rtol=2e-4), "mismatch vs reference"

    print("KERNEL_OK")
</pallas_src>

<mosaic_0001>
module attributes {stable_mosaic.version = 11 : i64} {
  func.func @_fused_mlp_kernel(%arg0: i32, %arg1: memref<8x896xf32, #tpu.memory_space<vmem>>, %arg2: memref<896x640xf32, #tpu.memory_space<vmem>>, %arg3: memref<1x640xf32, #tpu.memory_space<vmem>>, %arg4: memref<640x256xf32, #tpu.memory_space<vmem>>, %arg5: memref<1x256xf32, #tpu.memory_space<vmem>>, %arg6: memref<256x256xf32, #tpu.memory_space<vmem>>, %arg7: memref<1x256xf32, #tpu.memory_space<vmem>>, %arg8: memref<256x128xf32, #tpu.memory_space<vmem>>, %arg9: memref<1x128xf32, #tpu.memory_space<vmem>>, %arg10: memref<8x128xf32, #tpu.memory_space<vmem>>) attributes {dimension_semantics = [#tpu.dimension_semantics<arbitrary>], iteration_bounds = array<i64: 1>, scalar_prefetch = 0 : i64, scratch_operands = 0 : i64, tpu.core_type = #tpu.core_type<tc>, window_params = [{pipeline_mode = #tpu.pipeline_mode<synchronous>, transform_indices = @transform_0, window_bounds = array<i64: 8, 896>}, {pipeline_mode = #tpu.pipeline_mode<synchronous>, transform_indices = @transform_1, window_bounds = array<i64: 896, 640>}, {pipeline_mode = #tpu.pipeline_mode<synchronous>, transform_indices = @transform_2, window_bounds = array<i64: 1, 640>}, {pipeline_mode = #tpu.pipeline_mode<synchronous>, transform_indices = @transform_3, window_bounds = array<i64: 640, 256>}, {pipeline_mode = #tpu.pipeline_mode<synchronous>, transform_indices = @transform_4, window_bounds = array<i64: 1, 256>}, {pipeline_mode = #tpu.pipeline_mode<synchronous>, transform_indices = @transform_5, window_bounds = array<i64: 256, 256>}, {pipeline_mode = #tpu.pipeline_mode<synchronous>, transform_indices = @transform_6, window_bounds = array<i64: 1, 256>}, {pipeline_mode = #tpu.pipeline_mode<synchronous>, transform_indices = @transform_7, window_bounds = array<i64: 256, 128>}, {pipeline_mode = #tpu.pipeline_mode<synchronous>, transform_indices = @transform_8, window_bounds = array<i64: 1, 128>}, {pipeline_mode = #tpu.pipeline_mode<synchronous>, transform_indices = @transform_9, window_bounds = array<i64: 8, 128>}]} {
    %c0 = arith.constant 0 : index
    %c0_0 = arith.constant 0 : index
    %0 = vector.load %arg1[%c0, %c0_0] : memref<8x896xf32, #tpu.memory_space<vmem>>, vector<8x896xf32>
    %c0_1 = arith.constant 0 : index
    %c0_2 = arith.constant 0 : index
    %1 = vector.load %arg2[%c0_1, %c0_2] : memref<896x640xf32, #tpu.memory_space<vmem>>, vector<896x640xf32>
    %c0_3 = arith.constant 0 : index
    %c0_4 = arith.constant 0 : index
    %2 = vector.load %arg3[%c0_3, %c0_4] : memref<1x640xf32, #tpu.memory_space<vmem>>, vector<1x640xf32>
    %cst = arith.constant dense<0.000000e+00> : vector<8x640xf32>
    %3 = tpu.matmul %0, %1, %cst {dimension_numbers = #tpu.dot_dimension_numbers<[1], [0], [0], [1], [0, 0, 1, 1], [], []>} : vector<8x896xf32>, vector<896x640xf32>, vector<8x640xf32> -> vector<8x640xf32>
    %4 = vector.broadcast %2 : vector<1x640xf32> to vector<8x640xf32>
    %5 = arith.addf %3, %4 : vector<8x640xf32>
    %cst_5 = arith.constant 0.000000e+00 : f32
    %6 = vector.broadcast %cst_5 : f32 to vector<8x640xf32>
    %7 = arith.maximumf %5, %6 : vector<8x640xf32>
    %c0_6 = arith.constant 0 : index
    %c0_7 = arith.constant 0 : index
    %8 = vector.load %arg4[%c0_6, %c0_7] : memref<640x256xf32, #tpu.memory_space<vmem>>, vector<640x256xf32>
    %c0_8 = arith.constant 0 : index
    %c0_9 = arith.constant 0 : index
    %9 = vector.load %arg5[%c0_8, %c0_9] : memref<1x256xf32, #tpu.memory_space<vmem>>, vector<1x256xf32>
    %cst_10 = arith.constant dense<0.000000e+00> : vector<8x256xf32>
    %10 = tpu.matmul %7, %8, %cst_10 {dimension_numbers = #tpu.dot_dimension_numbers<[1], [0], [0], [1], [0, 0, 1, 1], [], []>} : vector<8x640xf32>, vector<640x256xf32>, vector<8x256xf32> -> vector<8x256xf32>
    %11 = vector.broadcast %9 : vector<1x256xf32> to vector<8x256xf32>
    %12 = arith.addf %10, %11 : vector<8x256xf32>
    %cst_11 = arith.constant 0.000000e+00 : f32
    %13 = vector.broadcast %cst_11 : f32 to vector<8x256xf32>
    %14 = arith.maximumf %12, %13 : vector<8x256xf32>
    %c0_12 = arith.constant 0 : index
    %c0_13 = arith.constant 0 : index
    %15 = vector.load %arg6[%c0_12, %c0_13] : memref<256x256xf32, #tpu.memory_space<vmem>>, vector<256x256xf32>
    %c0_14 = arith.constant 0 : index
    %c0_15 = arith.constant 0 : index
    %16 = vector.load %arg7[%c0_14, %c0_15] : memref<1x256xf32, #tpu.memory_space<vmem>>, vector<1x256xf32>
    %cst_16 = arith.constant dense<0.000000e+00> : vector<8x256xf32>
    %17 = tpu.matmul %14, %15, %cst_16 {dimension_numbers = #tpu.dot_dimension_numbers<[1], [0], [0], [1], [0, 0, 1, 1], [], []>} : vector<8x256xf32>, vector<256x256xf32>, vector<8x256xf32> -> vector<8x256xf32>
    %18 = vector.broadcast %16 : vector<1x256xf32> to vector<8x256xf32>
    %19 = arith.addf %17, %18 : vector<8x256xf32>
    %c0_17 = arith.constant 0 : index
    %c0_18 = arith.constant 0 : index
    %20 = vector.load %arg8[%c0_17, %c0_18] : memref<256x128xf32, #tpu.memory_space<vmem>>, vector<256x128xf32>
    %c0_19 = arith.constant 0 : index
    %c0_20 = arith.constant 0 : index
    %21 = vector.load %arg9[%c0_19, %c0_20] : memref<1x128xf32, #tpu.memory_space<vmem>>, vector<1x128xf32>
    %cst_21 = arith.constant dense<0.000000e+00> : vector<8x128xf32>
    %22 = tpu.matmul %19, %20, %cst_21 {dimension_numbers = #tpu.dot_dimension_numbers<[1], [0], [0], [1], [0, 0, 1, 1], [], []>} : vector<8x256xf32>, vector<256x128xf32>, vector<8x128xf32> -> vector<8x128xf32>
    %23 = vector.broadcast %21 : vector<1x128xf32> to vector<8x128xf32>
    %24 = arith.addf %22, %23 : vector<8x128xf32>
    %c0_22 = arith.constant 0 : index
    %c0_23 = arith.constant 0 : index
    %25 = vector.load %arg10[%c0_22, %c0_23] : memref<8x128xf32, #tpu.memory_space<vmem>>, vector<8x128xf32>
    tpu.vector_store %arg10[%c0_22, %c0_23], %24 {strides = array<i32>} : memref<8x128xf32, #tpu.memory_space<vmem>>, vector<8x128xf32>,
    return
  }
  func.func @transform_0(%arg0: i32) -> (i32, i32) {
    %c0_i32 = arith.constant 0 : i32
    %c0_i32_0 = arith.constant 0 : i32
    %c0_i32_1 = arith.constant 0 : i32
    return %c0_i32, %c0_i32_0 : i32, i32
  }
  func.func @transform_1(%arg0: i32) -> (i32, i32) {
    %c0_i32 = arith.constant 0 : i32
    %c0_i32_0 = arith.constant 0 : i32
    %c0_i32_1 = arith.constant 0 : i32
    return %c0_i32, %c0_i32_0 : i32, i32
  }
  func.func @transform_2(%arg0: i32) -> (i32, i32) {
    %c0_i32 = arith.constant 0 : i32
    %c0_i32_0 = arith.constant 0 : i32
    %c0_i32_1 = arith.constant 0 : i32
    return %c0_i32, %c0_i32_0 : i32, i32
  }
  func.func @transform_3(%arg0: i32) -> (i32, i32) {
    %c0_i32 = arith.constant 0 : i32
    %c0_i32_0 = arith.constant 0 : i32
    %c0_i32_1 = arith.constant 0 : i32
    return %c0_i32, %c0_i32_0 : i32, i32
  }
  func.func @transform_4(%arg0: i32) -> (i32, i32) {
    %c0_i32 = arith.constant 0 : i32
    %c0_i32_0 = arith.constant 0 : i32
    %c0_i32_1 = arith.constant 0 : i32
    return %c0_i32, %c0_i32_0 : i32, i32
  }
  func.func @transform_5(%arg0: i32) -> (i32, i32) {
    %c0_i32 = arith.constant 0 : i32
    %c0_i32_0 = arith.constant 0 : i32
    %c0_i32_1 = arith.constant 0 : i32
    return %c0_i32, %c0_i32_0 : i32, i32
  }
  func.func @transform_6(%arg0: i32) -> (i32, i32) {
    %c0_i32 = arith.constant 0 : i32
    %c0_i32_0 = arith.constant 0 : i32
    %c0_i32_1 = arith.constant 0 : i32
    return %c0_i32, %c0_i32_0 : i32, i32
  }
  func.func @transform_7(%arg0: i32) -> (i32, i32) {
    %c0_i32 = arith.constant 0 : i32
    %c0_i32_0 = arith.constant 0 : i32
    %c0_i32_1 = arith.constant 0 : i32
    return %c0_i32, %c0_i32_0 : i32, i32
  }
  func.func @transform_8(%arg0: i32) -> (i32, i32) {
    %c0_i32 = arith.constant 0 : i32
    %c0_i32_0 = arith.constant 0 : i32
    %c0_i32_1 = arith.constant 0 : i32
    return %c0_i32, %c0_i32_0 : i32, i32
  }
  func.func @transform_9(%arg0: i32) -> (i32, i32) {
    %c0_i32 = arith.constant 0 : i32
    %c0_i32_0 = arith.constant 0 : i32
    %c0_i32_1 = arith.constant 0 : i32
    return %c0_i32, %c0_i32_0 : i32, i32
  }
}

</mosaic_0001>

<bundles_post_ra>
// kernel: _lambda_.1
= control target key start
LH: loop header
LB: loop body
LE: loop exit
PB: predicated region body
PF: predicated region fallthrough
CT: control target
= control target key end

     0   :  { %14 = vsyncpa [#allocation3], 0  ;;  %s3763_s0 = inlined_call_operand.vmem [shape: f32[8,896], index: 0, kind: input, shape index: {}]   ;;  %s3764_s1 = inlined_call_operand.hbm [shape: f32[896,640], index: 1, kind: input, shape index: {}]   ;;  %s3765_s2 = inlined_call_operand.hbm [shape: f32[1,640], index: 2, kind: input, shape index: {}]   ;;  %s3766_s3 = inlined_call_operand.hbm [shape: f32[640,256], index: 3, kind: input, shape index: {}]   ;;  %s3767_s4 = inlined_call_operand.hbm [shape: f32[1,256], index: 4, kind: input, shape index: {}]   ;;  %s3768_s5 = inlined_call_operand.hbm [shape: f32[256,256], index: 5, kind: input, shape index: {}]   ;;  %s3769_s6 = inlined_call_operand.hbm [shape: f32[1,256], index: 6, kind: input, shape index: {}]   ;;  %s3770_s7 = inlined_call_operand.hbm [shape: f32[256,128], index: 7, kind: input, shape index: {}]   ;;  %s3771_s8 = inlined_call_operand.hbm [shape: f32[1,128], index: 8, kind: input, shape index: {}]   ;;  %s3772_s9 = inlined_call_operand.vmem [shape: f32[8,128], index: 9, kind: output, shape index: {}]  }
   0x1   :  { %15 = vsyncpa [#allocation5], 0 }
   0x2   :  { %16 = vsyncpa [#allocation8], 0 }
   0x3   :  { %17 = vsyncpa [#allocation11], 0 }
   0x4   :  { %18 = vsyncpa [#allocation14], 0  ;;  %s3480_s30 = smov [#allocation4]   ;;  %s3481_s11 = smov [#allocation7]  }
   0x5   :  { %s39_s10 = sshll.u32 %s3480_s30, 4  ;;  %s61_s12 = sshll.u32 %s3481_s11, 4  ;;  %s40_s10 = int_to_ptr.vmem [resolvable:$true] %s39_s10  ;;  %s62_s12 = int_to_ptr.vmem [resolvable:$true] %s61_s12 }
   0x6   :  { %s3294_s15 = scalar_lea.hbm %s3765_s2, 80 }
   0x7   :  { %p3295_p0 = scmp.ne.s32.totalorder %s3765_s2, %s3294_s15  ;;  %p3298_p1 = scmp.lt.u32.totalorder %s3294_s15, %s3765_s2 }
   0x9   :  { %p3300_p2 = pnand %p3298_p1, %p3295_p0 }
   0xb   :  { %3303 = shalt.err (!%p3300_p2)
}
   0xc   :  { %s3304_s20 = scalar_lea.vmem %s40_s10, 80  ;;  %s3308_s21 = scalar_lea.vmem %s40_s10, 96 }
   0xd   :  { %p3305_p3 = scmp.ne.s32.totalorder %s40_s10, %s3304_s20  ;;  %p3309_p4 = scmp.lt.s32.totalorder %s40_s10, %s40_s10 }
   0xe   :  { %p3310_p5 = scmp.lt.s32.totalorder %s3308_s21, %s3304_s20 }
  0x10   :  { %p3311_p6 = por %p3310_p5, %p3309_p4 }
  0x12   :  { %p3312_p7 = pnand %p3311_p6, %p3305_p3 }
  0x14   :  { %3315 = shalt.err (!%p3312_p7)
}
  0x15   :  { %42 = dma.hbm_to_vmem [thread:$0]  %s3765_s2, 80, %s40_s10, [#allocation5]  }
  0x16   :  { %s3316_s26 = scalar_lea.hbm %s3767_s4, 32 }
  0x17   :  { %p3317_p8 = scmp.ne.s32.totalorder %s3767_s4, %s3316_s26  ;;  %p3320_p9 = scmp.lt.u32.totalorder %s3316_s26, %s3767_s4 }
  0x19   :  { %p3322_p10 = pnand %p3320_p9, %p3317_p8 }
  0x1b   :  { %3325 = shalt.err (!%p3322_p10)
}
  0x1c   :  { %s3326_s11 = scalar_lea.vmem %s62_s12, 32  ;;  %p3331_p12 = scmp.lt.s32.totalorder %s62_s12, %s62_s12 }
  0x1d   :  { %p3327_p11 = scmp.ne.s32.totalorder %s62_s12, %s3326_s11  ;;  %p3332_p13 = scmp.lt.s32.totalorder %s3326_s11, %s3326_s11 }
  0x1f   :  { %p3333_p0 = por %p3332_p13, %p3331_p12 }
  0x21   :  { %p3334_p1 = pnand %p3333_p0, %p3327_p11 }
  0x23   :  { %3337 = shalt.err (!%p3334_p1)
}
  0x24   :  { %64 = dma.hbm_to_vmem [thread:$0]  %s3767_s4, 32, %s62_s12, [#allocation8]  }
  0x25   :  { %s3482_s13 = smov [#allocation10]   ;;  %s3483_s15 = smov [#allocation2]  }
  0x26   :  { %s83_s14 = sshll.u32 %s3482_s13, 4  ;;  %s26_s16 = sshll.u32 %s3483_s15, 4  ;;  %s84_s14 = int_to_ptr.vmem [resolvable:$true] %s83_s14  ;;  %s3571_s16 = int_to_ptr.vmem [resolvable:$true] %s26_s16 }
  0x27   :  { %s3338_s19 = scalar_lea.hbm %s3769_s6, 32 }
  0x28   :  { %p3339_p2 = scmp.ne.s32.totalorder %s3769_s6, %s3338_s19  ;;  %p3342_p3 = scmp.lt.u32.totalorder %s3338_s19, %s3769_s6 }
  0x2a   :  { %p3344_p4 = pnand %p3342_p3, %p3339_p2 }
  0x2c   :  { %3347 = shalt.err (!%p3344_p4)
}
  0x2d   :  { %s3348_s4 = scalar_lea.vmem %s84_s14, 32  ;;  %p3353_p6 = scmp.lt.s32.totalorder %s84_s14, %s84_s14 }
  0x2e   :  { %p3349_p5 = scmp.ne.s32.totalorder %s84_s14, %s3348_s4  ;;  %p3354_p7 = scmp.lt.s32.totalorder %s3348_s4, %s3348_s4 }
  0x30   :  { %p3355_p8 = por %p3354_p7, %p3353_p6 }
  0x32   :  { %p3356_p9 = pnand %p3355_p8, %p3349_p5 }
  0x34   :  { %3359 = shalt.err (!%p3356_p9)
}
  0x35   :  { %86 = dma.hbm_to_vmem [thread:$0]  %s3769_s6, 32, %s84_s14, [#allocation11]  }
  0x36   :  { %s3360_s27 = scalar_lea.hbm %s3764_s1, 71680 }
  0x37   :  { %p3361_p10 = scmp.ne.s32.totalorder %s3764_s1, %s3360_s27  ;;  %p3364_p11 = scmp.lt.u32.totalorder %s3360_s27, %s3764_s1 }
  0x39   :  { %p3366_p12 = pnand %p3364_p11, %p3361_p10 }
  0x3b   :  { %3369 = shalt.err (!%p3366_p12)
}
  0x3c   :  { %s3370_s2 = scalar_lea.vmem %s3571_s16, 71680  ;;  %p3375_p0 = scmp.lt.s32.totalorder %s3571_s16, %s3571_s16 }
  0x3d   :  { %p3371_p13 = scmp.ne.s32.totalorder %s3571_s16, %s3370_s2  ;;  %p3376_p1 = scmp.lt.s32.totalorder %s3370_s2, %s3370_s2 }
  0x3f   :  { %p3377_p2 = por %p3376_p1, %p3375_p0 }
  0x41   :  { %p3378_p3 = pnand %p3377_p2, %p3371_p13 }
  0x43   :  { %3381 = shalt.err (!%p3378_p3)
}
  0x44   :  { %s3484_s6 = smov 640   ;;  %s3485_s10 = smov 40  }
  0x45   :  { %32 = dma.hbm_to_vmem [thread:$0]  %s3764_s1, 71680, %s3571_s16, [#allocation3], %s3484_s6, %s3484_s6, %s3485_s10  }
  0x46   :  { %s3486_s15 = smov [#allocation6]   ;;  %s3382_s20 = scalar_lea.hbm %s3766_s3, 20480 }
  0x47   :  { %s48_s17 = sshll.u32 %s3486_s15, 4  ;;  %p3383_p4 = scmp.ne.s32.totalorder %s3766_s3, %s3382_s20  ;;  %s49_s17 = int_to_ptr.vmem [resolvable:$true] %s48_s17 }
  0x48   :  { %p3386_p5 = scmp.lt.u32.totalorder %s3382_s20, %s3766_s3 }
  0x4a   :  { %p3388_p6 = pnand %p3386_p5, %p3383_p4 }
  0x4c   :  { %3391 = shalt.err (!%p3388_p6)
}
  0x4d   :  { %s3392_s12 = scalar_lea.vmem %s49_s17, 20480  ;;  %p3397_p8 = scmp.lt.s32.totalorder %s49_s17, %s49_s17 }
  0x4e   :  { %p3393_p7 = scmp.ne.s32.totalorder %s49_s17, %s3392_s12  ;;  %p3398_p9 = scmp.lt.s32.totalorder %s3392_s12, %s3392_s12 }
  0x50   :  { %p3399_p10 = por %p3398_p9, %p3397_p8 }
  0x52   :  { %p3400_p11 = pnand %p3399_p10, %p3393_p7 }
  0x54   :  { %3403 = shalt.err (!%p3400_p11)
}
  0x55   :  { %s3487_s1 = smov 256   ;;  %s3488_s16 = smov 16  }
  0x56   :  { %54 = dma.hbm_to_vmem [thread:$0]  %s3766_s3, 20480, %s49_s17, [#allocation5], %s3487_s1, %s3487_s1, %s3488_s16  }
  0x57   :  { %s3489_s26 = smov [#allocation9]   ;;  %s3490_s28 = smov [#allocation12]  }
  0x58   :  { %s70_s27 = sshll.u32 %s3489_s26, 4  ;;  %s92_s29 = sshll.u32 %s3490_s28, 4  ;;  %s71_s27 = int_to_ptr.vmem [resolvable:$true] %s70_s27  ;;  %s93_s29 = int_to_ptr.vmem [resolvable:$true] %s92_s29 }
  0x59   :  { %s3404_s2 = scalar_lea.hbm %s3768_s5, 8192 }
  0x5a   :  { %p3405_p12 = scmp.ne.s32.totalorder %s3768_s5, %s3404_s2  ;;  %p3408_p13 = scmp.lt.u32.totalorder %s3404_s2, %s3768_s5 }
  0x5c   :  { %p3410_p0 = pnand %p3408_p13, %p3405_p12 }
  0x5e   :  { %3413 = shalt.err (!%p3410_p0)
}
  0x5f   :  { %s3414_s3 = scalar_lea.vmem %s71_s27, 8192  ;;  %p3419_p2 = scmp.lt.s32.totalorder %s71_s27, %s71_s27 }
  0x60   :  { %p3415_p1 = scmp.ne.s32.totalorder %s71_s27, %s3414_s3  ;;  %p3420_p3 = scmp.lt.s32.totalorder %s3414_s3, %s3414_s3 }
  0x62   :  { %p3421_p4 = por %p3420_p3, %p3419_p2 }
  0x64   :  { %p3422_p5 = pnand %p3421_p4, %p3415_p1 }
  0x66   :  { %3425 = shalt.err (!%p3422_p5)
}
  0x67   :  { %76 = dma.hbm_to_vmem [thread:$0]  %s3768_s5, 8192, %s71_s27, [#allocation8], %s3487_s1, %s3487_s1, %s3488_s16  }
  0x68   :  { %s3426_s20 = scalar_lea.hbm %s3770_s7, 4096 }
  0x69   :  { %p3427_p6 = scmp.ne.s32.totalorder %s3770_s7, %s3426_s20  ;;  %p3430_p7 = scmp.lt.u32.totalorder %s3426_s20, %s3770_s7 }
  0x6b   :  { %p3432_p8 = pnand %p3430_p7, %p3427_p6 }
  0x6d   :  { %3435 = shalt.err (!%p3432_p8)
}
  0x6e   :  { %s3436_s12 = scalar_lea.vmem %s93_s29, 4096  ;;  %p3441_p10 = scmp.lt.s32.totalorder %s93_s29, %s93_s29 }
  0x6f   :  { %p3437_p9 = scmp.ne.s32.totalorder %s93_s29, %s3436_s12  ;;  %p3442_p11 = scmp.lt.s32.totalorder %s3436_s12, %s3436_s12 }
  0x71   :  { %p3443_p12 = por %p3442_p11, %p3441_p10 }
  0x73   :  { %p3444_p13 = pnand %p3443_p12, %p3437_p9 }
  0x75   :  { %3447 = shalt.err (!%p3444_p13)
}
  0x76   :  { %s3491_s5 = smov 128   ;;  %s3492_s1 = smov 8  }
  0x77   :  { %98 = dma.hbm_to_vmem [thread:$0]  %s3770_s7, 4096, %s93_s29, [#allocation11], %s3491_s5, %s3491_s5, %s3492_s1  }
  0x78   :  { %s3493_s25 = smov [#allocation13]   ;;  %s3448_s30 = scalar_lea.hbm %s3771_s8, 16 }
  0x79   :  { %s105_s26 = sshll.u32 %s3493_s25, 4  ;;  %p3449_p0 = scmp.ne.s32.totalorder %s3771_s8, %s3448_s30  ;;  %s106_s26 = int_to_ptr.vmem [resolvable:$true] %s105_s26 }
  0x7a   :  { %p3452_p1 = scmp.lt.u32.totalorder %s3448_s30, %s3771_s8 }
  0x7c   :  { %p3454_p2 = pnand %p3452_p1, %p3449_p0 }
  0x7e   :  { %3457 = shalt.err (!%p3454_p2)
}
  0x7f   :  { %s3458_s13 = scalar_lea.vmem %s106_s26, 16  ;;  %s3462_s7 = scalar_lea.vmem %s106_s26, 32 }
  0x80   :  { %p3459_p3 = scmp.ne.s32.totalorder %s106_s26, %s3458_s13  ;;  %p3463_p4 = scmp.lt.s32.totalorder %s106_s26, %s106_s26 }
  0x81   :  { %p3464_p5 = scmp.lt.s32.totalorder %s3462_s7, %s3458_s13 }
  0x83   :  { %p3465_p6 = por %p3464_p5, %p3463_p4 }
  0x85   :  { %p3466_p7 = pnand %p3465_p6, %p3459_p3 }
  0x87   :  { %3469 = shalt.err (!%p3466_p7)
}
  0x88   :  { %108 = dma.hbm_to_vmem [thread:$0]  %s3771_s8, 16, %s106_s26, [#allocation14]  }
  0x89   :  { %3470 = dma.done.wait [#allocation3], 71680  }
  0x8a   :  { %3471 = vsyncadd [#allocation3], 4294895616 }
  0x8b   :  { %3472 = dma.done.wait [#allocation5], 20560  }
  0x8c   :  { %3473 = vsyncadd [#allocation5], 4294946736 }
  0x8d   :  { %3474 = dma.done.wait [#allocation8], 8224  }
  0x8e   :  { %3475 = vsyncadd [#allocation8], 4294959072 }
  0x8f   :  { %3476 = dma.done.wait [#allocation11], 4128  }
  0x90   :  { %3477 = vsyncadd [#allocation11], 4294963168 }
  0x91   :  { %3478 = dma.done.wait [#allocation14], 16  }
  0x92   :  { %3479 = vsyncadd [#allocation14], 4294967280  ;;  %v3494_v0 = vmov 0.0   ;;  %v141_v1 = vld [vmem:[#allocation2 + $0x8] sm:$0xff]  ;;  %v146_v2 = vld [vmem:[#allocation2 + $0x30] sm:$0xff]  ;;  %vm3496_vm0 = vmmov 0  }
  0x93   :  { %1004 = vmatprep.mubr.f32.mxu1 %v3494_v0  ;;  %v621_v3 = vld [vmem:[#allocation2 + $0xf08] sm:$0xff]  ;;  %v2426_v4 = vpack.c.bf16 %v146_v2, %v141_v1  ;;  %v626_v5 = vld [vmem:[#allocation2 + $0xf30] sm:$0xff]  ;;  %v140_v6 = vld [vmem:[#allocation2] sm:$0xff] }
  0x94   :  { %v145_v7 = vld [vmem:[#allocation2 + $0x28] sm:$0xff]  ;;  %v2618_v8 = vpack.c.bf16 %v626_v5, %v621_v3  ;;  %v620_v10 = vld [vmem:[#allocation2 + $0xf00] sm:$0xff]  ;;  %v151_v12 = vld [vmem:[#allocation2 + $0x58] sm:$0xff] }
  0x95   :  { %v2428_v9 = vpack.c.bf16 %v145_v7, %v140_v6  ;;  %v625_v11 = vld [vmem:[#allocation2 + $0xf28] sm:$0xff]  ;;  %2427 = vmatprep.subr.bf16.mxu0 %v2426_v4  ;;  %v156_v14 = vld [vmem:[#allocation2 + $0x80] sm:$0xff]  ;;  %v631_v15 = vld [vmem:[#allocation2 + $0xf58] sm:$0xff] }
  0x96   :  { %v2620_v13 = vpack.c.bf16 %v625_v11, %v620_v10  ;;  %v636_v16 = vld [vmem:[#allocation2 + $0xf80] sm:$0xff]  ;;  %2619 = vmatprep.subr.bf16.mxu1 %v2618_v8  ;;  %v2430_v17 = vpack.c.bf16 %v156_v14, %v151_v12  ;;  %v150_v19 = vld [vmem:[#allocation2 + $0x50] sm:$0xff]  ;;  %v155_v20 = vld [vmem:[#allocation2 + $0x78] sm:$0xff] }
  0x97   :  { %2429 = vmatpush1.bf16.msra.mxu0 %v2428_v9  ;;  %v2622_v18 = vpack.c.bf16 %v636_v16, %v631_v15  ;;  %v630_v21 = vld [vmem:[#allocation2 + $0xf50] sm:$0xff]  ;;  %v2432_v22 = vpack.c.bf16 %v155_v20, %v150_v19  ;;  %v635_v23 = vld [vmem:[#allocation2 + $0xf78] sm:$0xff]  ;;  %v161_v24 = vld [vmem:[#allocation2 + $0xa8] sm:$0xff] }
  0x98   :  { %2621 = vmatpush1.bf16.msra.mxu1 %v2620_v13  ;;  %v166_v25 = vld [vmem:[#allocation2 + $0xd0] sm:$0xff]  ;;  %2431 = vmatprep.subr.bf16.mxu0 %v2430_v17  ;;  %v2624_v26 = vpack.c.bf16 %v635_v23, %v630_v21  ;;  %v641_v28 = vld [vmem:[#allocation2 + $0xfa8] sm:$0xff]  ;;  %v160_v30 = vld [vmem:[#allocation2 + $0xa0] sm:$0xff] }
  0x99   :  { %2623 = vmatprep.subr.bf16.mxu1 %v2622_v18  ;;  %v2434_v27 = vpack.c.bf16 %v166_v25, %v161_v24  ;;  %v646_v29 = vld [vmem:[#allocation2 + $0xfd0] sm:$0xff]  ;;  %v165_v32 = vld [vmem:[#allocation2 + $0xc8] sm:$0xff]  ;;  %v640_v33 = vld [vmem:[#allocation2 + $0xfa0] sm:$0xff] }
  0x9a   :  { %v2626_v31 = vpack.c.bf16 %v646_v29, %v641_v28  ;;  %v645_v34 = vld [vmem:[#allocation2 + $0xfc8] sm:$0xff]  ;;  %v2436_v35 = vpack.c.bf16 %v165_v32, %v160_v30  ;;  %v171_v36 = vld [vmem:[#allocation2 + $0xf8] sm:$0xff]  ;;  %v176_v37 = vld [vmem:[#allocation2 + $0x120] sm:$0xff] }
  0x9b   :  { %2433 = vmatpush1.bf16.msra.mxu0 %v2432_v22  ;;  %v651_v38 = vld [vmem:[#allocation2 + $0xff8] sm:$0xff]  ;;  %v2628_v39 = vpack.c.bf16 %v645_v34, %v640_v33  ;;  %v2438_v40 = vpack.c.bf16 %v176_v37, %v171_v36  ;;  %v656_v41 = vld [vmem:[#allocation2 + $0x1020] sm:$0xff]  ;;  %v170_v42 = vld [vmem:[#allocation2 + $0xf0] sm:$0xff] }
  0x9c   :  { %2625 = vmatpush1.bf16.msra.mxu1 %v2624_v26  ;;  %2435 = vmatprep.subr.bf16.mxu0 %v2434_v27  ;;  %v175_v43 = vld [vmem:[#allocation2 + $0x118] sm:$0xff]  ;;  %v2630_v44 = vpack.c.bf16 %v656_v41, %v651_v38  ;;  %v650_v45 = vld [vmem:[#allocation2 + $0xff0] sm:$0xff]  ;;  %v181_v47 = vld [vmem:[#allocation2 + $0x148] sm:$0xff] }
  0x9d   :  { %2627 = vmatprep.subr.bf16.mxu1 %v2626_v31  ;;  %v655_v46 = vld [vmem:[#allocation2 + $0x1018] sm:$0xff]  ;;  %v186_v48 = vld [vmem:[#allocation2 + $0x170] sm:$0xff]  ;;  %v661_v49 = vld [vmem:[#allocation2 + $0x1048] sm:$0xff]  ;;  %v2440_v51 = vpack.c.bf16 %v175_v43, %v170_v42 }
  0x9e   :  { %v666_v50 = vld [vmem:[#allocation2 + $0x1070] sm:$0xff]  ;;  %v2632_v52 = vpack.c.bf16 %v655_v46, %v650_v45  ;;  %v2442_v53 = vpack.c.bf16 %v186_v48, %v181_v47  ;;  %v180_v54 = vld [vmem:[#allocation2 + $0x140] sm:$0xff]  ;;  %v185_v55 = vld [vmem:[#allocation2 + $0x168] sm:$0xff] }
  0x9f   :  { %2437 = vmatpush1.bf16.msra.mxu0 %v2436_v35  ;;  %v660_v56 = vld [vmem:[#allocation2 + $0x1040] sm:$0xff]  ;;  %v2634_v57 = vpack.c.bf16 %v666_v50, %v661_v49  ;;  %v665_v58 = vld [vmem:[#allocation2 + $0x1068] sm:$0xff]  ;;  %v191_v59 = vld [vmem:[#allocation2 + $0x198] sm:$0xff]  ;;  %v2444_v63 = vpack.c.bf16 %v185_v55, %v180_v54 }
  0xa0   :  { %2629 = vmatpush1.bf16.msra.mxu1 %v2628_v39  ;;  %2439 = vmatprep.subr.bf16.mxu0 %v2438_v40  ;;  %v196_v60 = vld [vmem:[#allocation2 + $0x1c0] sm:$0xff]  ;;  %v671_v61 = vld [vmem:[#allocation2 + $0x1098] sm:$0xff]  ;;  %v2636_v1 = vpack.c.bf16 %v665_v58, %v660_v56  ;;  %v190_v3 = vld [vmem:[#allocation2 + $0x190] sm:$0xff] }
  0xa1   :  { %2631 = vmatprep.subr.bf16.mxu1 %v2630_v44  ;;  %v676_v62 = vld [vmem:[#allocation2 + $0x10c0] sm:$0xff]  ;;  %v2446_v2 = vpack.c.bf16 %v196_v60, %v191_v59  ;;  %v195_v4 = vld [vmem:[#allocation2 + $0x1b8] sm:$0xff]  ;;  %v670_v5 = vld [vmem:[#allocation2 + $0x1090] sm:$0xff] }
  0xa2   :  { %v2638_v6 = vpack.c.bf16 %v676_v62, %v671_v61  ;;  %v675_v7 = vld [vmem:[#allocation2 + $0x10b8] sm:$0xff]  ;;  %v201_v8 = vld [vmem:[#allocation2 + $0x1e8] sm:$0xff]  ;;  %v206_v9 = vld [vmem:[#allocation2 + $0x210] sm:$0xff]  ;;  %v2448_v12 = vpack.c.bf16 %v195_v4, %v190_v3 }
  0xa3   :  { %2441 = vmatpush1.bf16.msra.mxu0 %v2440_v51  ;;  %v681_v10 = vld [vmem:[#allocation2 + $0x10e8] sm:$0xff]  ;;  %v686_v11 = vld [vmem:[#allocation2 + $0x1110] sm:$0xff]  ;;  %v2640_v13 = vpack.c.bf16 %v675_v7, %v670_v5  ;;  %v2450_v14 = vpack.c.bf16 %v206_v9, %v201_v8  ;;  %v200_v15 = vld [vmem:[#allocation2 + $0x1e0] sm:$0xff] }
  0xa4   :  { %2633 = vmatpush1.bf16.msra.mxu1 %v2632_v52  ;;  %2443 = vmatprep.subr.bf16.mxu0 %v2442_v53  ;;  %v205_v16 = vld [vmem:[#allocation2 + $0x208] sm:$0xff]  ;;  %v680_v17 = vld [vmem:[#allocation2 + $0x10e0] sm:$0xff]  ;;  %v2642_v18 = vpack.c.bf16 %v686_v11, %v681_v10  ;;  %v211_v20 = vld [vmem:[#allocation2 + $0x238] sm:$0xff] }
  0xa5   :  { %2635 = vmatprep.subr.bf16.mxu1 %v2634_v57  ;;  %v685_v19 = vld [vmem:[#allocation2 + $0x1108] sm:$0xff]  ;;  %v216_v21 = vld [vmem:[#allocation2 + $0x260] sm:$0xff]  ;;  %v691_v22 = vld [vmem:[#allocation2 + $0x1138] sm:$0xff]  ;;  %v2452_v24 = vpack.c.bf16 %v205_v16, %v200_v15 }
  0xa6   :  { %v696_v23 = vld [vmem:[#allocation2 + $0x1160] sm:$0xff]  ;;  %v2644_v25 = vpack.c.bf16 %v685_v19, %v680_v17  ;;  %v2454_v26 = vpack.c.bf16 %v216_v21, %v211_v20  ;;  %v210_v27 = vld [vmem:[#allocation2 + $0x230] sm:$0xff]  ;;  %v215_v28 = vld [vmem:[#allocation2 + $0x258] sm:$0xff] }
  0xa7   :  { %2445 = vmatpush1.bf16.msra.mxu0 %v2444_v63  ;;  %v690_v29 = vld [vmem:[#allocation2 + $0x1130] sm:$0xff]  ;;  %v2646_v30 = vpack.c.bf16 %v696_v23, %v691_v22  ;;  %v695_v31 = vld [vmem:[#allocation2 + $0x1158] sm:$0xff]  ;;  %v221_v32 = vld [vmem:[#allocation2 + $0x288] sm:$0xff]  ;;  %v2456_v36 = vpack.c.bf16 %v215_v28, %v210_v27 }
  0xa8   :  { %2637 = vmatpush1.bf16.msra.mxu1 %v2636_v1  ;;  %2447 = vmatprep.subr.bf16.mxu0 %v2446_v2  ;;  %v226_v33 = vld [vmem:[#allocation2 + $0x2b0] sm:$0xff]  ;;  %v143_v34 = vld [vmem:[#allocation2 + $0x18] sm:$0xff]  ;;  %v148_v35 = vld [vmem:[#allocation2 + $0x40] sm:$0xff]  ;;  %v2648_v37 = vpack.c.bf16 %v695_v31, %v690_v29 }
  0xa9   :  { %2639 = vmatprep.subr.bf16.mxu1 %v2638_v6  ;;  %v2458_v38 = vpack.c.bf16 %v226_v33, %v221_v32  ;;  %v220_v39 = vld [vmem:[#allocation2 + $0x280] sm:$0xff]  ;;  %v225_v40 = vld [vmem:[#allocation2 + $0x2a8] sm:$0xff]  ;;  %v142_v41 = vld [vmem:[#allocation2 + $0x10] sm:$0xff]  ;;  %v2650_v42 = vpack.c.bf16 %v148_v35, %v143_v34 }
  0xaa   :  { %v147_v43 = vld [vmem:[#allocation2 + $0x38] sm:$0xff]  ;;  %v236_v45 = vld [vmem:[#allocation2 + $0x300] sm:$0xff]  ;;  %v153_v46 = vld [vmem:[#allocation2 + $0x68] sm:$0xff]  ;;  %v2460_v49 = vpack.c.bf16 %v225_v40, %v220_v39 }
  0xab   :  { %2449 = vmatpush1.bf16.msra.mxu0 %v2448_v12  ;;  %v231_v44 = vld [vmem:[#allocation2 + $0x2d8] sm:$0xff]  ;;  %v158_v47 = vld [vmem:[#allocation2 + $0x90] sm:$0xff]  ;;  %v2652_v50 = vpack.c.bf16 %v147_v43, %v142_v41  ;;  %v152_v54 = vld [vmem:[#allocation2 + $0x60] sm:$0xff] }
  0xac   :  { %2641 = vmatpush1.bf16.msra.mxu1 %v2640_v13  ;;  %2451 = vmatprep.subr.bf16.mxu0 %v2450_v14  ;;  %v139_v48 = vld [vmem:[%s3763_s0 + $0x30] sm:$0xff]  ;;  %v2462_v51 = vpack.c.bf16 %v236_v45, %v231_v44  ;;  %v235_v53 = vld [vmem:[#allocation2 + $0x2f8] sm:$0xff]  ;;  %v2654_v55 = vpack.c.bf16 %v158_v47, %v153_v46  ;;  %v157_v56 = vld [vmem:[#allocation2 + $0x88] sm:$0xff] }
  0xad   :  { %2643 = vmatprep.subr.bf16.mxu1 %v2642_v18  ;;  %v230_v52 = vld [vmem:[#allocation2 + $0x2d0] sm:$0xff]  ;;  %v241_v57 = vld [vmem:[#allocation2 + $0x328] sm:$0xff]  ;;  %v163_v59 = vld [vmem:[#allocation2 + $0xb8] sm:$0xff]  ;;  %v2656_v62 = vpack.c.bf16 %v157_v56, %v152_v54 }
  0xae   :  { %v246_v58 = vld [vmem:[#allocation2 + $0x350] sm:$0xff]  ;;  %v168_v60 = vld [vmem:[#allocation2 + $0xe0] sm:$0xff]  ;;  %v2464_v61 = vpack.c.bf16 %v235_v53, %v230_v52  ;;  %v245_v2 = vld [vmem:[#allocation2 + $0x348] sm:$0xff] }
  0xaf   :  { %2453 = vmatpush1.bf16.msra.mxu0 %v2452_v24  ;;  %v2466_v63 = vpack.c.bf16 %v246_v58, %v241_v57  ;;  %v240_v1 = vld [vmem:[#allocation2 + $0x320] sm:$0xff]  ;;  %v162_v3 = vld [vmem:[#allocation2 + $0xb0] sm:$0xff]  ;;  %v2658_v4 = vpack.c.bf16 %v168_v60, %v163_v59  ;;  %v167_v5 = vld [vmem:[#allocation2 + $0xd8] sm:$0xff] }
  0xb0   :  { %2645 = vmatpush1.bf16.msra.mxu1 %v2644_v25  ;;  %2455 = vmatprep.subr.bf16.mxu0 %v2454_v26  ;;  %v251_v6 = vld [vmem:[#allocation2 + $0x378] sm:$0xff]  ;;  %v256_v7 = vld [vmem:[#allocation2 + $0x3a0] sm:$0xff]  ;;  %v173_v8 = vld [vmem:[#allocation2 + $0x108] sm:$0xff]  ;;  %v2468_v10 = vpack.c.bf16 %v245_v2, %v240_v1  ;;  %v2660_v11 = vpack.c.bf16 %v167_v5, %v162_v3 }
  0xb1   :  { %2647 = vmatprep.subr.bf16.mxu1 %v2646_v30  ;;  %v178_v9 = vld [vmem:[#allocation2 + $0x130] sm:$0xff]  ;;  %v2470_v12 = vpack.c.bf16 %v256_v7, %v251_v6  ;;  %v255_v14 = vld [vmem:[#allocation2 + $0x398] sm:$0xff]  ;;  %v172_v15 = vld [vmem:[#allocation2 + $0x100] sm:$0xff] }
  0xb2   :  { %v250_v13 = vld [vmem:[#allocation2 + $0x370] sm:$0xff]  ;;  %v2662_v16 = vpack.c.bf16 %v178_v9, %v173_v8  ;;  %v177_v17 = vld [vmem:[#allocation2 + $0x128] sm:$0xff]  ;;  %v183_v20 = vld [vmem:[#allocation2 + $0x158] sm:$0xff] }
  0xb3   :  { %2457 = vmatpush1.bf16.msra.mxu0 %v2456_v36  ;;  %v261_v18 = vld [vmem:[#allocation2 + $0x3c8] sm:$0xff]  ;;  %v266_v19 = vld [vmem:[#allocation2 + $0x3f0] sm:$0xff]  ;;  %v188_v21 = vld [vmem:[#allocation2 + $0x180] sm:$0xff]  ;;  %v2472_v23 = vpack.c.bf16 %v255_v14, %v250_v13  ;;  %v2664_v24 = vpack.c.bf16 %v177_v17, %v172_v15 }
  0xb4   :  { %2649 = vmatpush1.bf16.msra.mxu1 %v2648_v37  ;;  %2459 = vmatprep.subr.bf16.mxu0 %v2458_v38  ;;  %v134_v22 = vld [vmem:[%s3763_s0 + $0x8] sm:$0xff]  ;;  %v2474_v25 = vpack.c.bf16 %v266_v19, %v261_v18  ;;  %v260_v26 = vld [vmem:[#allocation2 + $0x3c0] sm:$0xff]  ;;  %v182_v28 = vld [vmem:[#allocation2 + $0x150] sm:$0xff]  ;;  %v2666_v29 = vpack.c.bf16 %v188_v21, %v183_v20 }
  0xb5   :  { %2651 = vmatprep.subr.bf16.mxu1 %v2650_v42  ;;  %791 = vmatprep.mubr.f32.mxu0 %v134_v22  ;;  %v265_v27 = vld [vmem:[#allocation2 + $0x3e8] sm:$0xff]  ;;  %v187_v30 = vld [vmem:[#allocation2 + $0x178] sm:$0xff]  ;;  %v276_v32 = vld [vmem:[#allocation2 + $0x440] sm:$0xff] }
  0xb6   :  { %v271_v31 = vld [vmem:[#allocation2 + $0x418] sm:$0xff]  ;;  %v193_v33 = vld [vmem:[#allocation2 + $0x1a8] sm:$0xff]  ;;  %v198_v34 = vld [vmem:[#allocation2 + $0x1d0] sm:$0xff]  ;;  %v2476_v35 = vpack.c.bf16 %v265_v27, %v260_v26  ;;  %v2668_v36 = vpack.c.bf16 %v187_v30, %v182_v28 }
  0xb7   :  { %1005 = vmatmul.mubr.f32.vlgmr.msra.gmra.mrb[0].mxu1 %v139_v48  ;;  %2461 = vmatpush1.bf16.msra.mxu0 %v2460_v49  ;;  %v2478_v37 = vpack.c.bf16 %v276_v32, %v271_v31  ;;  %v270_v38 = vld [vmem:[#allocation2 + $0x410] sm:$0xff]  ;;  %v275_v39 = vld [vmem:[#allocation2 + $0x438] sm:$0xff]  ;;  %v192_v40 = vld [vmem:[#allocation2 + $0x1a0] sm:$0xff]  ;;  %v2670_v41 = vpack.c.bf16 %v198_v34, %v193_v33 }
  0xb8   :  { %2653 = vmatpush1.bf16.msra.mxu1 %v2652_v50  ;;  %2463 = vmatprep.subr.bf16.mxu0 %v2462_v51  ;;  %v197_v42 = vld [vmem:[#allocation2 + $0x1c8] sm:$0xff]  ;;  %v286_v44 = vld [vmem:[#allocation2 + $0x490] sm:$0xff]  ;;  %v203_v45 = vld [vmem:[#allocation2 + $0x1f8] sm:$0xff]  ;;  %v2480_v47 = vpack.c.bf16 %v275_v39, %v270_v38 }
  0xb9   :  { %2655 = vmatprep.subr.bf16.mxu1 %v2654_v55  ;;  %1075 = vmatprep.mubr.f32.mxu1 %v134_v22  ;;  %v281_v43 = vld [vmem:[#allocation2 + $0x468] sm:$0xff]  ;;  %v208_v46 = vld [vmem:[#allocation2 + $0x220] sm:$0xff]  ;;  %v2672_v48 = vpack.c.bf16 %v197_v42, %v192_v40  ;;  %v202_v52 = vld [vmem:[#allocation2 + $0x1f0] sm:$0xff] }
  0xba   :  { %v2482_v49 = vpack.c.bf16 %v286_v44, %v281_v43  ;;  %v280_v50 = vld [vmem:[#allocation2 + $0x460] sm:$0xff]  ;;  %v285_v51 = vld [vmem:[#allocation2 + $0x488] sm:$0xff]  ;;  %v2674_v53 = vpack.c.bf16 %v208_v46, %v203_v45  ;;  %v207_v54 = vld [vmem:[#allocation2 + $0x218] sm:$0xff] }
  0xbb   :  { %2465 = vmatpush1.bf16.msra.mxu0 %v2464_v61  ;;  %v291_v55 = vld [vmem:[#allocation2 + $0x4b8] sm:$0xff]  ;;  %v296_v56 = vld [vmem:[#allocation2 + $0x4e0] sm:$0xff]  ;;  %v213_v57 = vld [vmem:[#allocation2 + $0x248] sm:$0xff]  ;;  %v2484_v59 = vpack.c.bf16 %v285_v51, %v280_v50  ;;  %v2676_v60 = vpack.c.bf16 %v207_v54, %v202_v52 }
  0xbc   :  { %2657 = vmatpush1.bf16.msra.mxu1 %v2656_v62  ;;  %2467 = vmatprep.subr.bf16.mxu0 %v2466_v63  ;;  %v218_v58 = vld [vmem:[#allocation2 + $0x270] sm:$0xff]  ;;  %v2486_v61 = vpack.c.bf16 %v296_v56, %v291_v55  ;;  %v295_v63 = vld [vmem:[#allocation2 + $0x4d8] sm:$0xff]  ;;  %v212_v1 = vld [vmem:[#allocation2 + $0x240] sm:$0xff] }
  0xbd   :  { %2659 = vmatprep.subr.bf16.mxu1 %v2658_v4  ;;  %v290_v62 = vld [vmem:[#allocation2 + $0x4b0] sm:$0xff]  ;;  %v2678_v2 = vpack.c.bf16 %v218_v58, %v213_v57  ;;  %v217_v3 = vld [vmem:[#allocation2 + $0x268] sm:$0xff]  ;;  %v223_v6 = vld [vmem:[#allocation2 + $0x298] sm:$0xff] }
  0xbe   :  { %v301_v4 = vld [vmem:[#allocation2 + $0x508] sm:$0xff]  ;;  %v306_v5 = vld [vmem:[#allocation2 + $0x530] sm:$0xff]  ;;  %v228_v7 = vld [vmem:[#allocation2 + $0x2c0] sm:$0xff]  ;;  %v2488_v8 = vpack.c.bf16 %v295_v63, %v290_v62  ;;  %v2680_v9 = vpack.c.bf16 %v217_v3, %v212_v1 }
  0xbf   :  { %2469 = vmatpush1.bf16.msra.mxu0 %v2468_v10  ;;  %v2490_v10 = vpack.c.bf16 %v306_v5, %v301_v4  ;;  %v222_v13 = vld [vmem:[#allocation2 + $0x290] sm:$0xff]  ;;  %v2682_v14 = vpack.c.bf16 %v228_v7, %v223_v6  ;;  %v227_v15 = vld [vmem:[#allocation2 + $0x2b8] sm:$0xff]  ;;  %v316_v17 = vld [vmem:[#allocation2 + $0x580] sm:$0xff] }
  0xc0   :  { %2661 = vmatpush1.bf16.msra.mxu1 %v2660_v11  ;;  %2471 = vmatprep.subr.bf16.mxu0 %v2470_v12  ;;  %v300_v11 = vld [vmem:[#allocation2 + $0x500] sm:$0xff]  ;;  %v305_v12 = vld [vmem:[#allocation2 + $0x528] sm:$0xff]  ;;  %v238_v19 = vld [vmem:[#allocation2 + $0x310] sm:$0xff]  ;;  %v2684_v22 = vpack.c.bf16 %v227_v15, %v222_v13 }
  0xc1   :  { %2663 = vmatprep.subr.bf16.mxu1 %v2662_v16  ;;  %v311_v16 = vld [vmem:[#allocation2 + $0x558] sm:$0xff]  ;;  %v233_v18 = vld [vmem:[#allocation2 + $0x2e8] sm:$0xff]  ;;  %v3660_v20 = vld [vmem:[%s3763_s0] sm:$0xff]  ;;  %v2492_v21 = vpack.c.bf16 %v305_v12, %v300_v11 }
  0xc2   :  { %v232_v26 = vld [vmem:[#allocation2 + $0x2e0] sm:$0xff]  ;;  %v2686_v27 = vpack.c.bf16 %v238_v19, %v233_v18  ;;  %v237_v28 = vld [vmem:[#allocation2 + $0x308] sm:$0xff]  ;;  %v326_v30 = vld [vmem:[#allocation2 + $0x5d0] sm:$0xff] }
  0xc3   :  { %2473 = vmatpush1.bf16.msra.mxu0 %v2472_v23  ;;  %v2494_v23 = vpack.c.bf16 %v316_v17, %v311_v16  ;;  %v243_v31 = vld [vmem:[#allocation2 + $0x338] sm:$0xff]  ;;  %v248_v32 = vld [vmem:[#allocation2 + $0x360] sm:$0xff]  ;;  %v2688_v34 = vpack.c.bf16 %v237_v28, %v232_v26  ;;  %v242_v38 = vld [vmem:[#allocation2 + $0x330] sm:$0xff] }
  0xc4   :  { %2665 = vmatpush1.bf16.msra.mxu1 %v2664_v24  ;;  %2475 = vmatprep.subr.bf16.mxu0 %v2474_v25  ;;  %v310_v24 = vld [vmem:[#allocation2 + $0x550] sm:$0xff]  ;;  %v315_v25 = vld [vmem:[#allocation2 + $0x578] sm:$0xff]  ;;  %v2690_v39 = vpack.c.bf16 %v248_v32, %v243_v31  ;;  %v336_v42 = vld [vmem:[#allocation2 + $0x620] sm:$0xff] }
  0xc5   :  { %2667 = vmatprep.subr.bf16.mxu1 %v2666_v29  ;;  %v321_v29 = vld [vmem:[#allocation2 + $0x5a8] sm:$0xff]  ;;  %v2496_v33 = vpack.c.bf16 %v315_v25, %v310_v24  ;;  %v247_v40 = vld [vmem:[#allocation2 + $0x358] sm:$0xff]  ;;  %v258_v44 = vld [vmem:[#allocation2 + $0x3b0] sm:$0xff] }
  0xc6   :  { %v253_v43 = vld [vmem:[#allocation2 + $0x388] sm:$0xff]  ;;  %v2692_v46 = vpack.c.bf16 %v247_v40, %v242_v38  ;;  %v252_v50 = vld [vmem:[#allocation2 + $0x380] sm:$0xff]  ;;  %v346_v54 = vld [vmem:[#allocation2 + $0x670] sm:$0xff] }
  0xc7   :  { %2477 = vmatpush1.bf16.msra.mxu0 %v2476_v35  ;;  %v2498_v35 = vpack.c.bf16 %v326_v30, %v321_v29  ;;  %v2694_v51 = vpack.c.bf16 %v258_v44, %v253_v43  ;;  %v257_v52 = vld [vmem:[#allocation2 + $0x3a8] sm:$0xff]  ;;  %v263_v55 = vld [vmem:[#allocation2 + $0x3d8] sm:$0xff]  ;;  %v268_v56 = vld [vmem:[#allocation2 + $0x400] sm:$0xff] }
  0xc8   :  { %2669 = vmatpush1.bf16.msra.mxu1 %v2668_v36  ;;  %2479 = vmatprep.subr.bf16.mxu0 %v2478_v37  ;;  %v320_v36 = vld [vmem:[#allocation2 + $0x5a0] sm:$0xff]  ;;  %v325_v37 = vld [vmem:[#allocation2 + $0x5c8] sm:$0xff]  ;;  %v2696_v58 = vpack.c.bf16 %v257_v52, %v252_v50  ;;  %v262_v62 = vld [vmem:[#allocation2 + $0x3d0] sm:$0xff]  ;;  %v2698_v63 = vpack.c.bf16 %v268_v56, %v263_v55 }
  0xc9   :  { %2671 = vmatprep.subr.bf16.mxu1 %v2670_v41  ;;  %v331_v41 = vld [vmem:[#allocation2 + $0x5f8] sm:$0xff]  ;;  %v2500_v45 = vpack.c.bf16 %v325_v37, %v320_v36  ;;  %v356_v3 = vld [vmem:[#allocation2 + $0x6c0] sm:$0xff]  ;;  %v273_v4 = vld [vmem:[#allocation2 + $0x428] sm:$0xff] }
  0xca   :  { %v267_v1 = vld [vmem:[#allocation2 + $0x3f8] sm:$0xff]  ;;  %v278_v5 = vld [vmem:[#allocation2 + $0x450] sm:$0xff]  ;;  %v272_v11 = vld [vmem:[#allocation2 + $0x420] sm:$0xff] }
  0xcb   :  { %2481 = vmatpush1.bf16.msra.mxu0 %v2480_v47  ;;  %v2502_v47 = vpack.c.bf16 %v336_v42, %v331_v41  ;;  %v2700_v7 = vpack.c.bf16 %v267_v1, %v262_v62  ;;  %v2702_v12 = vpack.c.bf16 %v278_v5, %v273_v4  ;;  %v277_v13 = vld [vmem:[#allocation2 + $0x448] sm:$0xff]  ;;  %v366_v15 = vld [vmem:[#allocation2 + $0x710] sm:$0xff]  ;;  %v283_v16 = vld [vmem:[#allocation2 + $0x478] sm:$0xff] }
  0xcc   :  { %2673 = vmatpush1.bf16.msra.mxu1 %v2672_v48  ;;  %2483 = vmatprep.subr.bf16.mxu0 %v2482_v49  ;;  %v330_v48 = vld [vmem:[#allocation2 + $0x5f0] sm:$0xff]  ;;  %v335_v49 = vld [vmem:[#allocation2 + $0x618] sm:$0xff]  ;;  %v288_v17 = vld [vmem:[#allocation2 + $0x4a0] sm:$0xff] }
  0xcd   :  { %2675 = vmatprep.subr.bf16.mxu1 %v2674_v53  ;;  %v341_v53 = vld [vmem:[#allocation2 + $0x648] sm:$0xff]  ;;  %v2504_v57 = vpack.c.bf16 %v335_v49, %v330_v48  ;;  %v360_v19 = vld [vmem:[#allocation2 + $0x6e0] sm:$0xff]  ;;  %v282_v24 = vld [vmem:[#allocation2 + $0x470] sm:$0xff]  ;;  %v2706_v26 = vpack.c.bf16 %v288_v17, %v283_v16 }
  0xce   :  { %v287_v25 = vld [vmem:[#allocation2 + $0x498] sm:$0xff]  ;;  %v376_v28 = vld [vmem:[#allocation2 + $0x760] sm:$0xff]  ;;  %v293_v30 = vld [vmem:[#allocation2 + $0x4c8] sm:$0xff] }
  0xcf   :  { %2485 = vmatpush1.bf16.msra.mxu0 %v2484_v59  ;;  %v2506_v59 = vpack.c.bf16 %v346_v54, %v341_v53  ;;  %v3666_v29 = vld [vmem:[%s3763_s0 + $0x18] sm:$0xff]  ;;  %v298_v31 = vld [vmem:[#allocation2 + $0x4f0] sm:$0xff]  ;;  %v292_v37 = vld [vmem:[#allocation2 + $0x4c0] sm:$0xff] }
  0xd0   :  { %2677 = vmatpush1.bf16.msra.mxu1 %v2676_v60  ;;  %2487 = vmatprep.subr.bf16.mxu0 %v2486_v61  ;;  %v340_v60 = vld [vmem:[#allocation2 + $0x640] sm:$0xff]  ;;  %v345_v61 = vld [vmem:[#allocation2 + $0x668] sm:$0xff]  ;;  %v375_v36 = vld [vmem:[#allocation2 + $0x758] sm:$0xff]  ;;  %v2710_v38 = vpack.c.bf16 %v298_v31, %v293_v30 }
  0xd1   :  { %2679 = vmatprep.subr.bf16.mxu1 %v2678_v2  ;;  %v351_v2 = vld [vmem:[#allocation2 + $0x698] sm:$0xff]  ;;  %v2508_v6 = vpack.c.bf16 %v345_v61, %v340_v60  ;;  %v381_v40 = vld [vmem:[#allocation2 + $0x788] sm:$0xff]  ;;  %v386_v41 = vld [vmem:[#allocation2 + $0x7b0] sm:$0xff] }
  0xd2   :  { %v303_v42 = vld [vmem:[#allocation2 + $0x518] sm:$0xff]  ;;  %v308_v43 = vld [vmem:[#allocation2 + $0x540] sm:$0xff]  ;;  %v385_v48 = vld [vmem:[#allocation2 + $0x7a8] sm:$0xff] }
  0xd3   :  { %2489 = vmatpush1.bf16.msra.mxu0 %v2488_v8  ;;  %v2510_v8 = vpack.c.bf16 %v356_v3, %v351_v2  ;;  %v302_v49 = vld [vmem:[#allocation2 + $0x510] sm:$0xff]  ;;  %v2714_v50 = vpack.c.bf16 %v308_v43, %v303_v42  ;;  %v391_v52 = vld [vmem:[#allocation2 + $0x7d8] sm:$0xff]  ;;  %v396_v53 = vld [vmem:[#allocation2 + $0x800] sm:$0xff] }
  0xd4   :  { %2681 = vmatpush1.bf16.msra.mxu1 %v2680_v9  ;;  %2491 = vmatprep.subr.bf16.mxu0 %v2490_v10  ;;  %v350_v9 = vld [vmem:[#allocation2 + $0x690] sm:$0xff]  ;;  %v355_v10 = vld [vmem:[#allocation2 + $0x6b8] sm:$0xff]  ;;  %v313_v54 = vld [vmem:[#allocation2 + $0x568] sm:$0xff] }
  0xd5   :  { %2683 = vmatprep.subr.bf16.mxu1 %v2682_v14  ;;  %v361_v14 = vld [vmem:[#allocation2 + $0x6e8] sm:$0xff]  ;;  %v2512_v18 = vpack.c.bf16 %v355_v10, %v350_v9  ;;  %v318_v55 = vld [vmem:[#allocation2 + $0x590] sm:$0xff]  ;;  %v395_v60 = vld [vmem:[#allocation2 + $0x7f8] sm:$0xff] }
  0xd6   :  { %792 = vmatmul.mubr.f32.vlgmr.msra.gmra.mrb[0].mxu0 %v3660_v20  ;;  %v312_v61 = vld [vmem:[#allocation2 + $0x560] sm:$0xff]  ;;  %v2718_v62 = vpack.c.bf16 %v318_v55, %v313_v54  ;;  %v401_v1 = vld [vmem:[#allocation2 + $0x828] sm:$0xff]  ;;  %v406_v2 = vld [vmem:[#allocation2 + $0x850] sm:$0xff] }
  0xd7   :  { %2493 = vmatpush1.bf16.msra.mxu0 %v2492_v21  ;;  %v2704_v21 = vpack.c.bf16 %v277_v13, %v272_v11  ;;  %862 = vmatprep.mubr.f32.mxu0 %v3666_v29  ;;  %v323_v3 = vld [vmem:[#allocation2 + $0x5b8] sm:$0xff]  ;;  %v328_v4 = vld [vmem:[#allocation2 + $0x5e0] sm:$0xff]  ;;  %v405_v9 = vld [vmem:[#allocation2 + $0x848] sm:$0xff] }
  0xd8   :  { %2685 = vmatpush1.bf16.msra.mxu1 %v2684_v22  ;;  %2495 = vmatprep.subr.bf16.mxu0 %v2494_v23  ;;  %v2514_v22 = vpack.c.bf16 %v366_v15, %v361_v14  ;;  %v365_v23 = vld [vmem:[#allocation2 + $0x708] sm:$0xff]  ;;  %v322_v10 = vld [vmem:[#allocation2 + $0x5b0] sm:$0xff]  ;;  %v2722_v11 = vpack.c.bf16 %v328_v4, %v323_v3  ;;  %v411_v13 = vld [vmem:[#allocation2 + $0x878] sm:$0xff] }
  0xd9   :  { %2687 = vmatprep.subr.bf16.mxu1 %v2686_v27  ;;  %v371_v27 = vld [vmem:[#allocation2 + $0x738] sm:$0xff]  ;;  %v2516_v32 = vpack.c.bf16 %v365_v23, %v360_v19  ;;  %v416_v14 = vld [vmem:[#allocation2 + $0x8a0] sm:$0xff]  ;;  %v333_v15 = vld [vmem:[#allocation2 + $0x608] sm:$0xff] }
  0xda   :  { %v338_v16 = vld [vmem:[#allocation2 + $0x630] sm:$0xff] }
  0xdb   :  { %2497 = vmatpush1.bf16.msra.mxu0 %v2496_v33  ;;  %v2708_v33 = vpack.c.bf16 %v287_v25, %v282_v24  ;;  %v410_v19 = vld [vmem:[#allocation2 + $0x870] sm:$0xff]  ;;  %v2726_v23 = vpack.c.bf16 %v338_v16, %v333_v15  ;;  %v337_v24 = vld [vmem:[#allocation2 + $0x628] sm:$0xff] }
  0xdc   :  { %2689 = vmatpush1.bf16.msra.mxu1 %v2688_v34  ;;  %2499 = vmatprep.subr.bf16.mxu0 %v2498_v35  ;;  %v2518_v34 = vpack.c.bf16 %v376_v28, %v371_v27  ;;  %v370_v35 = vld [vmem:[#allocation2 + $0x730] sm:$0xff]  ;;  %v421_v25 = vld [vmem:[#allocation2 + $0x8c8] sm:$0xff]  ;;  %v343_v27 = vld [vmem:[#allocation2 + $0x658] sm:$0xff] }
  0xdd   :  { %2691 = vmatprep.subr.bf16.mxu1 %v2690_v39  ;;  %v297_v39 = vld [vmem:[#allocation2 + $0x4e8] sm:$0xff]  ;;  %v2520_v44 = vpack.c.bf16 %v375_v36, %v370_v35  ;;  %v348_v28 = vld [vmem:[#allocation2 + $0x680] sm:$0xff]  ;;  %v347_v36 = vld [vmem:[#allocation2 + $0x678] sm:$0xff] }
  0xde   :  { %v2730_v35 = vpack.c.bf16 %v348_v28, %v343_v27  ;;  %v470_v28 = vld [vmem:[#allocation2 + $0xa50] sm:$0xff] }
  0xdf   :  { %2501 = vmatpush1.bf16.msra.mxu0 %v2500_v45  ;;  %v2712_v45 = vpack.c.bf16 %v297_v39, %v292_v37  ;;  %v431_v37 = vld [vmem:[#allocation2 + $0x918] sm:$0xff]  ;;  %v353_v39 = vld [vmem:[#allocation2 + $0x6a8] sm:$0xff] }
  0xe0   :  { %2693 = vmatpush1.bf16.msra.mxu1 %v2692_v46  ;;  %2503 = vmatprep.subr.bf16.mxu0 %v2502_v47  ;;  %v2522_v46 = vpack.c.bf16 %v386_v41, %v381_v40  ;;  %v380_v47 = vld [vmem:[#allocation2 + $0x780] sm:$0xff]  ;;  %v358_v40 = vld [vmem:[#allocation2 + $0x6d0] sm:$0xff] }
  0xe1   :  { %2695 = vmatprep.subr.bf16.mxu1 %v2694_v51  ;;  %v307_v51 = vld [vmem:[#allocation2 + $0x538] sm:$0xff]  ;;  %v2524_v56 = vpack.c.bf16 %v385_v48, %v380_v47  ;;  %v2734_v47 = vpack.c.bf16 %v358_v40, %v353_v39  ;;  %v357_v48 = vld [vmem:[#allocation2 + $0x6c8] sm:$0xff]  ;;  %v408_v39 = vld [vmem:[#allocation2 + $0x860] sm:$0xff] }
  0xe3   :  { %2505 = vmatpush1.bf16.msra.mxu0 %v2504_v57  ;;  %v2716_v57 = vpack.c.bf16 %v307_v51, %v302_v49  ;;  %v441_v49 = vld [vmem:[#allocation2 + $0x968] sm:$0xff]  ;;  %v363_v51 = vld [vmem:[#allocation2 + $0x6f8] sm:$0xff] }
  0xe4   :  { %2697 = vmatpush1.bf16.msra.mxu1 %v2696_v58  ;;  %2507 = vmatprep.subr.bf16.mxu0 %v2506_v59  ;;  %v2526_v58 = vpack.c.bf16 %v396_v53, %v391_v52  ;;  %v390_v59 = vld [vmem:[#allocation2 + $0x7d0] sm:$0xff]  ;;  %v368_v52 = vld [vmem:[#allocation2 + $0x720] sm:$0xff] }
  0xe5   :  { %2699 = vmatprep.subr.bf16.mxu1 %v2698_v63  ;;  %v317_v63 = vld [vmem:[#allocation2 + $0x588] sm:$0xff]  ;;  %v2528_v5 = vpack.c.bf16 %v395_v60, %v390_v59  ;;  %v2738_v59 = vpack.c.bf16 %v368_v52, %v363_v51  ;;  %v367_v60 = vld [vmem:[#allocation2 + $0x718] sm:$0xff]  ;;  %v418_v51 = vld [vmem:[#allocation2 + $0x8b0] sm:$0xff] }
  0xe7   :  { %2509 = vmatpush1.bf16.msra.mxu0 %v2508_v6  ;;  %v2720_v6 = vpack.c.bf16 %v317_v63, %v312_v61  ;;  %v451_v61 = vld [vmem:[#allocation2 + $0x9b8] sm:$0xff]  ;;  %v373_v63 = vld [vmem:[#allocation2 + $0x748] sm:$0xff] }
  0xe8   :  { %2701 = vmatpush1.bf16.msra.mxu1 %v2700_v7  ;;  %2511 = vmatprep.subr.bf16.mxu0 %v2510_v8  ;;  %v2530_v7 = vpack.c.bf16 %v406_v2, %v401_v1  ;;  %v400_v8 = vld [vmem:[#allocation2 + $0x820] sm:$0xff]  ;;  %v378_v1 = vld [vmem:[#allocation2 + $0x770] sm:$0xff] }
  0xe9   :  { %2703 = vmatprep.subr.bf16.mxu1 %v2702_v12  ;;  %v327_v12 = vld [vmem:[#allocation2 + $0x5d8] sm:$0xff]  ;;  %v2532_v17 = vpack.c.bf16 %v405_v9, %v400_v8  ;;  %v2742_v8 = vpack.c.bf16 %v378_v1, %v373_v63  ;;  %v377_v9 = vld [vmem:[#allocation2 + $0x768] sm:$0xff]  ;;  %v428_v63 = vld [vmem:[#allocation2 + $0x900] sm:$0xff] }
  0xeb   :  { %2513 = vmatpush1.bf16.msra.mxu0 %v2512_v18  ;;  %v2534_v18 = vpack.c.bf16 %v416_v14, %v411_v13  ;;  %v388_v13 = vld [vmem:[#allocation2 + $0x7c0] sm:$0xff] }
  0xec   :  { %2705 = vmatpush1.bf16.msra.mxu1 %v2704_v21  ;;  %2515 = vmatprep.subr.bf16.mxu0 %v2514_v22  ;;  %v415_v21 = vld [vmem:[#allocation2 + $0x898] sm:$0xff]  ;;  %v332_v22 = vld [vmem:[#allocation2 + $0x600] sm:$0xff] }
  0xed   :  { %2707 = vmatprep.subr.bf16.mxu1 %v2706_v26  ;;  %v426_v26 = vld [vmem:[#allocation2 + $0x8f0] sm:$0xff]  ;;  %v2728_v30 = vpack.c.bf16 %v337_v24, %v332_v22  ;;  %v471_v22 = vld [vmem:[#allocation2 + $0xa58] sm:$0xff]  ;;  %v393_v24 = vld [vmem:[#allocation2 + $0x7e8] sm:$0xff] }
  0xee   :  { %v2538_v31 = vpack.c.bf16 %v426_v26, %v421_v25  ;;  %v398_v25 = vld [vmem:[#allocation2 + $0x810] sm:$0xff] }
  0xef   :  { %2517 = vmatpush1.bf16.msra.mxu0 %v2516_v32  ;;  %v420_v32 = vld [vmem:[#allocation2 + $0x8c0] sm:$0xff]  ;;  %v3674_v26 = vld [vmem:[%s3763_s0 + $0x10] sm:$0xff] }
  0xf0   :  { %2709 = vmatpush1.bf16.msra.mxu1 %v2708_v33  ;;  %2519 = vmatprep.subr.bf16.mxu0 %v2518_v34  ;;  %v425_v33 = vld [vmem:[#allocation2 + $0x8e8] sm:$0xff]  ;;  %v342_v34 = vld [vmem:[#allocation2 + $0x650] sm:$0xff] }
  0xf1   :  { %2711 = vmatprep.subr.bf16.mxu1 %v2710_v38  ;;  %v436_v38 = vld [vmem:[#allocation2 + $0x940] sm:$0xff]  ;;  %v2540_v41 = vpack.c.bf16 %v425_v33, %v420_v32  ;;  %v2732_v42 = vpack.c.bf16 %v347_v36, %v342_v34  ;;  %v3679_v33 = vld [vmem:[%s3763_s0 + $0x28] sm:$0xff]  ;;  %v2750_v34 = vpack.c.bf16 %v398_v25, %v393_v24 }
  0xf2   :  { %v2542_v43 = vpack.c.bf16 %v436_v38, %v431_v37  ;;  %v392_v32 = vld [vmem:[#allocation2 + $0x7e0] sm:$0xff]  ;;  %v481_v36 = vld [vmem:[#allocation2 + $0xaa8] sm:$0xff]  ;;  %v486_v37 = vld [vmem:[#allocation2 + $0xad0] sm:$0xff] }
  0xf3   :  { %2521 = vmatpush1.bf16.msra.mxu0 %v2520_v44  ;;  %v430_v44 = vld [vmem:[#allocation2 + $0x910] sm:$0xff]  ;;  %v403_v38 = vld [vmem:[#allocation2 + $0x838] sm:$0xff]  ;;  %v448_v24 = vld [vmem:[#allocation2 + $0x9a0] sm:$0xff] }
  0xf4   :  { %2713 = vmatpush1.bf16.msra.mxu1 %v2712_v45  ;;  %2523 = vmatprep.subr.bf16.mxu0 %v2522_v46  ;;  %v435_v45 = vld [vmem:[#allocation2 + $0x938] sm:$0xff]  ;;  %v352_v46 = vld [vmem:[#allocation2 + $0x6a0] sm:$0xff] }
  0xf5   :  { %2715 = vmatprep.subr.bf16.mxu1 %v2714_v50  ;;  %v446_v50 = vld [vmem:[#allocation2 + $0x990] sm:$0xff]  ;;  %v2544_v53 = vpack.c.bf16 %v435_v45, %v430_v44  ;;  %v2736_v54 = vpack.c.bf16 %v357_v48, %v352_v46  ;;  %v485_v44 = vld [vmem:[#allocation2 + $0xac8] sm:$0xff]  ;;  %v2754_v46 = vpack.c.bf16 %v408_v39, %v403_v38  ;;  %v491_v48 = vld [vmem:[#allocation2 + $0xaf8] sm:$0xff] }
  0xf6   :  { %v2546_v55 = vpack.c.bf16 %v446_v50, %v441_v49  ;;  %v402_v45 = vld [vmem:[#allocation2 + $0x830] sm:$0xff]  ;;  %v496_v49 = vld [vmem:[#allocation2 + $0xb20] sm:$0xff]  ;;  %v413_v50 = vld [vmem:[#allocation2 + $0x888] sm:$0xff] }
  0xf7   :  { %2525 = vmatpush1.bf16.msra.mxu0 %v2524_v56  ;;  %1076 = vmatmul.mubr.f32.vlgmr.msra.gmra.mrb[2].mxu1 %v3660_v20  ;;  %v2724_v20 = vpack.c.bf16 %v327_v12, %v322_v10  ;;  %v440_v56 = vld [vmem:[#allocation2 + $0x960] sm:$0xff]  ;;  %v461_v10 = vld [vmem:[#allocation2 + $0xa08] sm:$0xff]  ;;  %v383_v12 = vld [vmem:[#allocation2 + $0x798] sm:$0xff] }
  0xf8   :  { %2717 = vmatpush1.bf16.msra.mxu1 %v2716_v57  ;;  %2527 = vmatprep.subr.bf16.mxu0 %v2526_v58  ;;  %v445_v57 = vld [vmem:[#allocation2 + $0x988] sm:$0xff]  ;;  %v362_v58 = vld [vmem:[#allocation2 + $0x6f0] sm:$0xff] }
  0xf9   :  { %2719 = vmatprep.subr.bf16.mxu1 %v2718_v62  ;;  %1146 = vmatprep.mubr.f32.mxu1 %v3666_v29  ;;  %v2536_v29 = vpack.c.bf16 %v415_v21, %v410_v19  ;;  %v456_v62 = vld [vmem:[#allocation2 + $0x9e0] sm:$0xff]  ;;  %v2548_v2 = vpack.c.bf16 %v445_v57, %v440_v56  ;;  %v2740_v3 = vpack.c.bf16 %v367_v60, %v362_v58  ;;  %v387_v21 = vld [vmem:[#allocation2 + $0x7b8] sm:$0xff]  ;;  %v501_v60 = vld [vmem:[#allocation2 + $0xb48] sm:$0xff] }
  0xfa   :  { %v2550_v4 = vpack.c.bf16 %v456_v62, %v451_v61  ;;  %v2746_v19 = vpack.c.bf16 %v388_v13, %v383_v12  ;;  %v495_v56 = vld [vmem:[#allocation2 + $0xb18] sm:$0xff]  ;;  %v412_v57 = vld [vmem:[#allocation2 + $0x880] sm:$0xff]  ;;  %v2758_v58 = vpack.c.bf16 %v418_v51, %v413_v50  ;;  %v506_v61 = vld [vmem:[#allocation2 + $0xb70] sm:$0xff] }
  0xfb   :  { %2529 = vmatpush1.bf16.msra.mxu0 %v2528_v5  ;;  %v450_v5 = vld [vmem:[#allocation2 + $0x9b0] sm:$0xff]  ;;  %v423_v62 = vld [vmem:[#allocation2 + $0x8d8] sm:$0xff]  ;;  %v468_v50 = vld [vmem:[#allocation2 + $0xa40] sm:$0xff] }
  0xfc   :  { %2721 = vmatpush1.bf16.msra.mxu1 %v2720_v6  ;;  %2531 = vmatprep.subr.bf16.mxu0 %v2530_v7  ;;  %v455_v6 = vld [vmem:[#allocation2 + $0x9d8] sm:$0xff]  ;;  %v372_v7 = vld [vmem:[#allocation2 + $0x740] sm:$0xff]  ;;  %v438_v12 = vld [vmem:[#allocation2 + $0x950] sm:$0xff] }
  0xfd   :  { %2723 = vmatprep.subr.bf16.mxu1 %v2722_v11  ;;  %v466_v11 = vld [vmem:[#allocation2 + $0xa30] sm:$0xff]  ;;  %v2552_v14 = vpack.c.bf16 %v455_v6, %v450_v5  ;;  %v2744_v15 = vpack.c.bf16 %v377_v9, %v372_v7  ;;  %v505_v5 = vld [vmem:[#allocation2 + $0xb68] sm:$0xff]  ;;  %v2762_v7 = vpack.c.bf16 %v428_v63, %v423_v62  ;;  %v511_v9 = vld [vmem:[#allocation2 + $0xb98] sm:$0xff] }
  0xfe   :  { %v2554_v16 = vpack.c.bf16 %v466_v11, %v461_v10  ;;  %v422_v6 = vld [vmem:[#allocation2 + $0x8d0] sm:$0xff]  ;;  %v516_v10 = vld [vmem:[#allocation2 + $0xbc0] sm:$0xff]  ;;  %v433_v11 = vld [vmem:[#allocation2 + $0x928] sm:$0xff] }
  0xff   :  { %2533 = vmatpush1.bf16.msra.mxu0 %v2532_v17  ;;  %v460_v17 = vld [vmem:[#allocation2 + $0xa00] sm:$0xff]  ;;  %v458_v38 = vld [vmem:[#allocation2 + $0x9f0] sm:$0xff] }
 0x100   :  { %2725 = vmatpush1.bf16.msra.mxu1 %v2724_v20  ;;  %2535 = vmatprep.subr.bf16.mxu0 %v2534_v18  ;;  %v465_v20 = vld [vmem:[#allocation2 + $0xa28] sm:$0xff]  ;;  %v382_v18 = vld [vmem:[#allocation2 + $0x790] sm:$0xff] }
 0x101   :  { %2727 = vmatprep.subr.bf16.mxu1 %v2726_v23  ;;  %v476_v23 = vld [vmem:[#allocation2 + $0xa80] sm:$0xff]  ;;  %v2556_v27 = vpack.c.bf16 %v465_v20, %v460_v17  ;;  %v515_v17 = vld [vmem:[#allocation2 + $0xbb8] sm:$0xff]  ;;  %v478_v62 = vld [vmem:[#allocation2 + $0xa90] sm:$0xff] }
 0x102   :  { %v432_v20 = vld [vmem:[#allocation2 + $0x920] sm:$0xff] }
 0x103   :  { %2537 = vmatpush1.bf16.msra.mxu0 %v2536_v29  ;;  %v2748_v29 = vpack.c.bf16 %v387_v21, %v382_v18  ;;  %v2766_v18 = vpack.c.bf16 %v438_v12, %v433_v11  ;;  %v521_v21 = vld [vmem:[#allocation2 + $0xbe8] sm:$0xff]  ;;  %v488_v11 = vld [vmem:[#allocation2 + $0xae0] sm:$0xff] }
 0x104   :  { %2729 = vmatpush1.bf16.msra.mxu1 %v2728_v30  ;;  %2539 = vmatprep.subr.bf16.mxu0 %v2538_v31  ;;  %v2558_v30 = vpack.c.bf16 %v476_v23, %v471_v22  ;;  %v475_v31 = vld [vmem:[#allocation2 + $0xa78] sm:$0xff]  ;;  %v526_v22 = vld [vmem:[#allocation2 + $0xc10] sm:$0xff] }
 0x105   :  { %2731 = vmatprep.subr.bf16.mxu1 %v2730_v35  ;;  %v397_v35 = vld [vmem:[#allocation2 + $0x808] sm:$0xff]  ;;  %v2560_v40 = vpack.c.bf16 %v475_v31, %v470_v28  ;;  %v443_v23 = vld [vmem:[#allocation2 + $0x978] sm:$0xff]  ;;  %v2578_v28 = vpack.c.bf16 %v526_v22, %v521_v21  ;;  %v442_v31 = vld [vmem:[#allocation2 + $0x970] sm:$0xff] }
 0x106   :  { %v576_v21 = vld [vmem:[#allocation2 + $0xda0] sm:$0xff]  ;;  %v493_v22 = vld [vmem:[#allocation2 + $0xb08] sm:$0xff] }
 0x107   :  { %2541 = vmatpush1.bf16.msra.mxu0 %v2540_v41  ;;  %v2752_v41 = vpack.c.bf16 %v397_v35, %v392_v32  ;;  %v2770_v32 = vpack.c.bf16 %v448_v24, %v443_v23  ;;  %v531_v35 = vld [vmem:[#allocation2 + $0xc38] sm:$0xff]  ;;  %v498_v23 = vld [vmem:[#allocation2 + $0xb30] sm:$0xff] }
 0x108   :  { %2733 = vmatpush1.bf16.msra.mxu1 %v2732_v42  ;;  %2543 = vmatprep.subr.bf16.mxu0 %v2542_v43  ;;  %v2562_v42 = vpack.c.bf16 %v486_v37, %v481_v36  ;;  %v480_v43 = vld [vmem:[#allocation2 + $0xaa0] sm:$0xff]  ;;  %v453_v37 = vld [vmem:[#allocation2 + $0x9c8] sm:$0xff] }
 0x109   :  { %2735 = vmatprep.subr.bf16.mxu1 %v2734_v47  ;;  %v407_v47 = vld [vmem:[#allocation2 + $0x858] sm:$0xff]  ;;  %v2564_v52 = vpack.c.bf16 %v485_v44, %v480_v43  ;;  %v536_v36 = vld [vmem:[#allocation2 + $0xc60] sm:$0xff] }
 0x10a   :  { %v535_v43 = vld [vmem:[#allocation2 + $0xc58] sm:$0xff]  ;;  %v452_v44 = vld [vmem:[#allocation2 + $0x9c0] sm:$0xff] }
 0x10b   :  { %2545 = vmatpush1.bf16.msra.mxu0 %v2544_v53  ;;  %v2756_v53 = vpack.c.bf16 %v407_v47, %v402_v45  ;;  %v2774_v45 = vpack.c.bf16 %v458_v38, %v453_v37  ;;  %v541_v47 = vld [vmem:[#allocation2 + $0xc88] sm:$0xff] }
 0x10c   :  { %2737 = vmatpush1.bf16.msra.mxu1 %v2736_v54  ;;  %2547 = vmatprep.subr.bf16.mxu0 %v2546_v55  ;;  %v2566_v54 = vpack.c.bf16 %v496_v49, %v491_v48  ;;  %v490_v55 = vld [vmem:[#allocation2 + $0xaf0] sm:$0xff]  ;;  %v463_v49 = vld [vmem:[#allocation2 + $0xa18] sm:$0xff] }
 0x10d   :  { %2739 = vmatprep.subr.bf16.mxu1 %v2738_v59  ;;  %v417_v59 = vld [vmem:[#allocation2 + $0x8a8] sm:$0xff]  ;;  %v2568_v1 = vpack.c.bf16 %v495_v56, %v490_v55  ;;  %v546_v48 = vld [vmem:[#allocation2 + $0xcb0] sm:$0xff] }
 0x10e   :  { %v545_v55 = vld [vmem:[#allocation2 + $0xca8] sm:$0xff]  ;;  %v462_v56 = vld [vmem:[#allocation2 + $0xa10] sm:$0xff] }
 0x10f   :  { %2549 = vmatpush1.bf16.msra.mxu0 %v2548_v2  ;;  %v2760_v2 = vpack.c.bf16 %v417_v59, %v412_v57  ;;  %v2778_v57 = vpack.c.bf16 %v468_v50, %v463_v49  ;;  %v551_v59 = vld [vmem:[#allocation2 + $0xcd8] sm:$0xff] }
 0x110   :  { %2741 = vmatpush1.bf16.msra.mxu1 %v2740_v3  ;;  %2551 = vmatprep.subr.bf16.mxu0 %v2550_v4  ;;  %v2570_v3 = vpack.c.bf16 %v506_v61, %v501_v60  ;;  %v500_v4 = vld [vmem:[#allocation2 + $0xb40] sm:$0xff]  ;;  %v473_v61 = vld [vmem:[#allocation2 + $0xa68] sm:$0xff] }
 0x111   :  { %2743 = vmatprep.subr.bf16.mxu1 %v2742_v8  ;;  %v427_v8 = vld [vmem:[#allocation2 + $0x8f8] sm:$0xff]  ;;  %v2572_v13 = vpack.c.bf16 %v505_v5, %v500_v4  ;;  %v556_v60 = vld [vmem:[#allocation2 + $0xd00] sm:$0xff] }
 0x112   :  { %v555_v4 = vld [vmem:[#allocation2 + $0xcf8] sm:$0xff]  ;;  %v472_v5 = vld [vmem:[#allocation2 + $0xa60] sm:$0xff] }
 0x113   :  { %2553 = vmatpush1.bf16.msra.mxu0 %v2552_v14  ;;  %v2764_v14 = vpack.c.bf16 %v427_v8, %v422_v6  ;;  %v2782_v6 = vpack.c.bf16 %v478_v62, %v473_v61  ;;  %v561_v8 = vld [vmem:[#allocation2 + $0xd28] sm:$0xff] }
 0x114   :  { %2745 = vmatpush1.bf16.msra.mxu1 %v2744_v15  ;;  %2555 = vmatprep.subr.bf16.mxu0 %v2554_v16  ;;  %v2574_v15 = vpack.c.bf16 %v516_v10, %v511_v9  ;;  %v510_v16 = vld [vmem:[#allocation2 + $0xb90] sm:$0xff]  ;;  %v483_v10 = vld [vmem:[#allocation2 + $0xab8] sm:$0xff] }
 0x115   :  { %2747 = vmatprep.subr.bf16.mxu1 %v2746_v19  ;;  %v437_v19 = vld [vmem:[#allocation2 + $0x948] sm:$0xff]  ;;  %v2576_v25 = vpack.c.bf16 %v515_v17, %v510_v16  ;;  %v566_v9 = vld [vmem:[#allocation2 + $0xd50] sm:$0xff] }
 0x116   :  { %863 = vmatmul.mubr.f32.vlgmr.msra.gmra.mrb[0].mxu0 %v3674_v26  ;;  %v565_v16 = vld [vmem:[#allocation2 + $0xd48] sm:$0xff]  ;;  %v482_v17 = vld [vmem:[#allocation2 + $0xab0] sm:$0xff] }
 0x117   :  { %2557 = vmatpush1.bf16.msra.mxu0 %v2556_v27  ;;  %933 = vmatprep.mubr.f32.mxu0 %v3679_v33  ;;  %v2768_v27 = vpack.c.bf16 %v437_v19, %v432_v20  ;;  %v2786_v20 = vpack.c.bf16 %v488_v11, %v483_v10  ;;  %v571_v19 = vld [vmem:[#allocation2 + $0xd78] sm:$0xff] }
 0x118   :  { %2749 = vmatpush1.bf16.msra.mxu1 %v2748_v29  ;;  %2559 = vmatprep.subr.bf16.mxu0 %v2558_v30  ;;  %v520_v29 = vld [vmem:[#allocation2 + $0xbe0] sm:$0xff]  ;;  %v525_v30 = vld [vmem:[#allocation2 + $0xc08] sm:$0xff] }
 0x119   :  { %2751 = vmatprep.subr.bf16.mxu1 %v2750_v34  ;;  %v447_v34 = vld [vmem:[#allocation2 + $0x998] sm:$0xff]  ;;  %v2580_v39 = vpack.c.bf16 %v525_v30, %v520_v29  ;;  %v492_v29 = vld [vmem:[#allocation2 + $0xb00] sm:$0xff]  ;;  %v2790_v30 = vpack.c.bf16 %v498_v23, %v493_v22 }
 0x11b   :  { %2561 = vmatpush1.bf16.msra.mxu0 %v2560_v40  ;;  %v2772_v40 = vpack.c.bf16 %v447_v34, %v442_v31  ;;  %v497_v31 = vld [vmem:[#allocation2 + $0xb28] sm:$0xff]  ;;  %v586_v34 = vld [vmem:[#allocation2 + $0xdf0] sm:$0xff] }
 0x11c   :  { %2753 = vmatpush1.bf16.msra.mxu1 %v2752_v41  ;;  %2563 = vmatprep.subr.bf16.mxu0 %v2562_v42  ;;  %v2582_v41 = vpack.c.bf16 %v536_v36, %v531_v35  ;;  %v530_v42 = vld [vmem:[#allocation2 + $0xc30] sm:$0xff]  ;;  %v503_v35 = vld [vmem:[#allocation2 + $0xb58] sm:$0xff]  ;;  %v508_v36 = vld [vmem:[#allocation2 + $0xb80] sm:$0xff]  ;;  %v2792_v38 = vpack.c.bf16 %v497_v31, %v492_v29 }
 0x11d   :  { %2755 = vmatprep.subr.bf16.mxu1 %v2754_v46  ;;  %v457_v46 = vld [vmem:[#allocation2 + $0x9e8] sm:$0xff]  ;;  %v2584_v51 = vpack.c.bf16 %v535_v43, %v530_v42  ;;  %v502_v42 = vld [vmem:[#allocation2 + $0xb50] sm:$0xff]  ;;  %v2794_v43 = vpack.c.bf16 %v508_v36, %v503_v35  ;;  %v547_v29 = vld [vmem:[#allocation2 + $0xcb8] sm:$0xff] }
 0x11e   :  { %v239_v31 = vld [vmem:[#allocation2 + $0x318] sm:$0xff]  ;;  %v3688_v35 = vld [vmem:[%s3763_s0 + $0x20] sm:$0xff] }
 0x11f   :  { %2565 = vmatpush1.bf16.msra.mxu0 %v2564_v52  ;;  %v2776_v52 = vpack.c.bf16 %v457_v46, %v452_v44  ;;  %v507_v44 = vld [vmem:[#allocation2 + $0xb78] sm:$0xff]  ;;  %v596_v46 = vld [vmem:[#allocation2 + $0xe40] sm:$0xff] }
 0x120   :  { %2757 = vmatpush1.bf16.msra.mxu1 %v2756_v53  ;;  %2567 = vmatprep.subr.bf16.mxu0 %v2566_v54  ;;  %v2586_v53 = vpack.c.bf16 %v546_v48, %v541_v47  ;;  %v540_v54 = vld [vmem:[#allocation2 + $0xc80] sm:$0xff]  ;;  %v513_v47 = vld [vmem:[#allocation2 + $0xba8] sm:$0xff]  ;;  %v518_v48 = vld [vmem:[#allocation2 + $0xbd0] sm:$0xff]  ;;  %v2796_v50 = vpack.c.bf16 %v507_v44, %v502_v42 }
 0x121   :  { %2759 = vmatprep.subr.bf16.mxu1 %v2758_v58  ;;  %v467_v58 = vld [vmem:[#allocation2 + $0xa38] sm:$0xff]  ;;  %v2588_v63 = vpack.c.bf16 %v545_v55, %v540_v54  ;;  %v512_v54 = vld [vmem:[#allocation2 + $0xba0] sm:$0xff]  ;;  %v2798_v55 = vpack.c.bf16 %v518_v48, %v513_v47 }
 0x122   :  { %v244_v44 = vld [vmem:[#allocation2 + $0x340] sm:$0xff] }
 0x123   :  { %2569 = vmatpush1.bf16.msra.mxu0 %v2568_v1  ;;  %v2780_v1 = vpack.c.bf16 %v467_v58, %v462_v56  ;;  %v517_v56 = vld [vmem:[#allocation2 + $0xbc8] sm:$0xff]  ;;  %v606_v58 = vld [vmem:[#allocation2 + $0xe90] sm:$0xff]  ;;  %v568_v47 = vld [vmem:[#allocation2 + $0xd60] sm:$0xff] }
 0x124   :  { %2761 = vmatpush1.bf16.msra.mxu1 %v2760_v2  ;;  %2571 = vmatprep.subr.bf16.mxu0 %v2570_v3  ;;  %v2590_v2 = vpack.c.bf16 %v556_v60, %v551_v59  ;;  %v550_v3 = vld [vmem:[#allocation2 + $0xcd0] sm:$0xff]  ;;  %v523_v59 = vld [vmem:[#allocation2 + $0xbf8] sm:$0xff]  ;;  %v528_v60 = vld [vmem:[#allocation2 + $0xc20] sm:$0xff]  ;;  %v2800_v62 = vpack.c.bf16 %v517_v56, %v512_v54 }
 0x125   :  { %2763 = vmatprep.subr.bf16.mxu1 %v2762_v7  ;;  %v477_v7 = vld [vmem:[#allocation2 + $0xa88] sm:$0xff]  ;;  %v2592_v12 = vpack.c.bf16 %v555_v4, %v550_v3  ;;  %v522_v3 = vld [vmem:[#allocation2 + $0xbf0] sm:$0xff]  ;;  %v2802_v4 = vpack.c.bf16 %v528_v60, %v523_v59  ;;  %v567_v56 = vld [vmem:[#allocation2 + $0xd58] sm:$0xff] }
 0x126   :  { %v169_v54 = vld [vmem:[#allocation2 + $0xe8] sm:$0xff]  ;;  %v578_v60 = vld [vmem:[#allocation2 + $0xdb0] sm:$0xff] }
 0x127   :  { %2573 = vmatpush1.bf16.msra.mxu0 %v2572_v13  ;;  %v2784_v13 = vpack.c.bf16 %v477_v7, %v472_v5  ;;  %v527_v5 = vld [vmem:[#allocation2 + $0xc18] sm:$0xff]  ;;  %v616_v7 = vld [vmem:[#allocation2 + $0xee0] sm:$0xff]  ;;  %v573_v59 = vld [vmem:[#allocation2 + $0xd88] sm:$0xff] }
 0x128   :  { %2765 = vmatpush1.bf16.msra.mxu1 %v2764_v14  ;;  %2575 = vmatprep.subr.bf16.mxu0 %v2574_v15  ;;  %v2594_v14 = vpack.c.bf16 %v566_v9, %v561_v8  ;;  %v560_v15 = vld [vmem:[#allocation2 + $0xd20] sm:$0xff]  ;;  %v533_v8 = vld [vmem:[#allocation2 + $0xc48] sm:$0xff]  ;;  %v538_v9 = vld [vmem:[#allocation2 + $0xc70] sm:$0xff]  ;;  %v2804_v11 = vpack.c.bf16 %v527_v5, %v522_v3 }
 0x129   :  { %2767 = vmatprep.subr.bf16.mxu1 %v2766_v18  ;;  %v487_v18 = vld [vmem:[#allocation2 + $0xad8] sm:$0xff]  ;;  %v2596_v24 = vpack.c.bf16 %v565_v16, %v560_v15  ;;  %v532_v15 = vld [vmem:[#allocation2 + $0xc40] sm:$0xff]  ;;  %v2806_v16 = vpack.c.bf16 %v538_v9, %v533_v8  ;;  %v577_v5 = vld [vmem:[#allocation2 + $0xda8] sm:$0xff] }
 0x12a   :  { %v179_v3 = vld [vmem:[#allocation2 + $0x138] sm:$0xff]  ;;  %v588_v9 = vld [vmem:[#allocation2 + $0xe00] sm:$0xff] }
 0x12b   :  { %2577 = vmatpush1.bf16.msra.mxu0 %v2576_v25  ;;  %v2598_v25 = vpack.c.bf16 %v576_v21, %v571_v19  ;;  %v543_v19 = vld [vmem:[#allocation2 + $0xc98] sm:$0xff]  ;;  %v548_v21 = vld [vmem:[#allocation2 + $0xcc0] sm:$0xff] }
 0x12c   :  { %2769 = vmatpush1.bf16.msra.mxu1 %v2768_v27  ;;  %2579 = vmatprep.subr.bf16.mxu0 %v2578_v28  ;;  %v570_v27 = vld [vmem:[#allocation2 + $0xd70] sm:$0xff]  ;;  %v575_v28 = vld [vmem:[#allocation2 + $0xd98] sm:$0xff] }
 0x12d   :  { %2771 = vmatprep.subr.bf16.mxu1 %v2770_v32  ;;  %v581_v32 = vld [vmem:[#allocation2 + $0xdc8] sm:$0xff]  ;;  %v2600_v37 = vpack.c.bf16 %v575_v28, %v570_v27  ;;  %v2810_v28 = vpack.c.bf16 %v548_v21, %v543_v19  ;;  %v583_v8 = vld [vmem:[#allocation2 + $0xdd8] sm:$0xff]  ;;  %v598_v21 = vld [vmem:[#allocation2 + $0xe50] sm:$0xff] }
 0x12e   :  { %v149_v27 = vld [vmem:[#allocation2 + $0x48] sm:$0xff] }
 0x12f   :  { %2581 = vmatpush1.bf16.msra.mxu0 %v2580_v39  ;;  %v2602_v39 = vpack.c.bf16 %v586_v34, %v581_v32  ;;  %v553_v32 = vld [vmem:[#allocation2 + $0xce8] sm:$0xff]  ;;  %v558_v34 = vld [vmem:[#allocation2 + $0xd10] sm:$0xff] }
 0x130   :  { %2773 = vmatpush1.bf16.msra.mxu1 %v2772_v40  ;;  %2583 = vmatprep.subr.bf16.mxu0 %v2582_v41  ;;  %v580_v40 = vld [vmem:[#allocation2 + $0xdc0] sm:$0xff]  ;;  %v585_v41 = vld [vmem:[#allocation2 + $0xde8] sm:$0xff]  ;;  %v2814_v42 = vpack.c.bf16 %v558_v34, %v553_v32  ;;  %v603_v32 = vld [vmem:[#allocation2 + $0xe78] sm:$0xff] }
 0x131   :  { %2775 = vmatprep.subr.bf16.mxu1 %v2774_v45  ;;  %v591_v45 = vld [vmem:[#allocation2 + $0xe18] sm:$0xff]  ;;  %v2604_v49 = vpack.c.bf16 %v585_v41, %v580_v40  ;;  %v154_v40 = vld [vmem:[#allocation2 + $0x70] sm:$0xff]  ;;  %v593_v19 = vld [vmem:[#allocation2 + $0xe28] sm:$0xff] }
 0x132   :  { %v159_v41 = vld [vmem:[#allocation2 + $0x98] sm:$0xff]  ;;  %v608_v34 = vld [vmem:[#allocation2 + $0xea0] sm:$0xff] }
 0x133   :  { %2585 = vmatpush1.bf16.msra.mxu0 %v2584_v51  ;;  %v2606_v51 = vpack.c.bf16 %v596_v46, %v591_v45  ;;  %v249_v45 = vld [vmem:[#allocation2 + $0x368] sm:$0xff]  ;;  %v563_v46 = vld [vmem:[#allocation2 + $0xd38] sm:$0xff]  ;;  %v2880_v48 = vpack.c.bf16 %v159_v41, %v154_v40  ;;  %v204_v40 = vld [vmem:[#allocation2 + $0x200] sm:$0xff] }
 0x134   :  { %2777 = vmatpush1.bf16.msra.mxu1 %v2776_v52  ;;  %2587 = vmatprep.subr.bf16.mxu0 %v2586_v53  ;;  %v590_v52 = vld [vmem:[#allocation2 + $0xe10] sm:$0xff]  ;;  %v595_v53 = vld [vmem:[#allocation2 + $0xe38] sm:$0xff]  ;;  %v209_v41 = vld [vmem:[#allocation2 + $0x228] sm:$0xff] }
 0x135   :  { %2779 = vmatprep.subr.bf16.mxu1 %v2778_v57  ;;  %v601_v57 = vld [vmem:[#allocation2 + $0xe68] sm:$0xff]  ;;  %v2608_v61 = vpack.c.bf16 %v595_v53, %v590_v52  ;;  %v2882_v52 = vpack.c.bf16 %v249_v45, %v244_v44  ;;  %v164_v53 = vld [vmem:[#allocation2 + $0xc0] sm:$0xff]  ;;  %v294_v44 = vld [vmem:[#allocation2 + $0x4d0] sm:$0xff] }
 0x136   :  { %v299_v45 = vld [vmem:[#allocation2 + $0x4f8] sm:$0xff] }
 0x137   :  { %2589 = vmatpush1.bf16.msra.mxu0 %v2588_v63  ;;  %1147 = vmatmul.mubr.f32.vlgmr.msra.gmra.mrb[2].mxu1 %v3674_v26  ;;  %v2788_v26 = vpack.c.bf16 %v487_v18, %v482_v17  ;;  %v2610_v63 = vpack.c.bf16 %v606_v58, %v601_v57  ;;  %v537_v17 = vld [vmem:[#allocation2 + $0xc68] sm:$0xff]  ;;  %v254_v57 = vld [vmem:[#allocation2 + $0x390] sm:$0xff]  ;;  %v259_v58 = vld [vmem:[#allocation2 + $0x3b8] sm:$0xff] }
 0x138   :  { %2781 = vmatpush1.bf16.msra.mxu1 %v2780_v1  ;;  %2591 = vmatprep.subr.bf16.mxu0 %v2590_v2  ;;  %v600_v1 = vld [vmem:[#allocation2 + $0xe60] sm:$0xff]  ;;  %v605_v2 = vld [vmem:[#allocation2 + $0xe88] sm:$0xff]  ;;  %v2808_v23 = vpack.c.bf16 %v537_v17, %v532_v15  ;;  %v587_v17 = vld [vmem:[#allocation2 + $0xdf8] sm:$0xff] }
 0x139   :  { %2783 = vmatprep.subr.bf16.mxu1 %v2782_v6  ;;  %1217 = vmatprep.mubr.f32.mxu1 %v3679_v33  ;;  %v611_v6 = vld [vmem:[#allocation2 + $0xeb8] sm:$0xff]  ;;  %v2612_v10 = vpack.c.bf16 %v605_v2, %v600_v1  ;;  %v229_v18 = vld [vmem:[#allocation2 + $0x2c8] sm:$0xff]  ;;  %v2886_v1 = vpack.c.bf16 %v259_v58, %v254_v57  ;;  %v174_v2 = vld [vmem:[#allocation2 + $0x110] sm:$0xff] }
 0x13a   :  { %v189_v15 = vld [vmem:[#allocation2 + $0x188] sm:$0xff]  ;;  %v623_v58 = vld [vmem:[#allocation2 + $0xf18] sm:$0xff] }
 0x13b   :  { %2593 = vmatpush1.bf16.msra.mxu0 %v2592_v12  ;;  %v2614_v12 = vpack.c.bf16 %v616_v7, %v611_v6  ;;  %v264_v6 = vld [vmem:[#allocation2 + $0x3e0] sm:$0xff]  ;;  %v269_v7 = vld [vmem:[#allocation2 + $0x408] sm:$0xff] }
 0x13c   :  { %2785 = vmatpush1.bf16.msra.mxu1 %v2784_v13  ;;  %2595 = vmatprep.subr.bf16.mxu0 %v2594_v14  ;;  %v610_v13 = vld [vmem:[#allocation2 + $0xeb0] sm:$0xff]  ;;  %v615_v14 = vld [vmem:[#allocation2 + $0xed8] sm:$0xff]  ;;  %v549_v57 = vld [vmem:[#allocation2 + $0xcc8] sm:$0xff] }
 0x13d   :  { %2787 = vmatprep.subr.bf16.mxu1 %v2786_v20  ;;  %v224_v20 = vld [vmem:[#allocation2 + $0x2a0] sm:$0xff]  ;;  %v2616_v22 = vpack.c.bf16 %v615_v14, %v610_v13  ;;  %v2890_v13 = vpack.c.bf16 %v269_v7, %v264_v6  ;;  %v638_v6 = vld [vmem:[#allocation2 + $0xf90] sm:$0xff] }
 0x13e   :  { %v184_v14 = vld [vmem:[#allocation2 + $0x160] sm:$0xff]  ;;  %v554_v7 = vld [vmem:[#allocation2 + $0xcf0] sm:$0xff] }
 0x13f   :  { %2597 = vmatpush1.bf16.msra.mxu0 %v2596_v24  ;;  %v542_v24 = vld [vmem:[#allocation2 + $0xc90] sm:$0xff] }
 0x140   :  { %2789 = vmatpush1.bf16.msra.mxu1 %v2788_v26  ;;  %2599 = vmatprep.subr.bf16.mxu0 %v2598_v25  ;;  %v2874_v26 = vpack.c.bf16 %v229_v18, %v224_v20  ;;  %v144_v25 = vld [vmem:[#allocation2 + $0x20] sm:$0xff]  ;;  %v274_v20 = vld [vmem:[#allocation2 + $0x430] sm:$0xff]  ;;  %v279_v18 = vld [vmem:[#allocation2 + $0x458] sm:$0xff] }
 0x141   :  { %2791 = vmatprep.subr.bf16.mxu1 %v2790_v30  ;;  %v234_v30 = vld [vmem:[#allocation2 + $0x2f0] sm:$0xff]  ;;  %v2876_v36 = vpack.c.bf16 %v149_v27, %v144_v25  ;;  %v199_v27 = vld [vmem:[#allocation2 + $0x1d8] sm:$0xff] }
 0x142   :  { %v194_v25 = vld [vmem:[#allocation2 + $0x1b0] sm:$0xff] }
 0x143   :  { %2601 = vmatpush1.bf16.msra.mxu0 %v2600_v37  ;;  %v2812_v37 = vpack.c.bf16 %v547_v29, %v542_v24  ;;  %v592_v24 = vld [vmem:[#allocation2 + $0xe20] sm:$0xff]  ;;  %v597_v29 = vld [vmem:[#allocation2 + $0xe48] sm:$0xff] }
 0x144   :  { %2793 = vmatpush1.bf16.msra.mxu1 %v2792_v38  ;;  %2603 = vmatprep.subr.bf16.mxu0 %v2602_v39  ;;  %v552_v38 = vld [vmem:[#allocation2 + $0xce0] sm:$0xff]  ;;  %v2878_v39 = vpack.c.bf16 %v239_v31, %v234_v30  ;;  %v289_v31 = vld [vmem:[#allocation2 + $0x4a8] sm:$0xff] }
 0x145   :  { %2795 = vmatprep.subr.bf16.mxu1 %v2794_v43  ;;  %v557_v43 = vld [vmem:[#allocation2 + $0xd08] sm:$0xff]  ;;  %v284_v30 = vld [vmem:[#allocation2 + $0x480] sm:$0xff] }
 0x147   :  { %2605 = vmatpush1.bf16.msra.mxu0 %v2604_v49  ;;  %v3289_v49 = vld [vmem:[%s3763_s0 + $0x8] sm:$0xff] }
 0x148   :  { %2797 = vmatpush1.bf16.msra.mxu1 %v2796_v50  ;;  %2607 = vmatprep.subr.bf16.mxu0 %v2606_v51  ;;  %v2816_v50 = vpack.c.bf16 %v557_v43, %v552_v38  ;;  %v562_v51 = vld [vmem:[#allocation2 + $0xd30] sm:$0xff]  ;;  %v607_v43 = vld [vmem:[#allocation2 + $0xe98] sm:$0xff] }
 0x149   :  { %2799 = vmatprep.subr.bf16.mxu1 %v2798_v55  ;;  %v2818_v55 = vpack.c.bf16 %v568_v47, %v563_v46  ;;  %v602_v38 = vld [vmem:[#allocation2 + $0xe70] sm:$0xff]  ;;  %v613_v46 = vld [vmem:[#allocation2 + $0xec8] sm:$0xff] }
 0x14a   :  { %v618_v47 = vld [vmem:[#allocation2 + $0xef0] sm:$0xff] }
 0x14b   :  { %2609 = vmatpush1.bf16.msra.mxu0 %v2608_v61  ;;  %v2884_v61 = vpack.c.bf16 %v169_v54, %v164_v53  ;;  %v219_v53 = vld [vmem:[#allocation2 + $0x278] sm:$0xff]  ;;  %v2838_v54 = vpack.c.bf16 %v618_v47, %v613_v46  ;;  %v668_v47 = vld [vmem:[#allocation2 + $0x1080] sm:$0xff] }
 0x14c   :  { %2801 = vmatpush1.bf16.msra.mxu1 %v2800_v62  ;;  %2611 = vmatprep.subr.bf16.mxu0 %v2610_v63  ;;  %v2820_v62 = vpack.c.bf16 %v567_v56, %v562_v51  ;;  %v572_v63 = vld [vmem:[#allocation2 + $0xd80] sm:$0xff]  ;;  %v2902_v51 = vpack.c.bf16 %v299_v45, %v294_v44  ;;  %v589_v45 = vld [vmem:[#allocation2 + $0xe08] sm:$0xff]  ;;  %v663_v46 = vld [vmem:[#allocation2 + $0x1058] sm:$0xff] }
 0x14d   :  { %2803 = vmatprep.subr.bf16.mxu1 %v2802_v4  ;;  %v2822_v4 = vpack.c.bf16 %v578_v60, %v573_v59  ;;  %v544_v56 = vld [vmem:[#allocation2 + $0xca0] sm:$0xff] }
 0x14e   :  { %v628_v59 = vld [vmem:[#allocation2 + $0xf40] sm:$0xff] }
 0x14f   :  { %2613 = vmatpush1.bf16.msra.mxu0 %v2612_v10  ;;  %v2888_v10 = vpack.c.bf16 %v179_v3, %v174_v2  ;;  %v2842_v2 = vpack.c.bf16 %v628_v59, %v623_v58  ;;  %v622_v3 = vld [vmem:[#allocation2 + $0xf10] sm:$0xff]  ;;  %v584_v44 = vld [vmem:[#allocation2 + $0xde0] sm:$0xff] }
 0x150   :  { %2805 = vmatpush1.bf16.msra.mxu1 %v2804_v11  ;;  %2615 = vmatprep.subr.bf16.mxu0 %v2614_v12  ;;  %v2824_v11 = vpack.c.bf16 %v577_v5, %v572_v63  ;;  %v582_v12 = vld [vmem:[#allocation2 + $0xdd0] sm:$0xff]  ;;  %v464_v63 = vld [vmem:[#allocation2 + $0xa20] sm:$0xff]  ;;  %v633_v5 = vld [vmem:[#allocation2 + $0xf68] sm:$0xff] }
 0x151   :  { %2807 = vmatprep.subr.bf16.mxu1 %v2806_v16  ;;  %v2826_v16 = vpack.c.bf16 %v588_v9, %v583_v8  ;;  %v559_v8 = vld [vmem:[#allocation2 + $0xd18] sm:$0xff]  ;;  %v678_v58 = vld [vmem:[#allocation2 + $0x10d0] sm:$0xff] }
 0x153   :  { %2617 = vmatpush1.bf16.msra.mxu0 %v2616_v22  ;;  %v2892_v22 = vpack.c.bf16 %v189_v15, %v184_v14  ;;  %v2846_v14 = vpack.c.bf16 %v638_v6, %v633_v5  ;;  %v637_v15 = vld [vmem:[#allocation2 + $0xf88] sm:$0xff]  ;;  %v683_v6 = vld [vmem:[#allocation2 + $0x10f8] sm:$0xff] }
 0x154   :  { %2809 = vmatpush1.bf16.msra.mxu1 %v2808_v23  ;;  %2875 = vmatprep.subr.bf16.mxu0 %v2874_v26  ;;  %v2828_v23 = vpack.c.bf16 %v587_v17, %v582_v12  ;;  %v2894_v26 = vpack.c.bf16 %v279_v18, %v274_v20  ;;  %v474_v12 = vld [vmem:[#allocation2 + $0xa70] sm:$0xff]  ;;  %v564_v17 = vld [vmem:[#allocation2 + $0xd40] sm:$0xff]  ;;  %v569_v20 = vld [vmem:[#allocation2 + $0xd68] sm:$0xff] }
 0x155   :  { %2811 = vmatprep.subr.bf16.mxu1 %v2810_v28  ;;  %v2830_v28 = vpack.c.bf16 %v598_v21, %v593_v19  ;;  %v643_v18 = vld [vmem:[#allocation2 + $0xfb8] sm:$0xff]  ;;  %v648_v19 = vld [vmem:[#allocation2 + $0xfe0] sm:$0xff]  ;;  %v609_v5 = vld [vmem:[#allocation2 + $0xea8] sm:$0xff] }
 0x156   :  { %934 = vmatmul.mubr.f32.vlgmr.msra.gmra.mrb[0].mxu0 %v3688_v35  ;;  %v3290_v21 = vld [vmem:[%s3763_s0] sm:$0xff] }
 0x157   :  { %2877 = vmatpush3.bf16.msra.mxu0 %v2876_v36  ;;  %1359 = vmatprep.mubr.f32.mxu0 %v3289_v49  ;;  %v2896_v36 = vpack.c.bf16 %v199_v27, %v194_v25  ;;  %v2836_v49 = vpack.c.bf16 %v607_v43, %v602_v38  ;;  %v484_v25 = vld [vmem:[#allocation2 + $0xac0] sm:$0xff]  ;;  %v489_v27 = vld [vmem:[#allocation2 + $0xae8] sm:$0xff] }
 0x158   :  { %2813 = vmatpush1.bf16.msra.mxu1 %v2812_v37  ;;  %2879 = vmatprep.subr.bf16.mxu0 %v2878_v39  ;;  %v2832_v37 = vpack.c.bf16 %v597_v29, %v592_v24  ;;  %v2898_v39 = vpack.c.bf16 %v289_v31, %v284_v30  ;;  %v642_v24 = vld [vmem:[#allocation2 + $0xfb0] sm:$0xff]  ;;  %v647_v29 = vld [vmem:[#allocation2 + $0xfd8] sm:$0xff]  ;;  %v652_v38 = vld [vmem:[#allocation2 + $0x1000] sm:$0xff] }
 0x159   :  { %2815 = vmatprep.subr.bf16.mxu1 %v2814_v42  ;;  %v2834_v42 = vpack.c.bf16 %v608_v34, %v603_v32  ;;  %v574_v30 = vld [vmem:[#allocation2 + $0xd90] sm:$0xff]  ;;  %v579_v31 = vld [vmem:[#allocation2 + $0xdb8] sm:$0xff]  ;;  %v653_v32 = vld [vmem:[#allocation2 + $0x1008] sm:$0xff] }
 0x15a   :  { %v658_v34 = vld [vmem:[#allocation2 + $0x1030] sm:$0xff]  ;;  %v657_v43 = vld [vmem:[#allocation2 + $0x1028] sm:$0xff] }
 0x15b   :  { %2881 = vmatpush3.bf16.msra.mxu0 %v2880_v48  ;;  %v2900_v48 = vpack.c.bf16 %v209_v41, %v204_v40  ;;  %v494_v40 = vld [vmem:[#allocation2 + $0xb10] sm:$0xff]  ;;  %v499_v41 = vld [vmem:[#allocation2 + $0xb38] sm:$0xff] }
 0x15c   :  { %2817 = vmatpush1.bf16.msra.mxu1 %v2816_v50  ;;  %2883 = vmatprep.subr.bf16.mxu0 %v2882_v52  ;;  %v612_v50 = vld [vmem:[#allocation2 + $0xec0] sm:$0xff]  ;;  %v214_v52 = vld [vmem:[#allocation2 + $0x250] sm:$0xff] }
 0x15d   :  { %2819 = vmatprep.subr.bf16.mxu1 %v2818_v55  ;;  %v617_v55 = vld [vmem:[#allocation2 + $0xee8] sm:$0xff]  ;;  %v2904_v60 = vpack.c.bf16 %v219_v53, %v214_v52  ;;  %v2858_v53 = vpack.c.bf16 %v668_v47, %v663_v46  ;;  %v1587_v47 = vld [vmem:[#allocation6 + $0x38] sm:$0xff] }
 0x15e   :  { %v509_v52 = vld [vmem:[#allocation2 + $0xb88] sm:$0xff] }
 0x15f   :  { %2885 = vmatpush3.bf16.msra.mxu0 %v2884_v61  ;;  %v2840_v61 = vpack.c.bf16 %v617_v55, %v612_v50  ;;  %v2954_v50 = vpack.c.bf16 %v589_v45, %v584_v44  ;;  %v594_v55 = vld [vmem:[#allocation2 + $0xe30] sm:$0xff]  ;;  %v399_v45 = vld [vmem:[#allocation2 + $0x818] sm:$0xff] }
 0x160   :  { %2821 = vmatpush1.bf16.msra.mxu1 %v2820_v62  ;;  %2887 = vmatprep.subr.bf16.mxu0 %v2886_v1  ;;  %v2938_v62 = vpack.c.bf16 %v549_v57, %v544_v56  ;;  %v469_v1 = vld [vmem:[#allocation2 + $0xa48] sm:$0xff]  ;;  %v599_v56 = vld [vmem:[#allocation2 + $0xe58] sm:$0xff]  ;;  %v394_v44 = vld [vmem:[#allocation2 + $0x7f0] sm:$0xff] }
 0x161   :  { %2823 = vmatprep.subr.bf16.mxu1 %v2822_v4  ;;  %v627_v4 = vld [vmem:[#allocation2 + $0xf38] sm:$0xff]  ;;  %v2940_v9 = vpack.c.bf16 %v469_v1, %v464_v63  ;;  %v673_v57 = vld [vmem:[#allocation2 + $0x10a8] sm:$0xff]  ;;  %v514_v63 = vld [vmem:[#allocation2 + $0xbb0] sm:$0xff] }
 0x162   :  { %v519_v1 = vld [vmem:[#allocation2 + $0xbd8] sm:$0xff]  ;;  %v1585_v46 = vld [vmem:[#allocation6 + $0x28] sm:$0xff] }
 0x163   :  { %2889 = vmatpush3.bf16.msra.mxu0 %v2888_v10  ;;  %v2844_v10 = vpack.c.bf16 %v627_v4, %v622_v3  ;;  %v677_v3 = vld [vmem:[#allocation2 + $0x10c8] sm:$0xff]  ;;  %v604_v4 = vld [vmem:[#allocation2 + $0xe80] sm:$0xff] }
 0x164   :  { %2825 = vmatpush1.bf16.msra.mxu1 %v2824_v11  ;;  %2891 = vmatprep.subr.bf16.mxu0 %v2890_v13  ;;  %v632_v11 = vld [vmem:[#allocation2 + $0xf60] sm:$0xff]  ;;  %v479_v13 = vld [vmem:[#allocation2 + $0xa98] sm:$0xff] }
 0x165   :  { %2827 = vmatprep.subr.bf16.mxu1 %v2826_v16  ;;  %v2942_v16 = vpack.c.bf16 %v559_v8, %v554_v7  ;;  %v688_v7 = vld [vmem:[#allocation2 + $0x1120] sm:$0xff]  ;;  %v2960_v8 = vpack.c.bf16 %v519_v1, %v514_v63  ;;  %v3292_v63 = vld [vmem:[%s3763_s0 + $0x18] sm:$0xff] }
 0x167   :  { %2893 = vmatpush3.bf16.msra.mxu0 %v2892_v22  ;;  %v2944_v22 = vpack.c.bf16 %v479_v13, %v474_v12  ;;  %v524_v12 = vld [vmem:[#allocation2 + $0xc00] sm:$0xff]  ;;  %v529_v13 = vld [vmem:[#allocation2 + $0xc28] sm:$0xff] }
 0x168   :  { %2829 = vmatpush1.bf16.msra.mxu1 %v2828_v23  ;;  %2895 = vmatprep.subr.bf16.mxu0 %v2894_v26  ;;  %v2848_v23 = vpack.c.bf16 %v637_v15, %v632_v11  ;;  %v2946_v26 = vpack.c.bf16 %v569_v20, %v564_v17  ;;  %v2962_v11 = vpack.c.bf16 %v609_v5, %v604_v4  ;;  %v687_v15 = vld [vmem:[#allocation2 + $0x1118] sm:$0xff]  ;;  %v329_v4 = vld [vmem:[#allocation2 + $0x5e8] sm:$0xff] }
 0x169   :  { %2831 = vmatprep.subr.bf16.mxu1 %v2830_v28  ;;  %v2850_v28 = vpack.c.bf16 %v648_v19, %v643_v18  ;;  %v619_v17 = vld [vmem:[#allocation2 + $0xef8] sm:$0xff]  ;;  %v693_v18 = vld [vmem:[#allocation2 + $0x1148] sm:$0xff]  ;;  %v698_v19 = vld [vmem:[#allocation2 + $0x1170] sm:$0xff] }
 0x16a   :  { %v1593_v5 = vld [vmem:[#allocation6 + $0x68] sm:$0xff] }
 0x16b   :  { %2897 = vmatpush3.bf16.msra.mxu0 %v2896_v36  ;;  %v2948_v36 = vpack.c.bf16 %v489_v27, %v484_v25  ;;  %v534_v25 = vld [vmem:[#allocation2 + $0xc50] sm:$0xff]  ;;  %v539_v27 = vld [vmem:[#allocation2 + $0xc78] sm:$0xff] }
 0x16c   :  { %2833 = vmatpush1.bf16.msra.mxu1 %v2832_v37  ;;  %2899 = vmatprep.subr.bf16.mxu0 %v2898_v39  ;;  %v2852_v37 = vpack.c.bf16 %v647_v29, %v642_v24  ;;  %v2950_v39 = vpack.c.bf16 %v579_v31, %v574_v30  ;;  %v692_v24 = vld [vmem:[#allocation2 + $0x1140] sm:$0xff]  ;;  %v697_v29 = vld [vmem:[#allocation2 + $0x1168] sm:$0xff] }
 0x16d   :  { %2835 = vmatprep.subr.bf16.mxu1 %v2834_v42  ;;  %v2854_v42 = vpack.c.bf16 %v658_v34, %v653_v32  ;;  %v1581_v30 = vld [vmem:[#allocation6 + $0x8] sm:$0xff]  ;;  %v1583_v31 = vld [vmem:[#allocation6 + $0x18] sm:$0xff] }
 0x16e   :  { %v384_v32 = vld [vmem:[#allocation2 + $0x7a0] sm:$0xff]  ;;  %v389_v34 = vld [vmem:[#allocation2 + $0x7c8] sm:$0xff] }
 0x16f   :  { %2901 = vmatpush3.bf16.msra.mxu0 %v2900_v48  ;;  %v2952_v48 = vpack.c.bf16 %v499_v41, %v494_v40  ;;  %v1582_v40 = vld [vmem:[#allocation6 + $0x10] sm:$0xff]  ;;  %v2906_v41 = vpack.c.bf16 %v389_v34, %v384_v32  ;;  %v1603_v32 = vld [vmem:[#allocation6 + $0xb8] sm:$0xff] }
 0x170   :  { %2837 = vmatpush1.bf16.msra.mxu1 %v2836_v49  ;;  %2903 = vmatprep.subr.bf16.mxu0 %v2902_v51  ;;  %v662_v49 = vld [vmem:[#allocation2 + $0x1050] sm:$0xff]  ;;  %v504_v51 = vld [vmem:[#allocation2 + $0xb60] sm:$0xff] }
 0x171   :  { %2839 = vmatprep.subr.bf16.mxu1 %v2838_v54  ;;  %v667_v54 = vld [vmem:[#allocation2 + $0x1078] sm:$0xff]  ;;  %v2956_v59 = vpack.c.bf16 %v509_v52, %v504_v51  ;;  %v2910_v52 = vpack.c.bf16 %v399_v45, %v394_v44  ;;  %v434_v34 = vld [vmem:[#allocation2 + $0x930] sm:$0xff] }
 0x172   :  { %v1586_v51 = vld [vmem:[#allocation6 + $0x30] sm:$0xff]  ;;  %v1605_v45 = vld [vmem:[#allocation6 + $0xc8] sm:$0xff] }
 0x173   :  { %2905 = vmatpush3.bf16.msra.mxu0 %v2904_v60  ;;  %v2860_v60 = vpack.c.bf16 %v667_v54, %v662_v49  ;;  %v314_v49 = vld [vmem:[#allocation2 + $0x570] sm:$0xff]  ;;  %v2998_v54 = vpack.c.bf16 %v1587_v47, %v1585_v46  ;;  %v359_v44 = vld [vmem:[#allocation2 + $0x6d8] sm:$0xff]  ;;  %v444_v47 = vld [vmem:[#allocation2 + $0x980] sm:$0xff] }
 0x174   :  { %2841 = vmatpush1.bf16.msra.mxu1 %v2840_v61  ;;  %2939 = vmatprep.subr.bf16.mxu0 %v2938_v62  ;;  %v672_v61 = vld [vmem:[#allocation2 + $0x10a0] sm:$0xff]  ;;  %v2958_v62 = vpack.c.bf16 %v599_v56, %v594_v55  ;;  %v1589_v55 = vld [vmem:[#allocation6 + $0x48] sm:$0xff] }
 0x175   :  { %2843 = vmatprep.subr.bf16.mxu1 %v2842_v2  ;;  %v2862_v2 = vpack.c.bf16 %v678_v58, %v673_v57  ;;  %v1591_v56 = vld [vmem:[#allocation6 + $0x58] sm:$0xff]  ;;  %v409_v58 = vld [vmem:[#allocation2 + $0x868] sm:$0xff] }
 0x176   :  { %1360 = vmatmul.mubr.f32.vlgmr.msra.gmra.mrb[2].mxu0 %v3290_v21  ;;  %v404_v57 = vld [vmem:[#allocation2 + $0x840] sm:$0xff]  ;;  %v3002_v1 = vpack.c.bf16 %v1591_v56, %v1589_v55  ;;  %v369_v55 = vld [vmem:[#allocation2 + $0x728] sm:$0xff] }
 0x177   :  { %1218 = vmatmul.mubr.f32.vlgmr.msra.gmra.mrb[2].mxu1 %v3688_v35  ;;  %2941 = vmatpush3.bf16.msra.mxu0 %v2940_v9  ;;  %v2864_v9 = vpack.c.bf16 %v677_v3, %v672_v61  ;;  %v2914_v3 = vpack.c.bf16 %v409_v58, %v404_v57  ;;  %v1607_v46 = vld [vmem:[#allocation6 + $0xd8] sm:$0xff]  ;;  %v1609_v56 = vld [vmem:[#allocation6 + $0xe8] sm:$0xff] }
 0x178   :  { %2845 = vmatpush1.bf16.msra.mxu1 %v2844_v10  ;;  %1288 = vmatprep.mubr.f32.mxu1 %v3494_v0  ;;  %v682_v10 = vld [vmem:[#allocation2 + $0x10f0] sm:$0xff]  ;;  %v1611_v57 = vld [vmem:[#allocation6 + $0xf8] sm:$0xff] }
 0x179   :  { %2847 = vmatprep.subr.bf16.mxu1 %v2846_v14  ;;  %2943 = vmatprep.subr.bf16.mxu0 %v2942_v16  ;;  %v2866_v14 = vpack.c.bf16 %v688_v7, %v683_v6  ;;  %v614_v16 = vld [vmem:[#allocation2 + $0xed0] sm:$0xff]  ;;  %v1595_v6 = vld [vmem:[#allocation6 + $0x78] sm:$0xff] }
 0x17a   :  { %1499 = vmatprep.mubr.f32.mxu0 %v3679_v33  ;;  %v2856_v33 = vpack.c.bf16 %v657_v43, %v652_v38  ;;  %v2994_v38 = vpack.c.bf16 %v1583_v31, %v1581_v30  ;;  %v309_v43 = vld [vmem:[#allocation2 + $0x548] sm:$0xff]  ;;  %v414_v7 = vld [vmem:[#allocation2 + $0x890] sm:$0xff] }
 0x17b   :  { %2945 = vmatpush3.bf16.msra.mxu0 %v2944_v22  ;;  %v2964_v22 = vpack.c.bf16 %v529_v13, %v524_v12  ;;  %v3006_v12 = vpack.c.bf16 %v1595_v6, %v1593_v5  ;;  %v1592_v13 = vld [vmem:[#allocation6 + $0x60] sm:$0xff]  ;;  %v1601_v31 = vld [vmem:[#allocation6 + $0xa8] sm:$0xff]  ;;  %v1615_v6 = vld [vmem:[#allocation6 + $0x118] sm:$0xff] }
 0x17c   :  { %2849 = vmatpush1.bf16.msra.mxu1 %v2848_v23  ;;  %2947 = vmatprep.subr.bf16.mxu0 %v2946_v26  ;;  %v2868_v23 = vpack.c.bf16 %v687_v15, %v682_v10  ;;  %v2966_v26 = vpack.c.bf16 %v619_v17, %v614_v16  ;;  %v339_v16 = vld [vmem:[#allocation2 + $0x638] sm:$0xff]  ;;  %v1597_v17 = vld [vmem:[#allocation6 + $0x88] sm:$0xff] }
 0x17d   :  { %2851 = vmatprep.subr.bf16.mxu1 %v2850_v28  ;;  %v2870_v28 = vpack.c.bf16 %v698_v19, %v693_v18  ;;  %v1599_v18 = vld [vmem:[#allocation6 + $0x98] sm:$0xff]  ;;  %v349_v30 = vld [vmem:[#allocation2 + $0x688] sm:$0xff]  ;;  %v454_v58 = vld [vmem:[#allocation2 + $0x9d0] sm:$0xff] }
 0x17e   :  { %v424_v19 = vld [vmem:[#allocation2 + $0x8e0] sm:$0xff]  ;;  %v1613_v5 = vld [vmem:[#allocation6 + $0x108] sm:$0xff] }
 0x17f   :  { %2949 = vmatpush3.bf16.msra.mxu0 %v2948_v36  ;;  %v2968_v36 = vpack.c.bf16 %v539_v27, %v534_v25  ;;  %v3010_v25 = vpack.c.bf16 %v1599_v18, %v1597_v17  ;;  %v1596_v27 = vld [vmem:[#allocation6 + $0x80] sm:$0xff]  ;;  %v634_v18 = vld [vmem:[#allocation2 + $0xf70] sm:$0xff] }
 0x180   :  { %2853 = vmatpush1.bf16.msra.mxu1 %v2852_v37  ;;  %2951 = vmatprep.subr.bf16.mxu0 %v2950_v39  ;;  %v2872_v37 = vpack.c.bf16 %v697_v29, %v692_v24  ;;  %v1580_v39 = vld [vmem:[#allocation6] sm:$0xff] }
 0x181   :  { %2855 = vmatprep.subr.bf16.mxu1 %v2854_v42  ;;  %v304_v42 = vld [vmem:[#allocation2 + $0x520] sm:$0xff] }
 0x183   :  { %2953 = vmatpush3.bf16.msra.mxu0 %v2952_v48  ;;  %v2996_v48 = vpack.c.bf16 %v1582_v40, %v1580_v39  ;;  %v354_v39 = vld [vmem:[#allocation2 + $0x6b0] sm:$0xff]  ;;  %v3014_v40 = vpack.c.bf16 %v1603_v32, %v1601_v31  ;;  %v644_v31 = vld [vmem:[#allocation2 + $0xfc0] sm:$0xff] }
 0x184   :  { %2857 = vmatpush1.bf16.msra.mxu1 %v2856_v33  ;;  %2955 = vmatprep.subr.bf16.mxu0 %v2954_v50  ;;  %v2908_v33 = vpack.c.bf16 %v309_v43, %v304_v42  ;;  %v1584_v50 = vld [vmem:[#allocation6 + $0x20] sm:$0xff]  ;;  %v1602_v42 = vld [vmem:[#allocation6 + $0xb0] sm:$0xff] }
 0x185   :  { %2859 = vmatprep.subr.bf16.mxu1 %v2858_v53  ;;  %v319_v53 = vld [vmem:[#allocation2 + $0x598] sm:$0xff] }
 0x186   :  { %v2912_v61 = vpack.c.bf16 %v319_v53, %v314_v49  ;;  %v2928_v49 = vpack.c.bf16 %v359_v44, %v354_v39  ;;  %v1606_v53 = vld [vmem:[#allocation6 + $0xd0] sm:$0xff]  ;;  %v1627_v39 = vld [vmem:[#allocation6 + $0x178] sm:$0xff]  ;;  %v1624_v44 = vld [vmem:[#allocation6 + $0x160] sm:$0xff] }
 0x187   :  { %2957 = vmatpush3.bf16.msra.mxu0 %v2956_v59  ;;  %v3708_v59 = vld [vmem:[%s3763_s0 + $0x30] sm:$0xff] }
 0x188   :  { %2861 = vmatpush1.bf16.msra.mxu1 %v2860_v60  ;;  %2959 = vmatprep.subr.bf16.mxu0 %v2958_v62  ;;  %v3000_v60 = vpack.c.bf16 %v1586_v51, %v1584_v50  ;;  %v324_v62 = vld [vmem:[#allocation2 + $0x5c0] sm:$0xff]  ;;  %v3018_v51 = vpack.c.bf16 %v1607_v46, %v1605_v45  ;;  %v1626_v45 = vld [vmem:[#allocation6 + $0x170] sm:$0xff] }
 0x189   :  { %2863 = vmatprep.subr.bf16.mxu1 %v2862_v2  ;;  %v1588_v2 = vld [vmem:[#allocation6 + $0x40] sm:$0xff]  ;;  %v2916_v10 = vpack.c.bf16 %v329_v4, %v324_v62  ;;  %v379_v4 = vld [vmem:[#allocation2 + $0x778] sm:$0xff] }
 0x18a   :  { %v3700_v20 = vpop.f32.mrb[0].mxu1  ;;  %v364_v50 = vld [vmem:[#allocation2 + $0x700] sm:$0xff]  ;;  %v659_v46 = vld [vmem:[#allocation2 + $0x1038] sm:$0xff] }
 0x18b   :  { %v3702_v21 = vpop.f32.mrb[1].mxu1  ;;  %2961 = vmatpush3.bf16.msra.mxu0 %v2960_v8  ;;  %v419_v8 = vld [vmem:[#allocation2 + $0x8b8] sm:$0xff]  ;;  %v2932_v62 = vpack.c.bf16 %v369_v55, %v364_v50  ;;  %v664_v50 = vld [vmem:[#allocation2 + $0x1060] sm:$0xff]  ;;  %v1633_v55 = vld [vmem:[#allocation6 + $0x1a8] sm:$0xff] }
 0x18c   :  { %2865 = vmatpush1.bf16.msra.mxu1 %v2864_v9  ;;  %2963 = vmatprep.subr.bf16.mxu0 %v2962_v11  ;;  %v334_v11 = vld [vmem:[#allocation2 + $0x610] sm:$0xff]  ;;  %v2918_v15 = vpack.c.bf16 %v419_v8, %v414_v7 }
 0x18d   :  { %2867 = vmatprep.subr.bf16.mxu1 %v2866_v14  ;;  %v1594_v14 = vld [vmem:[#allocation6 + $0x70] sm:$0xff]  ;;  %v2920_v24 = vpack.c.bf16 %v339_v16, %v334_v11 }
 0x18e   :  { %v1614_v11 = vld [vmem:[#allocation6 + $0x110] sm:$0xff] }
 0x18f   :  { %2965 = vmatpush3.bf16.msra.mxu0 %v2964_v22  ;;  %v429_v22 = vld [vmem:[#allocation2 + $0x908] sm:$0xff] }
 0x190   :  { %2869 = vmatpush1.bf16.msra.mxu1 %v2868_v23  ;;  %2967 = vmatprep.subr.bf16.mxu0 %v2966_v26  ;;  %v3008_v23 = vpack.c.bf16 %v1594_v14, %v1592_v13  ;;  %v344_v26 = vld [vmem:[#allocation2 + $0x660] sm:$0xff]  ;;  %v2922_v29 = vpack.c.bf16 %v429_v22, %v424_v19  ;;  %v629_v13 = vld [vmem:[#allocation2 + $0xf48] sm:$0xff]  ;;  %v1618_v22 = vld [vmem:[#allocation6 + $0x130] sm:$0xff] }
 0x191   :  { %2871 = vmatprep.subr.bf16.mxu1 %v2870_v28  ;;  %v1598_v28 = vld [vmem:[#allocation6 + $0x90] sm:$0xff]  ;;  %v1617_v14 = vld [vmem:[#allocation6 + $0x128] sm:$0xff]  ;;  %v1616_v19 = vld [vmem:[#allocation6 + $0x120] sm:$0xff] }
 0x193   :  { %2969 = vmatpush3.bf16.msra.mxu0 %v2968_v36  ;;  %v439_v36 = vld [vmem:[#allocation2 + $0x958] sm:$0xff] }
 0x194   :  { %2873 = vmatpush1.bf16.msra.mxu1 %v2872_v37  ;;  %2995 = vmatprep.subr.bf16.mxu0 %v2994_v38  ;;  %v3012_v37 = vpack.c.bf16 %v1598_v28, %v1596_v27  ;;  %v2924_v38 = vpack.c.bf16 %v349_v30, %v344_v26  ;;  %v2926_v43 = vpack.c.bf16 %v439_v36, %v434_v34  ;;  %v1623_v27 = vld [vmem:[#allocation6 + $0x158] sm:$0xff]  ;;  %v3293_v28 = vld [vmem:[%s3763_s0 + $0x10] sm:$0xff]  ;;  %v1620_v34 = vld [vmem:[#allocation6 + $0x140] sm:$0xff] }
 0x195   :  { %2907 = vmatprep.subr.bf16.mxu1 %v2906_v41  ;;  %v1600_v41 = vld [vmem:[#allocation6 + $0xa0] sm:$0xff]  ;;  %v1622_v36 = vld [vmem:[#allocation6 + $0x150] sm:$0xff] }
 0x196   :  { %1500 = vmatmul.mubr.f32.vlgmr.msra.gmra.mrb[4].mxu0 %v3688_v35  ;;  %v1590_v35 = vld [vmem:[#allocation6 + $0x50] sm:$0xff] }
 0x197   :  { %1289 = vmatmul.mubr.f32.vlgmr.msra.gmra.mrb[2].mxu1 %v3708_v59  ;;  %2997 = vmatpush1.bf16.msra.mxu0 %v2996_v48  ;;  %v3004_v9 = vpack.c.bf16 %v1590_v35, %v1588_v2  ;;  %v449_v48 = vld [vmem:[#allocation2 + $0x9a8] sm:$0xff]  ;;  %v1610_v35 = vld [vmem:[#allocation6 + $0xf0] sm:$0xff] }
 0x198   :  { %2909 = vmatpush3.bf16.msra.mxu1 %v2908_v33  ;;  %1429 = vmatprep.mubr.f32.mxu1 %v3292_v63  ;;  %v3016_v33 = vpack.c.bf16 %v1602_v42, %v1600_v41  ;;  %v374_v63 = vld [vmem:[#allocation2 + $0x750] sm:$0xff]  ;;  %v1608_v2 = vld [vmem:[#allocation6 + $0xe0] sm:$0xff] }
 0x199   :  { %2911 = vmatprep.subr.bf16.mxu1 %v2910_v52  ;;  %2999 = vmatprep.subr.bf16.mxu0 %v2998_v54  ;;  %v1604_v52 = vld [vmem:[#allocation6 + $0xc0] sm:$0xff]  ;;  %v2930_v54 = vpack.c.bf16 %v449_v48, %v444_v47  ;;  %v3024_v7 = vpack.c.bf16 %v1610_v35, %v1608_v2  ;;  %v2936_v8 = vpack.c.bf16 %v379_v4, %v374_v63  ;;  %v654_v42 = vld [vmem:[#allocation2 + $0x1010] sm:$0xff]  ;;  %v1631_v48 = vld [vmem:[#allocation6 + $0x198] sm:$0xff] }
 0x19a   :  { %v1629_v47 = vld [vmem:[#allocation6 + $0x188] sm:$0xff]  ;;  %v1634_v63 = vld [vmem:[#allocation6 + $0x1b0] sm:$0xff]  ;;  %v1639_v35 = vld [vmem:[#allocation6 + $0x1d8] sm:$0xff] }
 0x19b   :  { %3001 = vmatpush1.bf16.msra.mxu0 %v3000_v60  ;;  %v459_v60 = vld [vmem:[#allocation2 + $0x9f8] sm:$0xff]  ;;  %v1637_v2 = vld [vmem:[#allocation6 + $0x1c8] sm:$0xff] }
 0x19c   :  { %2913 = vmatpush3.bf16.msra.mxu1 %v2912_v61  ;;  %3003 = vmatprep.subr.bf16.mxu0 %v3002_v1  ;;  %v3020_v61 = vpack.c.bf16 %v1606_v53, %v1604_v52  ;;  %v3022_v1 = vpack.c.bf16 %v1611_v57, %v1609_v56  ;;  %v1628_v52 = vld [vmem:[#allocation6 + $0x180] sm:$0xff]  ;;  %v1630_v53 = vld [vmem:[#allocation6 + $0x190] sm:$0xff]  ;;  %v1635_v56 = vld [vmem:[#allocation6 + $0x1b8] sm:$0xff] }
 0x19d   :  { %2915 = vmatprep.subr.bf16.mxu1 %v2914_v3  ;;  %v2934_v3 = vpack.c.bf16 %v459_v60, %v454_v58  ;;  %v3044_v57 = vpack.c.bf16 %v1630_v53, %v1628_v52  ;;  %v674_v60 = vld [vmem:[#allocation2 + $0x10b0] sm:$0xff] }
 0x19f   :  { %3005 = vmatpush1.bf16.msra.mxu0 %v3004_v9  ;;  %v3026_v9 = vpack.c.bf16 %v1615_v6, %v1613_v5  ;;  %v684_v5 = vld [vmem:[#allocation2 + $0x1100] sm:$0xff]  ;;  %v3050_v6 = vpack.c.bf16 %v1639_v35, %v1637_v2  ;;  %v1654_v2 = vld [vmem:[#allocation6 + $0x250] sm:$0xff] }
 0x1a0   :  { %2917 = vmatpush3.bf16.msra.mxu1 %v2916_v10  ;;  %3007 = vmatprep.subr.bf16.mxu0 %v3006_v12  ;;  %v1612_v10 = vld [vmem:[#allocation6 + $0x100] sm:$0xff] }
 0x1a1   :  { %2919 = vmatprep.subr.bf16.mxu1 %v2918_v15  ;;  %v624_v12 = vld [vmem:[#allocation2 + $0xf20] sm:$0xff]  ;;  %v3028_v16 = vpack.c.bf16 %v1614_v11, %v1612_v10  ;;  %v1641_v10 = vld [vmem:[#allocation6 + $0x1e8] sm:$0xff] }
 0x1a2   :  { %v1619_v15 = vld [vmem:[#allocation6 + $0x138] sm:$0xff]  ;;  %v2971_v17 = vpack.c.bf16 %v629_v13, %v624_v12 }
 0x1a3   :  { %3009 = vmatpush1.bf16.msra.mxu0 %v3008_v23  ;;  %v3495_v23 = vmov 0.0|0.0   ;;  %v3030_v26 = vpack.c.bf16 %v1619_v15, %v1617_v14  ;;  %v1643_v11 = vld [vmem:[#allocation6 + $0x1f8] sm:$0xff]  ;;  %v694_v14 = vld [vmem:[#allocation2 + $0x1150] sm:$0xff] }
 0x1a4   :  { %2921 = vmatpush3.bf16.msra.mxu1 %v2920_v24  ;;  %3011 = vmatprep.subr.bf16.mxu0 %v3010_v25  ;;  %v639_v24 = vld [vmem:[#allocation2 + $0xf98] sm:$0xff]  ;;  %v1621_v25 = vld [vmem:[#allocation6 + $0x148] sm:$0xff]  ;;  %v3054_v15 = vpack.c.bf16 %v1643_v11, %v1641_v10  ;;  %v1982_v10 = vld [vmem:[#allocation9 + $0x78] sm:$0xff] }
 0x1a5   :  { %2923 = vmatprep.subr.bf16.mxu1 %v2922_v29  ;;  %v3032_v29 = vpack.c.bf16 %v1618_v22, %v1616_v19  ;;  %v2974_v30 = vpack.c.bf16 %v639_v24, %v634_v18  ;;  %v3034_v32 = vpack.c.bf16 %v1623_v27, %v1621_v25  ;;  %v699_v18 = vld [vmem:[#allocation2 + $0x1178] sm:$0xff]  ;;  %v1645_v19 = vld [vmem:[#allocation6 + $0x208] sm:$0xff]  ;;  %v702_v27 = vlaneseq }
 0x1a6   :  { %v1647_v22 = vld [vmem:[#allocation6 + $0x218] sm:$0xff] }
 0x1a7   :  { %3013 = vmatpush1.bf16.msra.mxu0 %v3012_v37  ;;  %v649_v37 = vld [vmem:[#allocation2 + $0xfe8] sm:$0xff]  ;;  %v3058_v25 = vpack.c.bf16 %v1647_v22, %v1645_v19  ;;  %v1981_v19 = vld [vmem:[#allocation9 + $0x70] sm:$0xff] }
 0x1a8   :  { %2925 = vmatpush3.bf16.msra.mxu1 %v2924_v38  ;;  %3015 = vmatprep.subr.bf16.mxu0 %v3014_v40  ;;  %v1625_v38 = vld [vmem:[#allocation6 + $0x168] sm:$0xff]  ;;  %v3036_v40 = vpack.c.bf16 %v1622_v36, %v1620_v34  ;;  %v2977_v41 = vpack.c.bf16 %v649_v37, %v644_v31  ;;  %v1663_v22 = vld [vmem:[#allocation6 + $0x298] sm:$0xff] }
 0x1a9   :  { %2927 = vmatprep.subr.bf16.mxu1 %v2926_v43  ;;  %v3038_v43 = vpack.c.bf16 %v1627_v39, %v1625_v38  ;;  %v1644_v39 = vld [vmem:[#allocation6 + $0x200] sm:$0xff] }
 0x1ab   :  { %3017 = vmatpush1.bf16.msra.mxu0 %v3016_v33  ;;  %v3040_v33 = vpack.c.bf16 %v1626_v45, %v1624_v44  ;;  %v1648_v44 = vld [vmem:[#allocation6 + $0x220] sm:$0xff]  ;;  %v1650_v45 = vld [vmem:[#allocation6 + $0x230] sm:$0xff] }
 0x1ac   :  { %2929 = vmatpush3.bf16.msra.mxu1 %v2928_v49  ;;  %3019 = vmatprep.subr.bf16.mxu0 %v3018_v51  ;;  %v2980_v49 = vpack.c.bf16 %v659_v46, %v654_v42  ;;  %v3042_v51 = vpack.c.bf16 %v1631_v48, %v1629_v47  ;;  %v1649_v42 = vld [vmem:[#allocation6 + $0x228] sm:$0xff] }
 0x1ad   :  { %2931 = vmatprep.subr.bf16.mxu1 %v2930_v54  ;;  %v669_v54 = vld [vmem:[#allocation2 + $0x1088] sm:$0xff] }
 0x1ae   :  { %v2983_v58 = vpack.c.bf16 %v669_v54, %v664_v50  ;;  %v1653_v48 = vld [vmem:[#allocation6 + $0x248] sm:$0xff]  ;;  %v1970_v50 = vld [vmem:[#allocation9 + $0x18] sm:$0xff] }
 0x1af   :  { %3021 = vmatpush1.bf16.msra.mxu0 %v3020_v61  ;;  %v3046_v61 = vpack.c.bf16 %v1635_v56, %v1633_v55  ;;  %v1969_v55 = vld [vmem:[#allocation9 + $0x10] sm:$0xff]  ;;  %v1974_v56 = vld [vmem:[#allocation9 + $0x38] sm:$0xff] }
 0x1b0   :  { %2933 = vmatpush3.bf16.msra.mxu1 %v2932_v62  ;;  %3023 = vmatprep.subr.bf16.mxu0 %v3022_v1  ;;  %v1632_v62 = vld [vmem:[#allocation6 + $0x1a0] sm:$0xff]  ;;  %v679_v1 = vld [vmem:[#allocation2 + $0x10d8] sm:$0xff] }
 0x1b1   :  { %2935 = vmatprep.subr.bf16.mxu1 %v2934_v3  ;;  %v3048_v3 = vpack.c.bf16 %v1634_v63, %v1632_v62  ;;  %v2986_v4 = vpack.c.bf16 %v679_v1, %v674_v60  ;;  %v1973_v60 = vld [vmem:[#allocation9 + $0x30] sm:$0xff]  ;;  %v1978_v62 = vld [vmem:[#allocation9 + $0x58] sm:$0xff]  ;;  %v3064_v63 = vpack.c.bf16 %v1650_v45, %v1648_v44 }
 0x1b2   :  { %v1652_v1 = vld [vmem:[#allocation6 + $0x240] sm:$0xff]  ;;  %v1666_v44 = vld [vmem:[#allocation6 + $0x2b0] sm:$0xff] }
 0x1b3   :  { %3025 = vmatpush1.bf16.msra.mxu0 %v3024_v7  ;;  %v1636_v7 = vld [vmem:[#allocation6 + $0x1c0] sm:$0xff]  ;;  %v3068_v11 = vpack.c.bf16 %v1654_v2, %v1652_v1 }
 0x1b4   :  { %2937 = vmatpush3.bf16.msra.mxu1 %v2936_v8  ;;  %3027 = vmatprep.subr.bf16.mxu0 %v3026_v9  ;;  %v1638_v8 = vld [vmem:[#allocation6 + $0x1d0] sm:$0xff]  ;;  %v689_v9 = vld [vmem:[#allocation2 + $0x1128] sm:$0xff] }
 0x1b5   :  { %2970 = vmatprep.subr.bf16.mxu1 %v3495_v23  ;;  %v3052_v12 = vpack.c.bf16 %v1638_v8, %v1636_v7  ;;  %v2989_v13 = vpack.c.bf16 %v689_v9, %v684_v5  ;;  %v1977_v7 = vld [vmem:[#allocation9 + $0x50] sm:$0xff]  ;;  %v1980_v9 = vld [vmem:[#allocation9 + $0x68] sm:$0xff]  ;;  %v1672_v2 = vld [vmem:[#allocation6 + $0x2e0] sm:$0xff] }
 0x1b6   :  { %v1659_v8 = vld [vmem:[#allocation6 + $0x278] sm:$0xff] }
 0x1b7   :  { %1430 = vmatmul.mubr.f32.vlgmr.msra.gmra.mrb[4].mxu1 %v3293_v28  ;;  %3029 = vmatpush1.bf16.msra.mxu0 %v3028_v16  ;;  %v1640_v16 = vld [vmem:[#allocation6 + $0x1e0] sm:$0xff]  ;;  %v3727_v28 = vshrl.u32 %v702_v27, 7 }
 0x1b8   :  { %2972 = vmatpush3.bf16.msra.mxu1 %v2971_v17  ;;  %2423 = vmatprep.mubr.msk.f32.mxu1 %vm3496_vm0, %v3494_v0  ;;  %v1642_v17 = vld [vmem:[#allocation6 + $0x1f0] sm:$0xff]  ;;  %v1660_v27 = vld [vmem:[#allocation6 + $0x280] sm:$0xff] }
 0x1b9   :  { %2973 = vmatprep.subr.bf16.mxu1 %v3495_v23  ;;  %3031 = vmatprep.subr.bf16.mxu0 %v3030_v26  ;;  %v3056_v24 = vpack.c.bf16 %v1642_v17, %v1640_v16  ;;  %v2992_v26 = vpack.c.bf16 %v699_v18, %v694_v14  ;;  %v3735_v31 = vsub.s32 1, %v3727_v28  ;;  %v1661_v16 = vld [vmem:[#allocation6 + $0x288] sm:$0xff]  ;;  %v3166_v17 = vpack.c.bf16 %v1982_v10, %v1980_v9  ;;  %v1679_v9 = vld [vmem:[#allocation6 + $0x318] sm:$0xff] }
 0x1ba   :  { %v1979_v18 = vld [vmem:[#allocation9 + $0x60] sm:$0xff] }
 0x1bb   :  { %3033 = vmatpush1.bf16.msra.mxu0 %v3032_v29  ;;  %v3730_v29 = vsub.s32 0, %v3727_v28 }
 0x1bc   :  { %2975 = vmatpush3.bf16.msra.mxu1 %v2974_v30  ;;  %3035 = vmatprep.subr.bf16.mxu0 %v3034_v32  ;;  %v3732_v30 = vld [vmem:[#allocation4] sm:$0x1f] }
 0x1bd   :  { %2976 = vmatprep.subr.bf16.mxu1 %v3495_v23  ;;  %v705_v32 = vrot.slane %v3732_v30, %v3730_v29 }
 0x1bf   :  { %3037 = vmatpush1.bf16.msra.mxu0 %v3036_v40  ;;  %v1646_v40 = vld [vmem:[#allocation6 + $0x210] sm:$0xff] }
 0x1c0   :  { %2978 = vmatpush3.bf16.msra.mxu1 %v2977_v41  ;;  %3039 = vmatprep.subr.bf16.mxu0 %v3038_v43  ;;  %v1651_v43 = vld [vmem:[#allocation6 + $0x238] sm:$0xff]  ;;  %v3060_v47 = vpack.c.bf16 %v1646_v40, %v1644_v39  ;;  %v1988_v40 = vld [vmem:[#allocation9 + $0xa8] sm:$0xff] }
 0x1c1   :  { %2979 = vmatprep.subr.bf16.mxu1 %v3495_v23  ;;  %v3062_v53 = vpack.c.bf16 %v1651_v43, %v1649_v42  ;;  %v1667_v39 = vld [vmem:[#allocation6 + $0x2b8] sm:$0xff]  ;;  %v1664_v43 = vld [vmem:[#allocation6 + $0x2a0] sm:$0xff] }
 0x1c3   :  { %3041 = vmatpush1.bf16.msra.mxu0 %v3040_v33  ;;  %v1655_v33 = vld [vmem:[#allocation6 + $0x258] sm:$0xff] }
 0x1c4   :  { %2981 = vmatpush3.bf16.msra.mxu1 %v2980_v49  ;;  %3043 = vmatprep.subr.bf16.mxu0 %v3042_v51  ;;  %v1968_v49 = vld [vmem:[#allocation9 + $0x8] sm:$0xff]  ;;  %v1967_v51 = vld [vmem:[#allocation9] sm:$0xff] }
 0x1c5   :  { %2982 = vmatprep.subr.bf16.mxu1 %v3495_v23  ;;  %v3154_v54 = vpack.c.bf16 %v1970_v50, %v1968_v49  ;;  %v1989_v49 = vld [vmem:[#allocation9 + $0xb0] sm:$0xff] }
 0x1c6   :  { %v1671_v50 = vld [vmem:[#allocation6 + $0x2d8] sm:$0xff] }
 0x1c7   :  { %3045 = vmatpush1.bf16.msra.mxu0 %v3044_v57  ;;  %v3156_v57 = vpack.c.bf16 %v1969_v55, %v1967_v51  ;;  %v1992_v51 = vld [vmem:[#allocation9 + $0xc8] sm:$0xff] }
 0x1c8   :  { %2984 = vmatpush3.bf16.msra.mxu1 %v2983_v58  ;;  %3047 = vmatprep.subr.bf16.mxu0 %v3046_v61  ;;  %v1971_v58 = vld [vmem:[#allocation9 + $0x20] sm:$0xff]  ;;  %v1976_v61 = vld [vmem:[#allocation9 + $0x48] sm:$0xff] }
 0x1c9   :  { %2985 = vmatprep.subr.bf16.mxu1 %v3495_v23  ;;  %v3160_v35 = vpack.c.bf16 %v1973_v60, %v1971_v58  ;;  %v3162_v5 = vpack.c.bf16 %v1978_v62, %v1976_v61  ;;  %v1670_v55 = vld [vmem:[#allocation6 + $0x2d0] sm:$0xff]  ;;  %v1991_v58 = vld [vmem:[#allocation9 + $0xc0] sm:$0xff]  ;;  %v1675_v61 = vld [vmem:[#allocation6 + $0x2f8] sm:$0xff] }
 0x1ca   :  { %v1993_v60 = vld [vmem:[#allocation9 + $0xd0] sm:$0xff]  ;;  %v1996_v62 = vld [vmem:[#allocation9 + $0xe8] sm:$0xff] }
 0x1cb   :  { %3049 = vmatpush1.bf16.msra.mxu0 %v3048_v3  ;;  %v3066_v3 = vpack.c.bf16 %v1655_v33, %v1653_v48  ;;  %v1987_v33 = vld [vmem:[#allocation9 + $0xa0] sm:$0xff] }
 0x1cc   :  { %2987 = vmatpush3.bf16.msra.mxu1 %v2986_v4  ;;  %3051 = vmatprep.subr.bf16.mxu0 %v3050_v6  ;;  %v1657_v4 = vld [vmem:[#allocation6 + $0x268] sm:$0xff] }
 0x1cd   :  { %2988 = vmatprep.subr.bf16.mxu1 %v3495_v23  ;;  %v1975_v6 = vld [vmem:[#allocation9 + $0x40] sm:$0xff] }
 0x1ce   :  { %v3164_v14 = vpack.c.bf16 %v1977_v7, %v1975_v6  ;;  %v1995_v7 = vld [vmem:[#allocation9 + $0xe0] sm:$0xff] }
 0x1cf   :  { %3053 = vmatpush1.bf16.msra.mxu0 %v3052_v12  ;;  %v1656_v12 = vld [vmem:[#allocation6 + $0x260] sm:$0xff] }
 0x1d0   :  { %2990 = vmatpush3.bf16.msra.mxu1 %v2989_v13  ;;  %3055 = vmatprep.subr.bf16.mxu0 %v3054_v15  ;;  %v1658_v13 = vld [vmem:[#allocation6 + $0x270] sm:$0xff]  ;;  %v3070_v15 = vpack.c.bf16 %v1659_v8, %v1657_v4 }
 0x1d1   :  { %2991 = vmatprep.subr.bf16.mxu1 %v3495_v23  ;;  %v709_v23 = vrot.slane %v3732_v30, %v3735_v31  ;;  %v1997_v8 = vld [vmem:[#allocation9 + $0xf0] sm:$0xff] }
 0x1d3   :  { %3057 = vmatpush1.bf16.msra.mxu0 %v3056_v24  ;;  %v1984_v24 = vld [vmem:[#allocation9 + $0x88] sm:$0xff] }
 0x1d4   :  { %2993 = vmatpush3.bf16.msra.mxu1 %v2992_v26  ;;  %3059 = vmatprep.subr.bf16.mxu0 %v3058_v25  ;;  %v1986_v26 = vld [vmem:[#allocation9 + $0x98] sm:$0xff]  ;;  %v3072_v25 = vpack.c.bf16 %v1658_v13, %v1656_v12 }
 0x1d5   :  { %3155 = vmatprep.subr.bf16.mxu1 %v3154_v54  ;;  %v1668_v54 = vld [vmem:[#allocation6 + $0x2c0] sm:$0xff] }
 0x1d6   :  { %v3084_v1 = vpack.c.bf16 %v1670_v55, %v1668_v54  ;;  %v2002_v12 = vld [vmem:[#allocation9 + $0x118] sm:$0xff]  ;;  %v2012_v55 = vld [vmem:[#allocation9 + $0x168] sm:$0xff] }
 0x1d7   :  { %2424 = vmatmul.mubr.f32.vlgmr.msra.gmra.mrb[6].mxu1 %v3708_v59  ;;  %v1691_v54 = vld [vmem:[#allocation6 + $0x378] sm:$0xff] }
 0x1d8   :  { %3157 = vmatpush1.bf16.msra.mxu1 %v3156_v57  ;;  %v1673_v57 = vld [vmem:[#allocation6 + $0x2e8] sm:$0xff] }
 0x1d9   :  { %v3086_v4 = vpack.c.bf16 %v1675_v61, %v1673_v57  ;;  %v1688_v57 = vld [vmem:[#allocation6 + $0x360] sm:$0xff]  ;;  %v1693_v61 = vld [vmem:[#allocation6 + $0x388] sm:$0xff] }
 0x229   :  { %v935_v34 = vpop.f32.mrb[0].mxu0 }
 0x22a   :  { %v3250_v36 = vadd.f32 %v935_v34, %v705_v32  ;;  %v937_v59 = vpop.f32.mrb[1].mxu0  ;;  %v1662_v32 = vld [vmem:[#allocation6 + $0x290] sm:$0xff]  ;;  %v3074_v34 = vpack.c.bf16 %v1663_v22, %v1661_v16  ;;  %v1681_v22 = vld [vmem:[#allocation6 + $0x328] sm:$0xff] }
 0x22b   :  { %v3252_v37 = vadd.f32 %v937_v59, %v709_v23  ;;  %v3168_v23 = vpack.c.bf16 %v1981_v19, %v1979_v18  ;;  %v3170_v59 = vpack.c.bf16 %v1986_v26, %v1984_v24  ;;  %v3076_v42 = vpack.c.bf16 %v1662_v32, %v1660_v27  ;;  %v1678_v16 = vld [vmem:[#allocation6 + $0x310] sm:$0xff]  ;;  %v1999_v26 = vld [vmem:[#allocation9 + $0x100] sm:$0xff]  ;;  %v1683_v27 = vld [vmem:[#allocation6 + $0x338] sm:$0xff] }
 0x22c   :  { %v3251_v38 = vadd.f32 %v3250_v36, %v3700_v20  ;;  %v1972_v20 = vld [vmem:[#allocation9 + $0x28] sm:$0xff]  ;;  %v3184_v18 = vpack.c.bf16 %v1997_v8, %v1995_v7 }
 0x22d   :  { %v3253_v41 = vadd.f32 %v3252_v37, %v3702_v21  ;;  %v3158_v21 = vpack.c.bf16 %v1974_v56, %v1972_v20  ;;  %v1665_v36 = vld [vmem:[#allocation6 + $0x2a8] sm:$0xff]  ;;  %v3176_v20 = vpack.c.bf16 %v1989_v49, %v1987_v33 }
 0x22e   :  { %v1575_v52 = vmax.f32 %v3251_v38, 0.0  ;;  %v1983_v37 = vld [vmem:[#allocation9 + $0x80] sm:$0xff]  ;;  %v1985_v38 = vld [vmem:[#allocation9 + $0x90] sm:$0xff]  ;;  %v2004_v32 = vld [vmem:[#allocation9 + $0x128] sm:$0xff] }
 0x22f   :  { %v1576_v46 = vmax.f32 %v3253_v41, 0.0  ;;  %3159 = vmatprep.subr.bf16.mxu1 %v3158_v21  ;;  %v1990_v41 = vld [vmem:[#allocation9 + $0xb8] sm:$0xff]  ;;  %v3172_v45 = vpack.c.bf16 %v1985_v38, %v1983_v37  ;;  %v3094_v38 = vpack.c.bf16 %v1683_v27, %v1681_v22  ;;  %v2019_v27 = vld [vmem:[#allocation9 + $0x1a0] sm:$0xff] }
 0x230   :  { %3161 = vmatpush1.bf16.msra.mxu1 %v3160_v35  ;;  %v3174_v48 = vpack.c.bf16 %v1990_v41, %v1988_v40  ;;  %v1674_v35 = vld [vmem:[#allocation6 + $0x2f0] sm:$0xff]  ;;  %v2003_v41 = vld [vmem:[#allocation9 + $0x120] sm:$0xff] }
 0x231   :  { %1816 = vmatprep.mubr.f32.mxu0 %v1576_v46  ;;  %3163 = vmatprep.subr.bf16.mxu1 %v3162_v5  ;;  %v3078_v46 = vpack.c.bf16 %v1667_v39, %v1665_v36  ;;  %v1677_v5 = vld [vmem:[#allocation6 + $0x308] sm:$0xff]  ;;  %v1680_v36 = vld [vmem:[#allocation6 + $0x320] sm:$0xff] }
 0x232   :  { %1817 = vmatmul.mubr.f32.vlgmr.msra.gmra.mrb[6].mxu0 %v1575_v52  ;;  %v1994_v52 = vld [vmem:[#allocation9 + $0xd8] sm:$0xff]  ;;  %v3090_v19 = vpack.c.bf16 %v1679_v9, %v1677_v5  ;;  %v1685_v39 = vld [vmem:[#allocation6 + $0x348] sm:$0xff] }
 0x233   :  { %3061 = vmatpush1.bf16.msra.mxu0 %v3060_v47  ;;  %v1669_v47 = vld [vmem:[#allocation6 + $0x2c8] sm:$0xff]  ;;  %v3178_v21 = vpack.c.bf16 %v1994_v52, %v1992_v51  ;;  %v1692_v5 = vld [vmem:[#allocation6 + $0x380] sm:$0xff] }
 0x234   :  { %3063 = vmatprep.subr.bf16.mxu0 %v3062_v53  ;;  %3165 = vmatpush1.bf16.msra.mxu1 %v3164_v14  ;;  %v3080_v53 = vpack.c.bf16 %v1666_v44, %v1664_v43  ;;  %v3082_v56 = vpack.c.bf16 %v1671_v50, %v1669_v47  ;;  %v3088_v14 = vpack.c.bf16 %v1674_v35, %v1672_v2  ;;  %v1687_v43 = vld [vmem:[#allocation6 + $0x358] sm:$0xff]  ;;  %v2008_v44 = vld [vmem:[#allocation9 + $0x148] sm:$0xff]  ;;  %v1684_v47 = vld [vmem:[#allocation6 + $0x340] sm:$0xff] }
 0x235   :  { %3167 = vmatprep.subr.bf16.mxu1 %v3166_v17  ;;  %v3098_v49 = vpack.c.bf16 %v1687_v43, %v1685_v39  ;;  %v1689_v50 = vld [vmem:[#allocation6 + $0x368] sm:$0xff]  ;;  %v1695_v2 = vld [vmem:[#allocation6 + $0x398] sm:$0xff] }
 0x236   :  { %v2007_v52 = vld [vmem:[#allocation9 + $0x140] sm:$0xff]  ;;  %v2016_v35 = vld [vmem:[#allocation9 + $0x188] sm:$0xff]  ;;  %v3106_v8 = vpack.c.bf16 %v1695_v2, %v1693_v61 }
 0x237   :  { %3065 = vmatpush1.bf16.msra.mxu0 %v3064_v63  ;;  %v1998_v63 = vld [vmem:[#allocation9 + $0xf8] sm:$0xff]  ;;  %v1697_v9 = vld [vmem:[#allocation6 + $0x3a8] sm:$0xff] }
 0x238   :  { %3067 = vmatprep.subr.bf16.mxu0 %v3066_v3  ;;  %3169 = vmatpush1.bf16.msra.mxu1 %v3168_v23  ;;  %v3180_v3 = vpack.c.bf16 %v1993_v60, %v1991_v58  ;;  %v3182_v6 = vpack.c.bf16 %v1998_v63, %v1996_v62  ;;  %v2006_v23 = vld [vmem:[#allocation9 + $0x138] sm:$0xff]  ;;  %v3102_v60 = vpack.c.bf16 %v1691_v54, %v1689_v50  ;;  %v2011_v63 = vld [vmem:[#allocation9 + $0x160] sm:$0xff]  ;;  %v1706_v50 = vld [vmem:[#allocation6 + $0x3f0] sm:$0xff] }
 0x239   :  { %3171 = vmatprep.subr.bf16.mxu1 %v3170_v59  ;;  %v1682_v59 = vld [vmem:[#allocation6 + $0x330] sm:$0xff]  ;;  %v3190_v40 = vpack.c.bf16 %v2006_v23, %v2004_v32  ;;  %v1703_v23 = vld [vmem:[#allocation6 + $0x3d8] sm:$0xff]  ;;  %v1708_v61 = vld [vmem:[#allocation6 + $0x400] sm:$0xff] }
 0x23a   :  { %v2021_v32 = vld [vmem:[#allocation9 + $0x1b0] sm:$0xff] }
 0x23b   :  { %3069 = vmatpush1.bf16.msra.mxu0 %v3068_v11  ;;  %v2000_v11 = vld [vmem:[#allocation9 + $0x108] sm:$0xff] }
 0x23c   :  { %3071 = vmatprep.subr.bf16.mxu0 %v3070_v15  ;;  %3173 = vmatpush1.bf16.msra.mxu1 %v3172_v45  ;;  %v1676_v15 = vld [vmem:[#allocation6 + $0x300] sm:$0xff]  ;;  %v3186_v24 = vpack.c.bf16 %v2002_v12, %v2000_v11  ;;  %v2017_v12 = vld [vmem:[#allocation9 + $0x190] sm:$0xff] }
 0x23d   :  { %3175 = vmatprep.subr.bf16.mxu1 %v3174_v48  ;;  %v2010_v45 = vld [vmem:[#allocation9 + $0x158] sm:$0xff]  ;;  %v1686_v48 = vld [vmem:[#allocation6 + $0x350] sm:$0xff]  ;;  %v2015_v11 = vld [vmem:[#allocation9 + $0x180] sm:$0xff] }
 0x23e   :  { %v3194_v51 = vpack.c.bf16 %v2010_v45, %v2008_v44  ;;  %v3204_v22 = vpack.c.bf16 %v2017_v12, %v2015_v11  ;;  %v1705_v44 = vld [vmem:[#allocation6 + $0x3e8] sm:$0xff]  ;;  %v1707_v45 = vld [vmem:[#allocation6 + $0x3f8] sm:$0xff]  ;;  %v1716_v11 = vld [vmem:[#allocation6 + $0x440] sm:$0xff] }
 0x23f   :  { %3073 = vmatpush1.bf16.msra.mxu0 %v3072_v25  ;;  %v2001_v25 = vld [vmem:[#allocation9 + $0x110] sm:$0xff] }
 0x240   :  { %3075 = vmatprep.subr.bf16.mxu0 %v3074_v34  ;;  %3177 = vmatpush1.bf16.msra.mxu1 %v3176_v20  ;;  %v3092_v34 = vpack.c.bf16 %v1678_v16, %v1676_v15  ;;  %v3188_v37 = vpack.c.bf16 %v2001_v25, %v1999_v26  ;;  %v2014_v20 = vld [vmem:[#allocation9 + $0x178] sm:$0xff]  ;;  %v1701_v26 = vld [vmem:[#allocation6 + $0x3c8] sm:$0xff]  ;;  %v1718_v12 = vld [vmem:[#allocation6 + $0x450] sm:$0xff] }
 0x241   :  { %3179 = vmatprep.subr.bf16.mxu1 %v3178_v21  ;;  %v1690_v21 = vld [vmem:[#allocation6 + $0x370] sm:$0xff]  ;;  %v3198_v62 = vpack.c.bf16 %v2014_v20, %v2012_v55  ;;  %v2022_v15 = vld [vmem:[#allocation9 + $0x1b8] sm:$0xff]  ;;  %v3114_v39 = vpack.c.bf16 %v1703_v23, %v1701_v26 }
 0x242   :  { %v1731_v23 = vld [vmem:[#allocation6 + $0x4b8] sm:$0xff] }
 0x243   :  { %3077 = vmatpush1.bf16.msra.mxu0 %v3076_v42  ;;  %v2005_v42 = vld [vmem:[#allocation9 + $0x130] sm:$0xff] }
 0x244   :  { %3079 = vmatprep.subr.bf16.mxu0 %v3078_v46  ;;  %3181 = vmatpush1.bf16.msra.mxu1 %v3180_v3  ;;  %v3096_v46 = vpack.c.bf16 %v1682_v59, %v1680_v36  ;;  %v3192_v33 = vpack.c.bf16 %v2005_v42, %v2003_v41  ;;  %v2018_v3 = vld [vmem:[#allocation9 + $0x198] sm:$0xff]  ;;  %v1702_v42 = vld [vmem:[#allocation6 + $0x3d0] sm:$0xff] }
 0x245   :  { %3183 = vmatprep.subr.bf16.mxu1 %v3182_v6  ;;  %v1694_v6 = vld [vmem:[#allocation6 + $0x390] sm:$0xff]  ;;  %v2026_v36 = vld [vmem:[#allocation9 + $0x1d8] sm:$0xff] }
 0x246   :  { %v3108_v16 = vpack.c.bf16 %v1694_v6, %v1692_v5  ;;  %v1700_v41 = vld [vmem:[#allocation6 + $0x3c0] sm:$0xff]  ;;  %v1714_v6 = vld [vmem:[#allocation6 + $0x430] sm:$0xff] }
 0x247   :  { %3081 = vmatpush1.bf16.msra.mxu0 %v3080_v53  ;;  %v2009_v53 = vld [vmem:[#allocation9 + $0x150] sm:$0xff]  ;;  %v1712_v5 = vld [vmem:[#allocation6 + $0x420] sm:$0xff] }
 0x248   :  { %3083 = vmatprep.subr.bf16.mxu0 %v3082_v56  ;;  %3185 = vmatpush1.bf16.msra.mxu1 %v3184_v18  ;;  %v3100_v56 = vpack.c.bf16 %v1686_v48, %v1684_v47  ;;  %v3196_v58 = vpack.c.bf16 %v2009_v53, %v2007_v52  ;;  %v1696_v18 = vld [vmem:[#allocation6 + $0x3a0] sm:$0xff]  ;;  %v1709_v52 = vld [vmem:[#allocation6 + $0x408] sm:$0xff]  ;;  %v1711_v53 = vld [vmem:[#allocation6 + $0x418] sm:$0xff] }
 0x249   :  { %v2266_v10 = vpop.f32.mrb[2].mxu0  ;;  %3187 = vmatprep.subr.bf16.mxu1 %v3186_v24 }
 0x24a   :  { %v2267_v13 = vpop.f32.mrb[3].mxu0 }
 0x24b   :  { %3085 = vmatpush1.bf16.msra.mxu0 %v3084_v1  ;;  %v3743_v17 = vadd.f32 %v2267_v13, %v2266_v10  ;;  %v2013_v1 = vld [vmem:[#allocation9 + $0x170] sm:$0xff]  ;;  %v3202_v10 = vpack.c.bf16 %v2018_v3, %v2016_v35 }
 0x24c   :  { %3087 = vmatprep.subr.bf16.mxu0 %v3086_v4  ;;  %3189 = vmatpush1.bf16.msra.mxu1 %v3188_v37  ;;  %v3104_v4 = vpack.c.bf16 %v1690_v21, %v1688_v57  ;;  %v3200_v7 = vpack.c.bf16 %v2013_v1, %v2011_v63  ;;  %v1699_v13 = vld [vmem:[#allocation6 + $0x3b8] sm:$0xff]  ;;  %v3208_v37 = vpack.c.bf16 %v2021_v32, %v2019_v27  ;;  %v1713_v63 = vld [vmem:[#allocation6 + $0x428] sm:$0xff]  ;;  %v1724_v27 = vld [vmem:[#allocation6 + $0x480] sm:$0xff] }
 0x24d   :  { %3191 = vmatprep.subr.bf16.mxu1 %v3190_v40  ;;  %v3110_v24 = vpack.c.bf16 %v1699_v13, %v1697_v9  ;;  %v716_v40 = vsub.s32 3, %v3727_v28  ;;  %v1715_v1 = vld [vmem:[#allocation6 + $0x438] sm:$0xff]  ;;  %v3128_v9 = vpack.c.bf16 %v1714_v6, %v1712_v5  ;;  %v1721_v13 = vld [vmem:[#allocation6 + $0x468] sm:$0xff]  ;;  %v1740_v6 = vld [vmem:[#allocation7] sm:$0x3] }
 0x24e   :  { %v1729_v32 = vld [vmem:[#allocation6 + $0x4a8] sm:$0xff] }
 0x24f   :  { %3089 = vmatpush1.bf16.msra.mxu0 %v3088_v14  ;;  %v2020_v14 = vld [vmem:[#allocation9 + $0x1a8] sm:$0xff]  ;;  %v717_v48 = vrot.slane %v3732_v30, %v716_v40 }
 0x250   :  { %3091 = vmatprep.subr.bf16.mxu0 %v3090_v19  ;;  %3193 = vmatpush1.bf16.msra.mxu1 %v3192_v33  ;;  %v1698_v19 = vld [vmem:[#allocation6 + $0x3b0] sm:$0xff]  ;;  %v3206_v25 = vpack.c.bf16 %v2022_v15, %v2020_v14  ;;  %v3118_v33 = vpack.c.bf16 %v1707_v45, %v1705_v44  ;;  %v1723_v14 = vld [vmem:[#allocation6 + $0x478] sm:$0xff]  ;;  %v3132_v15 = vpack.c.bf16 %v1718_v12, %v1716_v11  ;;  %v1737_v45 = vld [vmem:[#allocation6 + $0x4e8] sm:$0xff] }
 0x251   :  { %3195 = vmatprep.subr.bf16.mxu1 %v3194_v51  ;;  %v3112_v59 = vpack.c.bf16 %v1698_v19, %v1696_v18  ;;  %v1720_v18 = vld [vmem:[#allocation6 + $0x460] sm:$0xff]  ;;  %v1722_v19 = vld [vmem:[#allocation6 + $0x470] sm:$0xff] }
 0x252   :  { %v3136_v26 = vpack.c.bf16 %v1722_v19, %v1720_v18  ;;  %v1734_v44 = vld [vmem:[#allocation6 + $0x4d0] sm:$0xff]  ;;  %v2114_v12 = vld [vmem:[#allocation12] sm:$0xff] }
 0x253   :  { %3093 = vmatpush1.bf16.msra.mxu0 %v3092_v34  ;;  %v2024_v34 = vld [vmem:[#allocation9 + $0x1c8] sm:$0xff] }
 0x254   :  { %3095 = vmatprep.subr.bf16.mxu0 %v3094_v38  ;;  %3197 = vmatpush1.bf16.msra.mxu1 %v3196_v58  ;;  %v712_v38 = vsub.s32 2, %v3727_v28  ;;  %v3210_v43 = vpack.c.bf16 %v2026_v36, %v2024_v34  ;;  %v3142_v36 = vpack.c.bf16 %v1731_v23, %v1729_v32  ;;  %v2131_v5 = vld [vmem:[#allocation12 + $0x88] sm:$0xff] }
 0x255   :  { %3199 = vmatprep.subr.bf16.mxu1 %v3198_v62  ;;  %v1710_v62 = vld [vmem:[#allocation6 + $0x410] sm:$0xff] }
 0x256   :  { %v713_v47 = vrot.slane %v3732_v30, %v712_v38  ;;  %v3124_v35 = vpack.c.bf16 %v1710_v62, %v1708_v61  ;;  %v1733_v38 = vld [vmem:[#allocation6 + $0x4c8] sm:$0xff]  ;;  %v2025_v61 = vld [vmem:[#allocation9 + $0x1d0] sm:$0xff] }
 0x257   :  { %3097 = vmatpush1.bf16.msra.mxu0 %v3096_v46  ;;  %v3116_v46 = vpack.c.bf16 %v1702_v42, %v1700_v41  ;;  %v720_v41 = vsub.s32 4, %v3727_v28 }
 0x258   :  { %3099 = vmatprep.subr.bf16.mxu0 %v3098_v49  ;;  %3201 = vmatpush1.bf16.msra.mxu1 %v3200_v7  ;;  %v1704_v49 = vld [vmem:[#allocation6 + $0x3e0] sm:$0xff]  ;;  %v1717_v7 = vld [vmem:[#allocation6 + $0x448] sm:$0xff] }
 0x259   :  { %3203 = vmatprep.subr.bf16.mxu1 %v3202_v10 }
 0x25b   :  { %3101 = vmatpush1.bf16.msra.mxu0 %v3100_v56  ;;  %v3120_v56 = vpack.c.bf16 %v1706_v50, %v1704_v49  ;;  %v1736_v49 = vld [vmem:[#allocation6 + $0x4e0] sm:$0xff]  ;;  %v1738_v50 = vld [vmem:[#allocation6 + $0x4f0] sm:$0xff] }
 0x25c   :  { %3103 = vmatprep.subr.bf16.mxu0 %v3102_v60  ;;  %3205 = vmatpush1.bf16.msra.mxu1 %v3204_v22  ;;  %v3122_v60 = vpack.c.bf16 %v1711_v53, %v1709_v52  ;;  %v1725_v22 = vld [vmem:[#allocation6 + $0x488] sm:$0xff]  ;;  %v3152_v53 = vpack.c.bf16 %v1738_v50, %v1736_v49 }
 0x25d   :  { %3207 = vmatprep.subr.bf16.mxu1 %v3206_v25 }
 0x25f   :  { %3105 = vmatpush1.bf16.msra.mxu0 %v3104_v4  ;;  %v3126_v4 = vpack.c.bf16 %v1715_v1, %v1713_v63  ;;  %v2028_v63 = vld [vmem:[#allocation9 + $0x1e8] sm:$0xff]  ;;  %v2030_v1 = vld [vmem:[#allocation9 + $0x1f8] sm:$0xff] }
 0x260   :  { %3107 = vmatprep.subr.bf16.mxu0 %v3106_v8  ;;  %3209 = vmatpush1.bf16.msra.mxu1 %v3208_v37  ;;  %v1719_v8 = vld [vmem:[#allocation6 + $0x458] sm:$0xff]  ;;  %v1730_v37 = vld [vmem:[#allocation6 + $0x4b0] sm:$0xff] }
 0x261   :  { %3211 = vmatprep.subr.bf16.mxu1 %v3210_v43  ;;  %v3130_v10 = vpack.c.bf16 %v1719_v8, %v1717_v7  ;;  %v1732_v43 = vld [vmem:[#allocation6 + $0x4c0] sm:$0xff]  ;;  %v1745_v7 = vrot.slane %v1740_v6, %v3730_v29  ;;  %v1749_v8 = vrot.slane %v1740_v6, %v3735_v31 }
 0x262   :  { %v2233_v6 = vld [vmem:[#allocation13] ss:$0 sm:$0xff] }
 0x263   :  { %3109 = vmatpush1.bf16.msra.mxu0 %v3108_v16  ;;  %v3134_v16 = vpack.c.bf16 %v1723_v14, %v1721_v13  ;;  %v2115_v13 = vld [vmem:[#allocation12 + $0x8] sm:$0xff] }
 0x264   :  { %3111 = vmatprep.subr.bf16.mxu0 %v3110_v24  ;;  %v1727_v24 = vld [vmem:[#allocation6 + $0x498] sm:$0xff]  ;;  %v3220_v19 = vpack.c.bf16 %v2115_v13, %v2114_v12 }
 0x265   :  { %v3138_v25 = vpack.c.bf16 %v1727_v24, %v1725_v22 }
 0x267   :  { %3113 = vmatpush1.bf16.msra.mxu0 %v3112_v59  ;;  %v1728_v59 = vld [vmem:[#allocation6 + $0x4a0] sm:$0xff] }
 0x268   :  { %3115 = vmatprep.subr.bf16.mxu0 %v3114_v39  ;;  %v1735_v39 = vld [vmem:[#allocation6 + $0x4d8] sm:$0xff]  ;;  %v3144_v40 = vpack.c.bf16 %v1730_v37, %v1728_v59 }
 0x269   :  { %v2336_v51 = vpop.f32.mrb[4].mxu0  ;;  %v3146_v42 = vpack.c.bf16 %v1735_v39, %v1733_v38  ;;  %v2136_v59 = vld [vmem:[#allocation12 + $0xb0] sm:$0xff]  ;;  %v2137_v37 = vld [vmem:[#allocation12 + $0xb8] sm:$0xff] }
 0x26a   :  { %v1290_v54 = vpop.f32.mrb[2].mxu1  ;;  %v2337_v55 = vpop.f32.mrb[5].mxu0  ;;  %v3230_v39 = vpack.c.bf16 %v2137_v37, %v2136_v59 }
 0x26b   :  { %v1292_v20 = vpop.f32.mrb[3].mxu1  ;;  %3117 = vmatpush1.bf16.msra.mxu0 %v3116_v46  ;;  %v3749_v57 = vadd.f32 %v2337_v55, %v2336_v51  ;;  %v3254_v21 = vadd.f32 %v1290_v54, %v713_v47  ;;  %v1739_v46 = vld [vmem:[#allocation6 + $0x4f8] sm:$0xff]  ;;  %v3148_v47 = vpack.c.bf16 %v1734_v44, %v1732_v43  ;;  %v2139_v43 = vld [vmem:[#allocation12 + $0xc8] sm:$0xff] }
 0x26c   :  { %v3255_v58 = vadd.f32 %v1292_v20, %v717_v48  ;;  %3119 = vmatprep.subr.bf16.mxu0 %v3118_v33  ;;  %v721_v48 = vrot.slane %v3732_v30, %v720_v41  ;;  %v3150_v33 = vpack.c.bf16 %v1739_v46, %v1737_v45  ;;  %v2121_v41 = vld [vmem:[#allocation12 + $0x38] sm:$0xff]  ;;  %v2122_v46 = vld [vmem:[#allocation12 + $0x40] sm:$0xff] }
 0x26d   :  { %v1577_v3 = vmax.f32 %v3254_v21, 0.0 }
 0x26e   :  { %v1578_v2 = vmax.f32 %v3255_v58, 0.0  ;;  %v1362_v28 = vadd.f32 %v3743_v17, %v721_v48  ;;  %v2029_v17 = vld [vmem:[#allocation9 + $0x1f0] sm:$0xff] }
 0x26f   :  { %3121 = vmatpush1.bf16.msra.mxu0 %v3120_v56  ;;  %v2140_v48 = vld [vmem:[#allocation12 + $0xd0] sm:$0xff] }
 0x270   :  { %1887 = vmatprep.mubr.f32.mxu0 %v1578_v2  ;;  %3123 = vmatprep.subr.bf16.mxu0 %v3122_v60  ;;  %v2023_v60 = vld [vmem:[#allocation9 + $0x1c0] sm:$0xff]  ;;  %v3214_v2 = vpack.c.bf16 %v2030_v1, %v2028_v63 }
 0x271   :  { %v3212_v62 = vpack.c.bf16 %v2025_v61, %v2023_v60  ;;  %v2128_v61 = vld [vmem:[#allocation12 + $0x70] sm:$0xff]  ;;  %v2031_v1 = vld [vmem:[#allocation10] sm:$0x3] }
 0x272   :  { %1888 = vmatmul.mubr.f32.vlgmr.msra.gmra.mrb[6].mxu0 %v1577_v3 }
 0x273   :  { %3125 = vmatpush1.bf16.msra.mxu0 %v3124_v35  ;;  %1958 = vmatprep.mubr.f32.mxu0 %v3494_v0  ;;  %v1726_v0 = vld [vmem:[#allocation6 + $0x490] sm:$0xff]  ;;  %v2027_v35 = vld [vmem:[#allocation9 + $0x1e0] sm:$0xff] }
 0x274   :  { %3127 = vmatprep.subr.bf16.mxu0 %v3126_v4  ;;  %v3140_v34 = vpack.c.bf16 %v1726_v0, %v1724_v27  ;;  %3213 = vmatpush1.bf16.msra.mxu1 %v3212_v62  ;;  %v3216_v3 = vpack.c.bf16 %v2029_v17, %v2027_v35  ;;  %v2130_v4 = vld [vmem:[#allocation12 + $0x80] sm:$0xff]  ;;  %v2135_v0 = vld [vmem:[#allocation12 + $0xa8] sm:$0xff]  ;;  %v2129_v62 = vld [vmem:[#allocation12 + $0x78] sm:$0xff]  ;;  %v2036_v35 = vrot.slane %v2031_v1, %v3730_v29 }
 0x275   :  { %3215 = vmatprep.subr.bf16.mxu1 %v3214_v2  ;;  %v2134_v27 = vld [vmem:[#allocation12 + $0xa0] sm:$0xff]  ;;  %v3248_v63 = vpack.c.bf16 %v2129_v62, %v2128_v61  ;;  %v2040_v2 = vrot.slane %v2031_v1, %v3735_v31 }
 0x276   :  { %v3226_v23 = vpack.c.bf16 %v2135_v0, %v2134_v27 }
 0x277   :  { %3129 = vmatpush1.bf16.msra.mxu0 %v3128_v9 }
 0x278   :  { %3131 = vmatprep.subr.bf16.mxu0 %v3130_v10  ;;  %3217 = vmatpush1.bf16.msra.mxu1 %v3216_v3 }
 0x27b   :  { %3133 = vmatpush1.bf16.msra.mxu0 %v3132_v15  ;;  %v2132_v15 = vld [vmem:[#allocation12 + $0x90] sm:$0xff] }
 0x27c   :  { %3135 = vmatprep.subr.bf16.mxu0 %v3134_v16  ;;  %v2133_v16 = vld [vmem:[#allocation12 + $0x98] sm:$0xff] }
 0x27d   :  { %v3222_v24 = vpack.c.bf16 %v2133_v16, %v2132_v15 }
 0x27f   :  { %3137 = vmatpush1.bf16.msra.mxu0 %v3136_v26  ;;  %v2116_v26 = vld [vmem:[#allocation12 + $0x10] sm:$0xff] }
 0x280   :  { %3139 = vmatprep.subr.bf16.mxu0 %v3138_v25  ;;  %v2117_v25 = vld [vmem:[#allocation12 + $0x18] sm:$0xff] }
 0x281   :  { %v3224_v32 = vpack.c.bf16 %v2117_v25, %v2116_v26 }
 0x283   :  { %3141 = vmatpush1.bf16.msra.mxu0 %v3140_v34  ;;  %v2118_v34 = vld [vmem:[#allocation12 + $0x20] sm:$0xff] }
 0x284   :  { %3143 = vmatprep.subr.bf16.mxu0 %v3142_v36  ;;  %v2119_v36 = vld [vmem:[#allocation12 + $0x28] sm:$0xff] }
 0x285   :  { %v3228_v38 = vpack.c.bf16 %v2119_v36, %v2118_v34 }
 0x287   :  { %3145 = vmatpush1.bf16.msra.mxu0 %v3144_v40  ;;  %v2120_v40 = vld [vmem:[#allocation12 + $0x30] sm:$0xff] }
 0x288   :  { %3147 = vmatprep.subr.bf16.mxu0 %v3146_v42  ;;  %v2138_v42 = vld [vmem:[#allocation12 + $0xc0] sm:$0xff]  ;;  %v3232_v44 = vpack.c.bf16 %v2121_v41, %v2120_v40 }
 0x289   :  { %v3234_v45 = vpack.c.bf16 %v2139_v43, %v2138_v42 }
 0x28a   :  { %v2301_v51 = vpop.f32.mrb[4].mxu1 }
 0x28b   :  { %v2302_v52 = vpop.f32.mrb[5].mxu1  ;;  %3149 = vmatpush1.bf16.msra.mxu0 %v3148_v47  ;;  %v2123_v47 = vld [vmem:[#allocation12 + $0x48] sm:$0xff] }
 0x28c   :  { %v2303_v54 = vadd.f32 %v2302_v52, %v2301_v51  ;;  %3151 = vmatprep.subr.bf16.mxu0 %v3150_v33  ;;  %v2141_v33 = vld [vmem:[#allocation12 + $0xd8] sm:$0xff]  ;;  %v3236_v49 = vpack.c.bf16 %v2123_v47, %v2122_v46  ;;  %v2124_v51 = vld [vmem:[#allocation12 + $0x50] sm:$0xff] }
 0x28d   :  { %v3238_v50 = vpack.c.bf16 %v2141_v33, %v2140_v48  ;;  %v2125_v52 = vld [vmem:[#allocation12 + $0x58] sm:$0xff] }
 0x28e   :  { %v1432_v55 = vadd.f32 %v2303_v54, %v1362_v28  ;;  %v2143_v28 = vld [vmem:[#allocation12 + $0xe8] sm:$0xff]  ;;  %v3240_v54 = vpack.c.bf16 %v2125_v52, %v2124_v51 }
 0x28f   :  { %3153 = vmatpush1.bf16.msra.mxu0 %v3152_v53  ;;  %v2142_v53 = vld [vmem:[#allocation12 + $0xe0] sm:$0xff] }
 0x290   :  { %v1502_v20 = vadd.f32 %v3749_v57, %v1432_v55  ;;  %v3218_v57 = vpack.c.bf16 %v2131_v5, %v2130_v4  ;;  %v3242_v55 = vpack.c.bf16 %v2143_v28, %v2142_v53 }
 0x292   :  { %3219 = vmatprep.subr.bf16.mxu1 %v3218_v57 }
 0x2aa   :  { %v1571_v56 = vpop.f32.mrb[6].mxu1 }
 0x2ab   :  { %v1572_v21 = vadd.f32 %v1571_v56, %v1502_v20  ;;  %v2425_v58 = vpop.f32.mrb[7].mxu1  ;;  %v2126_v20 = vld [vmem:[#allocation12 + $0x60] sm:$0xff]  ;;  %v2127_v56 = vld [vmem:[#allocation12 + $0x68] sm:$0xff] }
 0x2ac   :  { %v2144_v58 = vld [vmem:[#allocation12 + $0xf0] sm:$0xff] }
 0x2ad   :  { %v1579_v30 = vmax.f32 %v1572_v21, 0.0  ;;  %v3244_v21 = vpack.c.bf16 %v2127_v56, %v2126_v20 }
 0x2af   :  { %1959 = vmatmul.mubr.f32.vlgmr.msra.gmra.mrb[6].mxu0 %v1579_v30  ;;  %v2145_v30 = vld [vmem:[#allocation12 + $0xf8] sm:$0xff] }
 0x2b0   :  { %v3246_v60 = vpack.c.bf16 %v2145_v30, %v2144_v58 }
 0x382   :  { %v1960_v9 = vpop.f32.mrb[6].mxu0 }
 0x383   :  { %v3256_v10 = vadd.f32 %v1960_v9, %v1745_v7  ;;  %v1962_v11 = vpop.f32.mrb[7].mxu0 }
 0x384   :  { %v3257_v14 = vadd.f32 %v1962_v11, %v1749_v8 }
 0x385   :  { %v1965_v22 = vmax.f32 %v3256_v10, 0.0 }
 0x386   :  { %v1966_v18 = vmax.f32 %v3257_v14, 0.0 }
 0x388   :  { %2107 = vmatprep.mubr.f32.mxu1 %v1966_v18 }
 0x389   :  { %2108 = vmatmul.mubr.f32.vlgmr.msra.gmra.mrb[8].mxu1 %v1965_v22 }
 0x38a   :  { %3221 = vmatpush3.bf16.msra.mxu1 %v3220_v19 }
 0x38b   :  { %3223 = vmatprep.subr.bf16.mxu1 %v3222_v24 }
 0x38e   :  { %3225 = vmatpush3.bf16.msra.mxu1 %v3224_v32 }
 0x38f   :  { %3227 = vmatprep.subr.bf16.mxu1 %v3226_v23 }
 0x392   :  { %3229 = vmatpush3.bf16.msra.mxu1 %v3228_v38 }
 0x393   :  { %3231 = vmatprep.subr.bf16.mxu1 %v3230_v39 }
 0x396   :  { %3233 = vmatpush3.bf16.msra.mxu1 %v3232_v44 }
 0x397   :  { %3235 = vmatprep.subr.bf16.mxu1 %v3234_v45 }
 0x39a   :  { %3237 = vmatpush3.bf16.msra.mxu1 %v3236_v49 }
 0x39b   :  { %3239 = vmatprep.subr.bf16.mxu1 %v3238_v50 }
 0x39e   :  { %3241 = vmatpush3.bf16.msra.mxu1 %v3240_v54 }
 0x39f   :  { %3243 = vmatprep.subr.bf16.mxu1 %v3242_v55 }
 0x3a2   :  { %3245 = vmatpush3.bf16.msra.mxu1 %v3244_v21 }
 0x3a3   :  { %3247 = vmatprep.subr.bf16.mxu1 %v3246_v60 }
 0x3a6   :  { %3249 = vmatpush3.bf16.msra.mxu1 %v3248_v63 }
 0x45c   :  { %v2109_v17 = vpop.f32.mrb[8].mxu1 }
 0x45d   :  { %v2111_v3 = vpop.f32.mrb[9].mxu1  ;;  %v2110_v5 = vadd.f32 %v2109_v17, %v2036_v35 }
 0x45e   :  { %v2112_v4 = vadd.f32 %v2111_v3, %v2040_v2 }
 0x460   :  { %2217 = vmatprep.mubr.f32.mxu1 %v2112_v4 }
 0x461   :  { %2218 = vmatmul.mubr.f32.vlgmr.msra.gmra.mrb[10].mxu1 %v2110_v5 }
 0x534   :  { %v2388_v57 = vpop.f32.mrb[10].mxu1 }
 0x535   :  { %v2389_v7 = vpop.f32.mrb[11].mxu1 }
 0x536   :  { %v2390_v8 = vadd.f32 %v2389_v7, %v2388_v57 }
 0x538   :  { %v2220_v9 = vadd.f32 %v2390_v8, %v2233_v6 }
 0x53a   :  { %2223 = vst [vmem:[%s3772_s9] sm:$0xff] %v2220_v9 }
 0x53b   :  { %2228 = vsyncpa [#allocation3], 1 }
 0x53c   :  { %2229 = vsyncpa [#allocation5], 1 }
 0x53d   :  { %2230 = vsyncpa [#allocation8], 1 }
 0x53e   :  { %2231 = vsyncpa [#allocation11], 1 }
 0x53f   :  { %2232 = vsyncpa [#allocation14], 1 }

</bundles_post_ra>
